<compile_context>
chip_gen: v5e
topology: v5e:2x2
jax: 0.10.0
libtpu: 0.0.40
codegen_flags: <defaults>
</compile_context>

<pallas_src>
import functools
import math

import jax
import jax.numpy as jnp
from jax.experimental import pallas as pl
from jax.experimental.pallas import tpu as pltpu


IN_DIM = 13
HIDDEN = 128
OUT_DIM = 4
HEAD_DIM = 2 * OUT_DIM  # fused mu||std head

_SQRT_2_OVER_PI = math.sqrt(2.0 / math.pi)
_INV_SQRT2 = 1.0 / math.sqrt(2.0)


def _gelu_exact(x):
    # PyTorch F.gelu default = exact erf formulation (VPU polynomial).
    return 0.5 * x * (1.0 + jax.lax.erf(x * _INV_SQRT2))


def _gelu_tanh(x):
    # PyTorch F.gelu(approximate='tanh'); tanh runs on the EUP slot.
    return 0.5 * x * (1.0 + jnp.tanh(_SQRT_2_OVER_PI * (x + 0.044715 * x * x * x)))


def _softplus(x):
    # Numerically stable log(1 + exp(x)).
    return jnp.maximum(x, 0.0) + jnp.log1p(jnp.exp(-jnp.abs(x)))


def actor_net_kernel(
    xt_ref,                       # (IN_DIM, TB)   f32, feature-major input tile
    w1_ref, b1_ref,               # (128, 13)      (128, 1)
    w2_ref, b2_ref,               # (128, 128)     (128, 1)
    w3_ref, b3_ref,               # (128, 128)     (128, 1)
    wh_ref, bh_ref,               # (8, 128)       (8, 1)   fused [mu | std] head
    out_ref,                      # (HEAD_DIM, TB) f32  = [tanh(mu) ; softplus(std)]
    *, approximate_gelu: bool = False,
):
    gelu = _gelu_tanh if approximate_gelu else _gelu_exact

    x = xt_ref[...]  # (13, TB) f32; lanes = batch samples

    # Weights may be bf16 (MXU-native) or f32; activations are cast to the
    # weight dtype right before each dot, accumulation is always f32.
    h = jnp.dot(w1_ref[...], x.astype(w1_ref.dtype),
                preferred_element_type=jnp.float32) + b1_ref[...]
    h = gelu(h)

    h = jnp.dot(w2_ref[...], h.astype(w2_ref.dtype),
                preferred_element_type=jnp.float32) + b2_ref[...]
    h = gelu(h)

    h = jnp.dot(w3_ref[...], h.astype(w3_ref.dtype),
                preferred_element_type=jnp.float32) + b3_ref[...]
    h = gelu(h)

    head = jnp.dot(wh_ref[...], h.astype(wh_ref.dtype),
                   preferred_element_type=jnp.float32) + bh_ref[...]  # (8, TB)

    # Rows 0..3 = mu head (tanh), rows 4..7 = std head (softplus).
    # Single lane-dense (8, TB) store.
    rows = jax.lax.broadcasted_iota(jnp.int32, head.shape, 0)
    out = jnp.where(rows < OUT_DIM, jnp.tanh(head), _softplus(head))
    out_ref[...] = out.astype(out_ref.dtype)


def _round_up(n, m):
    return ((n + m - 1) // m) * m


def actor_net_forward_raw(x, params, *, max_tile_b=2048,
                          mxu_dtype=jnp.bfloat16, approximate_gelu=False):
    """Runs the kernel and returns the fused, transposed (HEAD_DIM, B) slab
    (rows 0..3 = tanh(mu), rows 4..7 = softplus(std)).  Consumers that want
    to avoid the tiny mu/std split can use this directly.

    x: (B, 13) float32.  params: PyTorch-layout weights (out, in) and biases (out,).
    """
    B = x.shape[0]

    # Batch tile: multiple of 128 so batch sits on the lane axis of every
    # block (lane-dense loads/stores).  Cap at ceil(B/2) so large batches get
    # at least 2 grid steps (both v7x TensorCores busy under "parallel").
    max_tile_b = max(128, _round_up(max_tile_b, 128))
    TB = min(max_tile_b, _round_up(pl.cdiv(B, 2), 128))
    grid = (pl.cdiv(B, TB),)  # ragged final block handled by Pallas (masked writeback)

    # Feature-major input: (13, B); batch on the 128-wide lane axis.
    xt = x.T

    # Weights in native PyTorch (out_features, in_features) layout; the two
    # 4-wide heads are fused into one (8, 128) weight / (8, 1) bias.
    w1 = params["w1"].astype(mxu_dtype)
    w2 = params["w2"].astype(mxu_dtype)
    w3 = params["w3"].astype(mxu_dtype)
    wh = jnp.concatenate([params["wm"], params["ws"]], axis=0).astype(mxu_dtype)
    b1 = params["b1"].reshape(HIDDEN, 1)
    b2 = params["b2"].reshape(HIDDEN, 1)
    b3 = params["b3"].reshape(HIDDEN, 1)
    bh = jnp.concatenate([params["bm"], params["bs"]], axis=0).reshape(HEAD_DIM, 1)

    # Weights/biases stay VMEM-resident across batch tiles (index_map -> (0,0)).
    resident = lambda shape: pl.BlockSpec(shape, lambda i: (0, 0))

    weights = (w1, b1, w2, b2, w3, b3, wh, bh)
    flops = 2 * B * (IN_DIM * HIDDEN + 2 * HIDDEN * HIDDEN + HIDDEN * HEAD_DIM)
    transcendentals = B * (3 * HIDDEN + HEAD_DIM)
    bytes_accessed = int(
        xt.size * xt.dtype.itemsize
        + HEAD_DIM * B * 4
        + sum(int(a.size) * a.dtype.itemsize for a in weights)
    )

    out_t = pl.pallas_call(
        functools.partial(actor_net_kernel, approximate_gelu=approximate_gelu),
        out_shape=jax.ShapeDtypeStruct((HEAD_DIM, B), jnp.float32),
        grid_spec=pltpu.PrefetchScalarGridSpec(
            num_scalar_prefetch=0,
            grid=grid,
            in_specs=[
                pl.BlockSpec((IN_DIM, TB), lambda i: (0, i)),   # x tile (feature-major)
                resident((HIDDEN, IN_DIM)), resident((HIDDEN, 1)),
                resident((HIDDEN, HIDDEN)), resident((HIDDEN, 1)),
                resident((HIDDEN, HIDDEN)), resident((HIDDEN, 1)),
                resident((HEAD_DIM, HIDDEN)), resident((HEAD_DIM, 1)),
            ],
            out_specs=pl.BlockSpec((HEAD_DIM, TB), lambda i: (0, i)),
        ),
        compiler_params=pltpu.CompilerParams(
            dimension_semantics=("parallel",),
        ),
        cost_estimate=pl.CostEstimate(
            flops=flops,
            transcendentals=transcendentals,
            bytes_accessed=bytes_accessed,
        ),
    )(xt, *weights)

    return out_t


def actor_net_forward(x, params, *, max_tile_b=2048,
                      mxu_dtype=jnp.bfloat16, approximate_gelu=False):
    """Returns (mu, std), each (B, 4) float32, matching the PyTorch module."""
    out_t = actor_net_forward_raw(x, params, max_tile_b=max_tile_b,
                                  mxu_dtype=mxu_dtype,
                                  approximate_gelu=approximate_gelu)
    mu = out_t[:OUT_DIM, :].T
    std = out_t[OUT_DIM:, :].T
    return mu, std


def init_params(key):
    """Deterministic init mirroring the PyTorch module, PyTorch layout:
    weight (out, in) via kaiming_normal_ (std = sqrt(2 / fan_in)), bias (out,)
    via nn.Linear default uniform(-1/sqrt(fan_in), 1/sqrt(fan_in))."""
    def linear(key, fan_in, fan_out):
        kw, kb = jax.random.split(key)
        w = jax.random.normal(kw, (fan_out, fan_in), jnp.float32) * math.sqrt(2.0 / fan_in)
        bound = 1.0 / math.sqrt(fan_in)
        b = jax.random.uniform(kb, (fan_out,), jnp.float32, -bound, bound)
        return w, b

    k1, k2, k3, k4, k5 = jax.random.split(key, 5)
    w1, b1 = linear(k1, IN_DIM, HIDDEN)
    w2, b2 = linear(k2, HIDDEN, HIDDEN)
    w3, b3 = linear(k3, HIDDEN, HIDDEN)
    wm, bm = linear(k4, HIDDEN, OUT_DIM)
    ws, bs = linear(k5, HIDDEN, OUT_DIM)
    return dict(w1=w1, b1=b1, w2=w2, b2=b2, w3=w3, b3=b3,
                wm=wm, bm=bm, ws=ws, bs=bs)


def reference_forward(x, p, approximate=False):
    """Pure-JAX reference (f32, HIGHEST matmul precision) for sanity checks."""
    hp = jax.lax.Precision.HIGHEST
    h = jax.nn.gelu(jnp.dot(x, p["w1"].T, precision=hp) + p["b1"], approximate=approximate)
    h = jax.nn.gelu(jnp.dot(h, p["w2"].T, precision=hp) + p["b2"], approximate=approximate)
    h = jax.nn.gelu(jnp.dot(h, p["w3"].T, precision=hp) + p["b3"], approximate=approximate)
    mu = jnp.tanh(jnp.dot(h, p["wm"].T, precision=hp) + p["bm"])
    std = jax.nn.softplus(jnp.dot(h, p["ws"].T, precision=hp) + p["bs"])
    return mu, std


if __name__ == "__main__":
    key = jax.random.PRNGKey(0)
    kx, kx2, kp = jax.random.split(key, 3)
    params = init_params(kp)

    # 1) Small batch, f32 MXU path: single (ragged) tile, tight check.
    B = 8
    x = jax.random.normal(kx, (B, IN_DIM), jnp.float32)
    mu, std = actor_net_forward(x, params, mxu_dtype=jnp.float32)
    jax.block_until_ready((mu, std))
    mu_ref, std_ref = reference_forward(x, params)
    assert mu.shape == (B, OUT_DIM) and std.shape == (B, OUT_DIM)
    assert jnp.allclose(mu, mu_ref, atol=1e-4, rtol=1e-4)
    assert jnp.allclose(std, std_ref, atol=1e-4, rtol=1e-4)

    # 2) Non-multiple batch, default bf16 MXU path: 2 grid steps + ragged
    #    final block (exercises the un-padded pl.cdiv grid).
    B2 = 300
    x2 = jax.random.normal(kx2, (B2, IN_DIM), jnp.float32)
    mu2, std2 = actor_net_forward(x2, params)  # bf16 operands, f32 accumulate
    jax.block_until_ready((mu2, std2))
    mu2_ref, std2_ref = reference_forward(x2, params)
    assert mu2.shape == (B2, OUT_DIM) and std2.shape == (B2, OUT_DIM)
    assert jnp.allclose(mu2, mu2_ref, atol=5e-2, rtol=5e-2)
    assert jnp.allclose(std2, std2_ref, atol=5e-2, rtol=5e-2)

    # 3) Optional tanh-approximate GELU path (EUP instead of VPU erf).
    mu3, std3 = actor_net_forward(x2, params, approximate_gelu=True)
    jax.block_until_ready((mu3, std3))
    mu3_ref, std3_ref = reference_forward(x2, params, approximate=True)
    assert jnp.allclose(mu3, mu3_ref, atol=5e-2, rtol=5e-2)
    assert jnp.allclose(std3, std3_ref, atol=5e-2, rtol=5e-2)

    print("KERNEL_OK")
</pallas_src>

<mosaic_0001>
module attributes {stable_mosaic.version = 11 : i64} {
  func.func @actor_net_kernel(%arg0: i32, %arg1: memref<13x128xf32, #tpu.memory_space<vmem>>, %arg2: memref<128x13xf32, #tpu.memory_space<vmem>>, %arg3: memref<128x1xf32, #tpu.memory_space<vmem>>, %arg4: memref<128x128xf32, #tpu.memory_space<vmem>>, %arg5: memref<128x1xf32, #tpu.memory_space<vmem>>, %arg6: memref<128x128xf32, #tpu.memory_space<vmem>>, %arg7: memref<128x1xf32, #tpu.memory_space<vmem>>, %arg8: memref<8x128xf32, #tpu.memory_space<vmem>>, %arg9: memref<8x1xf32, #tpu.memory_space<vmem>>, %arg10: memref<8x128xf32, #tpu.memory_space<vmem>>) attributes {dimension_semantics = [#tpu.dimension_semantics<parallel>], iteration_bounds = array<i64: 1>, scalar_prefetch = 0 : i64, scratch_operands = 0 : i64, tpu.core_type = #tpu.core_type<tc>, window_params = [{transform_indices = @transform_0, window_bounds = array<i64: 13, 128>}, {pipeline_mode = #tpu.pipeline_mode<synchronous>, transform_indices = @transform_1, window_bounds = array<i64: 128, 13>}, {pipeline_mode = #tpu.pipeline_mode<synchronous>, transform_indices = @transform_2, window_bounds = array<i64: 128, 1>}, {pipeline_mode = #tpu.pipeline_mode<synchronous>, transform_indices = @transform_3, window_bounds = array<i64: 128, 128>}, {pipeline_mode = #tpu.pipeline_mode<synchronous>, transform_indices = @transform_4, window_bounds = array<i64: 128, 1>}, {pipeline_mode = #tpu.pipeline_mode<synchronous>, transform_indices = @transform_5, window_bounds = array<i64: 128, 128>}, {pipeline_mode = #tpu.pipeline_mode<synchronous>, transform_indices = @transform_6, window_bounds = array<i64: 128, 1>}, {pipeline_mode = #tpu.pipeline_mode<synchronous>, transform_indices = @transform_7, window_bounds = array<i64: 8, 128>}, {pipeline_mode = #tpu.pipeline_mode<synchronous>, transform_indices = @transform_8, window_bounds = array<i64: 8, 1>}, {transform_indices = @transform_9, window_bounds = array<i64: 8, 128>}]} {
    %c0 = arith.constant 0 : index
    %c0_0 = arith.constant 0 : index
    %0 = vector.load %arg1[%c0, %c0_0] : memref<13x128xf32, #tpu.memory_space<vmem>>, vector<13x128xf32>
    %c0_1 = arith.constant 0 : index
    %c0_2 = arith.constant 0 : index
    %1 = vector.load %arg2[%c0_1, %c0_2] : memref<128x13xf32, #tpu.memory_space<vmem>>, vector<128x13xf32>
    %cst = arith.constant dense<0.000000e+00> : vector<128x128xf32>
    %2 = tpu.matmul %1, %0, %cst {dimension_numbers = #tpu.dot_dimension_numbers<[1], [0], [0], [1], [0, 0, 1, 1], [], []>} : vector<128x13xf32>, vector<13x128xf32>, vector<128x128xf32> -> vector<128x128xf32>
    %c0_3 = arith.constant 0 : index
    %c0_4 = arith.constant 0 : index
    %3 = vector.load %arg3[%c0_3, %c0_4] : memref<128x1xf32, #tpu.memory_space<vmem>>, vector<128x1xf32>
    %4 = vector.broadcast %3 : vector<128x1xf32> to vector<128x128xf32>
    %5 = arith.addf %2, %4 : vector<128x128xf32>
    %cst_5 = arith.constant 5.000000e-01 : f32
    %6 = vector.broadcast %cst_5 : f32 to vector<128x128xf32>
    %7 = arith.mulf %6, %5 : vector<128x128xf32>
    %cst_6 = arith.constant 0.707106769 : f32
    %8 = vector.broadcast %cst_6 : f32 to vector<128x128xf32>
    %9 = arith.mulf %5, %8 : vector<128x128xf32>
    %10 = math.erf %9 : vector<128x128xf32>
    %cst_7 = arith.constant 1.000000e+00 : f32
    %11 = vector.broadcast %cst_7 : f32 to vector<128x128xf32>
    %12 = arith.addf %11, %10 : vector<128x128xf32>
    %13 = arith.mulf %7, %12 : vector<128x128xf32>
    %c0_8 = arith.constant 0 : index
    %c0_9 = arith.constant 0 : index
    %14 = vector.load %arg4[%c0_8, %c0_9] : memref<128x128xf32, #tpu.memory_space<vmem>>, vector<128x128xf32>
    %cst_10 = arith.constant dense<0.000000e+00> : vector<128x128xf32>
    %15 = tpu.matmul %14, %13, %cst_10 {dimension_numbers = #tpu.dot_dimension_numbers<[1], [0], [0], [1], [0, 0, 1, 1], [], []>} : vector<128x128xf32>, vector<128x128xf32>, vector<128x128xf32> -> vector<128x128xf32>
    %c0_11 = arith.constant 0 : index
    %c0_12 = arith.constant 0 : index
    %16 = vector.load %arg5[%c0_11, %c0_12] : memref<128x1xf32, #tpu.memory_space<vmem>>, vector<128x1xf32>
    %17 = vector.broadcast %16 : vector<128x1xf32> to vector<128x128xf32>
    %18 = arith.addf %15, %17 : vector<128x128xf32>
    %cst_13 = arith.constant 5.000000e-01 : f32
    %19 = vector.broadcast %cst_13 : f32 to vector<128x128xf32>
    %20 = arith.mulf %19, %18 : vector<128x128xf32>
    %cst_14 = arith.constant 0.707106769 : f32
    %21 = vector.broadcast %cst_14 : f32 to vector<128x128xf32>
    %22 = arith.mulf %18, %21 : vector<128x128xf32>
    %23 = math.erf %22 : vector<128x128xf32>
    %cst_15 = arith.constant 1.000000e+00 : f32
    %24 = vector.broadcast %cst_15 : f32 to vector<128x128xf32>
    %25 = arith.addf %24, %23 : vector<128x128xf32>
    %26 = arith.mulf %20, %25 : vector<128x128xf32>
    %c0_16 = arith.constant 0 : index
    %c0_17 = arith.constant 0 : index
    %27 = vector.load %arg6[%c0_16, %c0_17] : memref<128x128xf32, #tpu.memory_space<vmem>>, vector<128x128xf32>
    %cst_18 = arith.constant dense<0.000000e+00> : vector<128x128xf32>
    %28 = tpu.matmul %27, %26, %cst_18 {dimension_numbers = #tpu.dot_dimension_numbers<[1], [0], [0], [1], [0, 0, 1, 1], [], []>} : vector<128x128xf32>, vector<128x128xf32>, vector<128x128xf32> -> vector<128x128xf32>
    %c0_19 = arith.constant 0 : index
    %c0_20 = arith.constant 0 : index
    %29 = vector.load %arg7[%c0_19, %c0_20] : memref<128x1xf32, #tpu.memory_space<vmem>>, vector<128x1xf32>
    %30 = vector.broadcast %29 : vector<128x1xf32> to vector<128x128xf32>
    %31 = arith.addf %28, %30 : vector<128x128xf32>
    %cst_21 = arith.constant 5.000000e-01 : f32
    %32 = vector.broadcast %cst_21 : f32 to vector<128x128xf32>
    %33 = arith.mulf %32, %31 : vector<128x128xf32>
    %cst_22 = arith.constant 0.707106769 : f32
    %34 = vector.broadcast %cst_22 : f32 to vector<128x128xf32>
    %35 = arith.mulf %31, %34 : vector<128x128xf32>
    %36 = math.erf %35 : vector<128x128xf32>
    %cst_23 = arith.constant 1.000000e+00 : f32
    %37 = vector.broadcast %cst_23 : f32 to vector<128x128xf32>
    %38 = arith.addf %37, %36 : vector<128x128xf32>
    %39 = arith.mulf %33, %38 : vector<128x128xf32>
    %c0_24 = arith.constant 0 : index
    %c0_25 = arith.constant 0 : index
    %40 = vector.load %arg8[%c0_24, %c0_25] : memref<8x128xf32, #tpu.memory_space<vmem>>, vector<8x128xf32>
    %cst_26 = arith.constant dense<0.000000e+00> : vector<8x128xf32>
    %41 = tpu.matmul %40, %39, %cst_26 {dimension_numbers = #tpu.dot_dimension_numbers<[1], [0], [0], [1], [0, 0, 1, 1], [], []>} : vector<8x128xf32>, vector<128x128xf32>, vector<8x128xf32> -> vector<8x128xf32>
    %c0_27 = arith.constant 0 : index
    %c0_28 = arith.constant 0 : index
    %42 = vector.load %arg9[%c0_27, %c0_28] : memref<8x1xf32, #tpu.memory_space<vmem>>, vector<8x1xf32>
    %43 = vector.broadcast %42 : vector<8x1xf32> to vector<8x128xf32>
    %44 = arith.addf %41, %43 : vector<8x128xf32>
    %45 = tpu.iota {dimensions = array<i32: 0>} : vector<8x128xi32>
    %c4_i32 = arith.constant 4 : i32
    %46 = vector.broadcast %c4_i32 : i32 to vector<8x128xi32>
    %47 = arith.cmpi slt, %45, %46 : vector<8x128xi32>
    %48 = math.tanh %44 : vector<8x128xf32>
    %cst_29 = arith.constant 0.000000e+00 : f32
    %49 = vector.broadcast %cst_29 : f32 to vector<8x128xf32>
    %50 = arith.maximumf %44, %49 : vector<8x128xf32>
    %51 = math.absf %44 : vector<8x128xf32>
    %cst_30 = arith.constant 0.000000e+00 : f32
    %52 = vector.broadcast %cst_30 : f32 to vector<8x128xf32>
    %53 = arith.subf %52, %51 : vector<8x128xf32>
    %54 = math.exp %53 : vector<8x128xf32>
    %55 = math.log1p %54 : vector<8x128xf32>
    %56 = arith.addf %50, %55 : vector<8x128xf32>
    %57 = arith.select %47, %48, %56 : vector<8x128xi1>, vector<8x128xf32>
    %c0_31 = arith.constant 0 : index
    %c0_32 = arith.constant 0 : index
    %58 = vector.load %arg10[%c0_31, %c0_32] : memref<8x128xf32, #tpu.memory_space<vmem>>, vector<8x128xf32>
    tpu.vector_store %arg10[%c0_31, %c0_32], %57 {strides = array<i32>} : memref<8x128xf32, #tpu.memory_space<vmem>>, vector<8x128xf32>,
    return
  }
  func.func @transform_0(%arg0: i32) -> (i32, i32) {
    %c0_i32 = arith.constant 0 : i32
    %c0_i32_0 = arith.constant 0 : i32
    return %c0_i32, %arg0 : i32, i32
  }
  func.func @transform_1(%arg0: i32) -> (i32, i32) {
    %c0_i32 = arith.constant 0 : i32
    %c0_i32_0 = arith.constant 0 : i32
    %c0_i32_1 = arith.constant 0 : i32
    return %c0_i32, %c0_i32_0 : i32, i32
  }
  func.func @transform_2(%arg0: i32) -> (i32, i32) {
    %c0_i32 = arith.constant 0 : i32
    %c0_i32_0 = arith.constant 0 : i32
    %c0_i32_1 = arith.constant 0 : i32
    return %c0_i32, %c0_i32_0 : i32, i32
  }
  func.func @transform_3(%arg0: i32) -> (i32, i32) {
    %c0_i32 = arith.constant 0 : i32
    %c0_i32_0 = arith.constant 0 : i32
    %c0_i32_1 = arith.constant 0 : i32
    return %c0_i32, %c0_i32_0 : i32, i32
  }
  func.func @transform_4(%arg0: i32) -> (i32, i32) {
    %c0_i32 = arith.constant 0 : i32
    %c0_i32_0 = arith.constant 0 : i32
    %c0_i32_1 = arith.constant 0 : i32
    return %c0_i32, %c0_i32_0 : i32, i32
  }
  func.func @transform_5(%arg0: i32) -> (i32, i32) {
    %c0_i32 = arith.constant 0 : i32
    %c0_i32_0 = arith.constant 0 : i32
    %c0_i32_1 = arith.constant 0 : i32
    return %c0_i32, %c0_i32_0 : i32, i32
  }
  func.func @transform_6(%arg0: i32) -> (i32, i32) {
    %c0_i32 = arith.constant 0 : i32
    %c0_i32_0 = arith.constant 0 : i32
    %c0_i32_1 = arith.constant 0 : i32
    return %c0_i32, %c0_i32_0 : i32, i32
  }
  func.func @transform_7(%arg0: i32) -> (i32, i32) {
    %c0_i32 = arith.constant 0 : i32
    %c0_i32_0 = arith.constant 0 : i32
    %c0_i32_1 = arith.constant 0 : i32
    return %c0_i32, %c0_i32_0 : i32, i32
  }
  func.func @transform_8(%arg0: i32) -> (i32, i32) {
    %c0_i32 = arith.constant 0 : i32
    %c0_i32_0 = arith.constant 0 : i32
    %c0_i32_1 = arith.constant 0 : i32
    return %c0_i32, %c0_i32_0 : i32, i32
  }
  func.func @transform_9(%arg0: i32) -> (i32, i32) {
    %c0_i32 = arith.constant 0 : i32
    %c0_i32_0 = arith.constant 0 : i32
    return %c0_i32, %arg0 : i32, i32
  }
}

</mosaic_0001>

<bundles_post_ra>
// kernel: tpu_custom_call.1
= control target key start
LH: loop header
LB: loop body
LE: loop exit
PB: predicated region body
PF: predicated region fallthrough
CT: control target
= control target key end

     0   :  { %vm196_vm0 = vcmask 1044480   ;;  %v3025_v3 = vmov 0   ;;  %vm147_vm1 = vcmask 105472   ;;  %s5553_s0 = inlined_call_operand.vmem [shape: f32[13,8], index: 0, kind: input, shape index: {}]   ;;  %s5554_s1 = inlined_call_operand.vmem [shape: f32[128,13], index: 1, kind: input, shape index: {}]   ;;  %s5555_s2 = inlined_call_operand.vmem [shape: f32[128,1], index: 2, kind: input, shape index: {}]   ;;  %s5556_s3 = inlined_call_operand.vmem [shape: f32[128,128], index: 3, kind: input, shape index: {}]   ;;  %s5557_s4 = inlined_call_operand.vmem [shape: f32[128,1], index: 4, kind: input, shape index: {}]   ;;  %s5558_s5 = inlined_call_operand.vmem [shape: f32[128,128], index: 5, kind: input, shape index: {}]   ;;  %s5559_s6 = inlined_call_operand.vmem [shape: f32[128,1], index: 6, kind: input, shape index: {}]   ;;  %s5560_s7 = inlined_call_operand.vmem [shape: f32[8,128], index: 7, kind: input, shape index: {}]   ;;  %s5561_s8 = inlined_call_operand.vmem [shape: f32[8,1], index: 8, kind: input, shape index: {}]   ;;  %s5562_s9 = inlined_call_operand.hbm [shape: f32[8,8], index: 9, kind: output, shape index: {}]  }
   0x1   :  { %v34_v0 = vld [vmem:[%s5553_s0 + $0x8] sm:$0x1f]  ;;  %v66_v1 = vld [vmem:[%s5555_s2 + $0x78] sm:$0xff]  ;;  %2895 = vset.pattern.permute.xlu1 %v3025_v3  ;;  %2894 = vset.pattern.permute.xlu0 %v3025_v3  ;;  %v33_v4 = vld [vmem:[%s5553_s0] sm:$0xff] }
   0x2   :  { %v64_v2 = vld [vmem:[%s5555_s2 + $0x68] sm:$0xff]  ;;  %2795 = vmatpush.msk.msra.mxu0 %vm196_vm0, %v34_v0  ;;  %144 = vperm.xlu0 %2894, %v66_v1   ;;  %v35_v5 = vld [vmem:[%s5554_s1] sm:$0xff]  ;;  %v62_v6 = vld [vmem:[%s5555_s2 + $0x58] sm:$0xff] }
   0x3   :  { %134 = vperm.xlu1 %2895, %v64_v2   ;;  %2896 = vset.pattern.permute.xlu2 %v3025_v3  ;;  %v65_v7 = vld [vmem:[%s5555_s2 + $0x70] sm:$0xff] }
   0x4   :  { %215 = vmatpush.msra.mxu0 %v33_v4  ;;  %124 = vperm.xlu2 %2896, %v62_v6  }
   0x5   :  { %2796 = vmatmul.msk.f32.vlgmr.msra.gmra.mxu0 %vm147_vm1, %v35_v5 }
   0x6   :  { %14 = vsyncpa [#allocation3], 0  ;;  %v63_v8 = vld [vmem:[%s5555_s2 + $0x60] sm:$0xff]  ;;  %v61_v9 = vld [vmem:[%s5555_s2 + $0x50] sm:$0xff]  ;;  %s2786_s14 = sshll.u32 %s5562_s9, 4  ;;  %s2787_s14 = int_to_ptr.hbm [resolvable:$true] %s2786_s14 }
   0x7   :  { %v36_v10 = vld [vmem:[%s5554_s1 + $0x8] sm:$0xff]  ;;  %v59_v12 = vld [vmem:[%s5555_s2 + $0x40] sm:$0xff]  ;;  %v58_v13 = vld [vmem:[%s5555_s2 + $0x38] sm:$0xff] }
   0x8   :  { %v60_v11 = vld [vmem:[%s5555_s2 + $0x48] sm:$0xff]  ;;  %v37_v14 = vld [vmem:[%s5554_s1 + $0x10] sm:$0xff]  ;;  %v55_v17 = vld [vmem:[%s5555_s2 + $0x20] sm:$0xff] }
   0x9   :  { %v57_v15 = vld [vmem:[%s5555_s2 + $0x30] sm:$0xff]  ;;  %v56_v16 = vld [vmem:[%s5555_s2 + $0x28] sm:$0xff]  ;;  %v38_v18 = vld [vmem:[%s5554_s1 + $0x18] sm:$0xff] }
   0xa   :  { %139 = vperm.xlu0 %2894, %v65_v7   ;;  %v54_v19 = vld [vmem:[%s5555_s2 + $0x18] sm:$0xff]  ;;  %v53_v20 = vld [vmem:[%s5555_s2 + $0x10] sm:$0xff]  ;;  %v52_v21 = vld [vmem:[%s5555_s2 + $0x8] sm:$0xff] }
   0xb   :  { %129 = vperm.xlu1 %2895, %v63_v8   ;;  %v39_v22 = vld [vmem:[%s5554_s1 + $0x20] sm:$0xff]  ;;  %v1000_v24 = vld [vmem:[%s5557_s4 + $0x78] sm:$0xff]  ;;  %v40_v25 = vld [vmem:[%s5554_s1 + $0x28] sm:$0xff] }
   0xc   :  { %119 = vperm.xlu2 %2896, %v61_v9   ;;  %v51_v23 = vld [vmem:[%s5555_s2] sm:$0xff]  ;;  %v999_v26 = vld [vmem:[%s5557_s4 + $0x70] sm:$0xff]  ;;  %v998_v27 = vld [vmem:[%s5557_s4 + $0x68] sm:$0xff] }
   0xd   :  { %2797 = vmatmul.msk.f32.gmra.mxu0 %vm147_vm1, %v36_v10  ;;  %v997_v28 = vld [vmem:[%s5557_s4 + $0x60] sm:$0xff]  ;;  %v41_v29 = vld [vmem:[%s5554_s1 + $0x30] sm:$0xff]  ;;  %v996_v30 = vld [vmem:[%s5557_s4 + $0x58] sm:$0xff] }
   0xe   :  { %v995_v31 = vld [vmem:[%s5557_s4 + $0x50] sm:$0xff]  ;;  %v994_v32 = vld [vmem:[%s5557_s4 + $0x48] sm:$0xff]  ;;  %v42_v33 = vld [vmem:[%s5554_s1 + $0x38] sm:$0xff] }
   0xf   :  { %v993_v34 = vld [vmem:[%s5557_s4 + $0x40] sm:$0xff]  ;;  %v992_v35 = vld [vmem:[%s5557_s4 + $0x38] sm:$0xff]  ;;  %v991_v36 = vld [vmem:[%s5557_s4 + $0x30] sm:$0xff] }
  0x10   :  { %v43_v37 = vld [vmem:[%s5554_s1 + $0x40] sm:$0xff]  ;;  %v990_v38 = vld [vmem:[%s5557_s4 + $0x28] sm:$0xff]  ;;  %v988_v40 = vld [vmem:[%s5557_s4 + $0x18] sm:$0xff] }
  0x11   :  { %v989_v39 = vld [vmem:[%s5557_s4 + $0x20] sm:$0xff]  ;;  %v44_v41 = vld [vmem:[%s5554_s1 + $0x48] sm:$0xff]  ;;  %v987_v42 = vld [vmem:[%s5557_s4 + $0x10] sm:$0xff] }
  0x12   :  { %114 = vperm.xlu0 %2894, %v60_v11   ;;  %v986_v43 = vld [vmem:[%s5557_s4 + $0x8] sm:$0xff]  ;;  %v985_v44 = vld [vmem:[%s5557_s4] sm:$0xff]  ;;  %v45_v45 = vld [vmem:[%s5554_s1 + $0x50] sm:$0xff] }
  0x13   :  { %109 = vperm.xlu1 %2895, %v59_v12   ;;  %v1881_v46 = vld [vmem:[%s5559_s6 + $0x78] sm:$0xff]  ;;  %v1880_v47 = vld [vmem:[%s5559_s6 + $0x70] sm:$0xff]  ;;  %v1879_v48 = vld [vmem:[%s5559_s6 + $0x68] sm:$0xff] }
  0x14   :  { %104 = vperm.xlu2 %2896, %v58_v13   ;;  %v46_v49 = vld [vmem:[%s5554_s1 + $0x58] sm:$0xff]  ;;  %v1878_v50 = vld [vmem:[%s5559_s6 + $0x60] sm:$0xff]  ;;  %v1876_v52 = vld [vmem:[%s5559_s6 + $0x50] sm:$0xff] }
  0x15   :  { %2798 = vmatmul.msk.f32.gmra.mxu0 %vm147_vm1, %v37_v14  ;;  %v1877_v51 = vld [vmem:[%s5559_s6 + $0x58] sm:$0xff]  ;;  %v47_v53 = vld [vmem:[%s5554_s1 + $0x60] sm:$0xff]  ;;  %v1875_v54 = vld [vmem:[%s5559_s6 + $0x48] sm:$0xff] }
  0x16   :  { %v1874_v55 = vld [vmem:[%s5559_s6 + $0x40] sm:$0xff]  ;;  %v1873_v56 = vld [vmem:[%s5559_s6 + $0x38] sm:$0xff]  ;;  %v48_v57 = vld [vmem:[%s5554_s1 + $0x68] sm:$0xff] }
  0x17   :  { %v1872_v58 = vld [vmem:[%s5559_s6 + $0x30] sm:$0xff]  ;;  %v1871_v59 = vld [vmem:[%s5559_s6 + $0x28] sm:$0xff]  ;;  %v1870_v60 = vld [vmem:[%s5559_s6 + $0x20] sm:$0xff] }
  0x18   :  { %v49_v61 = vld [vmem:[%s5554_s1 + $0x70] sm:$0xff]  ;;  %v1869_v62 = vld [vmem:[%s5559_s6 + $0x18] sm:$0xff]  ;;  %v1867_v0 = vld [vmem:[%s5559_s6 + $0x8] sm:$0xff] }
  0x19   :  { %v1868_v63 = vld [vmem:[%s5559_s6 + $0x10] sm:$0xff]  ;;  %v50_v1 = vld [vmem:[%s5554_s1 + $0x78] sm:$0xff]  ;;  %v1866_v2 = vld [vmem:[%s5559_s6] sm:$0xff] }
  0x1a   :  { %99 = vperm.xlu0 %2894, %v57_v15   ;;  %v2732_v3 = vld [vmem:[%s5561_s8] sm:$0xff] }
  0x1b   :  { %94 = vperm.xlu1 %2895, %v56_v16  }
  0x1c   :  { %89 = vperm.xlu2 %2896, %v55_v17  }
  0x1d   :  { %2799 = vmatmul.msk.f32.gmra.mxu0 %vm147_vm1, %v38_v18 }
  0x22   :  { %84 = vperm.xlu0 %2894, %v54_v19  }
  0x23   :  { %79 = vperm.xlu1 %2895, %v53_v20  }
  0x24   :  { %74 = vperm.xlu2 %2896, %v52_v21  }
  0x25   :  { %2800 = vmatmul.msk.f32.gmra.mxu0 %vm147_vm1, %v39_v22 }
  0x2a   :  { %69 = vperm.xlu0 %2894, %v51_v23  }
  0x2b   :  { %1078 = vperm.xlu1 %2895, %v1000_v24  }
  0x2c   :  { %1073 = vperm.xlu2 %2896, %v999_v26  }
  0x2d   :  { %2801 = vmatmul.msk.f32.gmra.mxu0 %vm147_vm1, %v40_v25 }
  0x32   :  { %1068 = vperm.xlu0 %2894, %v998_v27  }
  0x33   :  { %1063 = vperm.xlu1 %2895, %v997_v28  }
  0x34   :  { %1058 = vperm.xlu2 %2896, %v996_v30  }
  0x35   :  { %2802 = vmatmul.msk.f32.gmra.mxu0 %vm147_vm1, %v41_v29 }
  0x3a   :  { %1053 = vperm.xlu0 %2894, %v995_v31  }
  0x3b   :  { %1048 = vperm.xlu1 %2895, %v994_v32  }
  0x3c   :  { %1043 = vperm.xlu2 %2896, %v993_v34  }
  0x3d   :  { %2803 = vmatmul.msk.f32.gmra.mxu0 %vm147_vm1, %v42_v33 }
  0x42   :  { %1038 = vperm.xlu0 %2894, %v992_v35  }
  0x43   :  { %1033 = vperm.xlu1 %2895, %v991_v36  }
  0x44   :  { %1028 = vperm.xlu2 %2896, %v990_v38  }
  0x45   :  { %2804 = vmatmul.msk.f32.gmra.mxu0 %vm147_vm1, %v43_v37 }
  0x4a   :  { %1023 = vperm.xlu0 %2894, %v989_v39  }
  0x4b   :  { %1018 = vperm.xlu1 %2895, %v988_v40  }
  0x4c   :  { %1013 = vperm.xlu2 %2896, %v987_v42  }
  0x4d   :  { %2805 = vmatmul.msk.f32.gmra.mxu0 %vm147_vm1, %v44_v41 }
  0x52   :  { %1008 = vperm.xlu0 %2894, %v986_v43  }
  0x53   :  { %1003 = vperm.xlu1 %2895, %v985_v44  }
  0x54   :  { %1959 = vperm.xlu2 %2896, %v1881_v46  }
  0x55   :  { %2806 = vmatmul.msk.f32.gmra.mxu0 %vm147_vm1, %v45_v45 }
  0x5a   :  { %1954 = vperm.xlu0 %2894, %v1880_v47  }
  0x5b   :  { %1949 = vperm.xlu1 %2895, %v1879_v48  }
  0x5c   :  { %1944 = vperm.xlu2 %2896, %v1878_v50  }
  0x5d   :  { %2807 = vmatmul.msk.f32.gmra.mxu0 %vm147_vm1, %v46_v49 }
  0x5e   :  { %v3296_v6 = vpop.permute.xlu2 %124 }
  0x62   :  { %1939 = vperm.xlu0 %2894, %v1877_v51  }
  0x63   :  { %1934 = vperm.xlu1 %2895, %v1876_v52  }
  0x64   :  { %1929 = vperm.xlu2 %2896, %v1875_v54  }
  0x65   :  { %2808 = vmatmul.msk.f32.gmra.mxu0 %vm147_vm1, %v47_v53 }
  0x66   :  { %v3302_v10 = vpop.permute.xlu2 %119 }
  0x6a   :  { %1924 = vperm.xlu0 %2894, %v1874_v55  }
  0x6b   :  { %1919 = vperm.xlu1 %2895, %v1873_v56  }
  0x6c   :  { %1914 = vperm.xlu2 %2896, %v1872_v58  }
  0x6d   :  { %2809 = vmatmul.msk.f32.gmra.mxu0 %vm147_vm1, %v48_v57 }
  0x6e   :  { %v105_v14 = vpop.permute.xlu2 %104 }
  0x72   :  { %1909 = vperm.xlu0 %2894, %v1871_v59  }
  0x73   :  { %1904 = vperm.xlu1 %2895, %v1870_v60  }
  0x74   :  { %1899 = vperm.xlu2 %2896, %v1869_v62   ;;  %v3294_v5 = vpop.permute.xlu0 %144 }
  0x75   :  { %2810 = vmatmul.msk.f32.gmra.mxu0 %vm147_vm1, %v49_v61  ;;  %v3298_v8 = vpop.permute.xlu1 %134 }
  0x76   :  { %v90_v19 = vpop.permute.xlu2 %89 }
  0x7a   :  { %1894 = vperm.xlu0 %2894, %v1868_v63  }
  0x7b   :  { %1889 = vperm.xlu1 %2895, %v1867_v0  }
  0x7c   :  { %1884 = vperm.xlu2 %2896, %v1866_v2   ;;  %v3300_v9 = vpop.permute.xlu0 %139 }
  0x7d   :  { %2811 = vmatmul.msk.f32.gmra.mxu0 %vm147_vm1, %v50_v1  ;;  %v3304_v12 = vpop.permute.xlu1 %129 }
  0x7e   :  { %v75_v24 = vpop.permute.xlu2 %74 }
  0x82   :  { %v217_v4 = vpop.f32.mrf.mxu0  ;;  %2735 = vperm.xlu0 %2894, %v2732_v3  }
  0x84   :  { %v3306_v13 = vpop.permute.xlu0 %114 }
  0x85   :  { %v110_v16 = vpop.permute.xlu1 %109 }
  0x8a   :  { %v220_v7 = vpop.f32.mrf.mxu0 }
  0x8b   :  { %v3312_v26 = vadd.f32 %v220_v7, %v75_v24 }
  0x8c   :  { %v100_v17 = vpop.permute.xlu0 %99 }
  0x8d   :  { %v95_v20 = vpop.permute.xlu1 %94  ;;  %5612 = vst [vmem:[#allocation7_spill] sm:$0xff] %v3312_v26  ;;  %v3325_v33 = vmul.f32 0.70710677, %v3312_v26 }
  0x8f   :  { %5614 = vst [vmem:[#allocation9_spill] sm:$0xff] %v3325_v33  ;;  %v337_v39 = vmul.f32 %v3325_v33, %v3325_v33 }
  0x91   :  { %v3354_v47 = vmin.f32 %v337_v39, 16.0 }
  0x92   :  { %v223_v11 = vpop.f32.mrf.mxu0 }
  0x93   :  { %v339_v55 = vmul.f32 2.1237322e-06, %v3354_v47 }
  0x94   :  { %v85_v22 = vpop.permute.xlu0 %84 }
  0x95   :  { %v80_v31 = vpop.permute.xlu1 %79  ;;  %v340_v2 = vadd.f32 0.00028619796, %v339_v55 }
  0x96   :  { %v3334_v37 = vadd.f32 %v223_v11, %v80_v31 }
  0x98   :  { %5615 = vst [vmem:[#allocation10_spill] sm:$0xff] %v3334_v37  ;;  %v3350_v44 = vmul.f32 0.70710677, %v3334_v37 }
  0x9a   :  { %v226_v15 = vpop.f32.mrf.mxu0  ;;  %5616 = vst [vmem:[#allocation11_spill] sm:$0xff] %v3350_v44  ;;  %v377_v53 = vmul.f32 %v3350_v44, %v3350_v44 }
  0x9b   :  { %v3308_v23 = vadd.f32 %v226_v15, %v85_v22 }
  0x9c   :  { %v70_v57 = vpop.permute.xlu0 %69  ;;  %v3374_v62 = vmin.f32 %v377_v53, 16.0 }
  0x9d   :  { %5610 = vst [vmem:[#allocation5_spill] sm:$0xff] %v3308_v23  ;;  %v3315_v27 = vmul.f32 0.70710677, %v3308_v23  ;;  %v3376_v0 = vadd.f32 %v217_v4, %v70_v57  ;;  %v341_v4 = vmul.f32 %v340_v2, %v3354_v47 }
  0x9f   :  { %5613 = vst [vmem:[#allocation8_spill] sm:$0xff] %v3315_v27  ;;  %v417_v34 = vmul.f32 %v3315_v27, %v3315_v27 }
  0xa0   :  { %5617 = vst [vmem:[#allocation12_spill] sm:$0xff] %v3376_v0 }
  0xa1   :  { %v3341_v40 = vmin.f32 %v417_v34, 16.0 }
  0xa2   :  { %v229_v18 = vpop.f32.mrf.mxu0 }
  0xa3   :  { %v3310_v25 = vadd.f32 %v229_v18, %v90_v19  ;;  %v419_v48 = vmul.f32 2.1237322e-06, %v3341_v40  ;;  %v3388_v19 = vmul.f32 0.70710677, %v3376_v0 }
  0xa5   :  { %5611 = vst [vmem:[#allocation6_spill] sm:$0xff] %v3310_v25  ;;  %v3320_v29 = vmul.f32 0.70710677, %v3310_v25  ;;  %v420_v56 = vadd.f32 0.00028619796, %v419_v48  ;;  %v297_v39 = vmul.f32 %v3388_v19, %v3388_v19 }
  0xa6   :  { %5618 = vst [vmem:[#allocation13_spill] sm:$0xff] %v3388_v19 }
  0xa7   :  { %v457_v36 = vmul.f32 %v3320_v29, %v3320_v29  ;;  %v421_v3 = vmul.f32 %v420_v56, %v3341_v40 }
  0xa9   :  { %v3345_v42 = vmin.f32 %v457_v36, 16.0 }
  0xaa   :  { %v232_v21 = vpop.f32.mrf.mxu0 }
  0xab   :  { %v3317_v28 = vadd.f32 %v232_v21, %v95_v20  ;;  %v459_v50 = vmul.f32 2.1237322e-06, %v3345_v42 }
  0xad   :  { %v3330_v35 = vmul.f32 0.70710677, %v3317_v28  ;;  %v460_v59 = vadd.f32 0.00028619796, %v459_v50 }
  0xaf   :  { %v497_v41 = vmul.f32 %v3330_v35, %v3330_v35  ;;  %v461_v11 = vmul.f32 %v460_v59, %v3345_v42  ;;  %v3410_v59 = vmin.f32 %v297_v39, 16.0 }
  0xb1   :  { %v3357_v49 = vmin.f32 %v497_v41, 16.0  ;;  %v462_v22 = vadd.f32 0.0036580483, %v461_v11 }
  0xb2   :  { %v235_v30 = vpop.f32.mrf.mxu0 }
  0xb3   :  { %v3322_v32 = vadd.f32 %v235_v30, %v100_v17  ;;  %v499_v58 = vmul.f32 2.1237322e-06, %v3357_v49  ;;  %v379_v17 = vmul.f32 2.1237322e-06, %v3374_v62  ;;  %v463_v53 = vmul.f32 %v462_v22, %v3345_v42 }
  0xb5   :  { %v3337_v38 = vmul.f32 0.70710677, %v3322_v32  ;;  %v500_v7 = vadd.f32 0.00028619796, %v499_v58  ;;  %v380_v31 = vadd.f32 0.00028619796, %v379_v17 }
  0xb7   :  { %v537_v43 = vmul.f32 %v3337_v38, %v3337_v38  ;;  %v501_v20 = vmul.f32 %v500_v7, %v3357_v49  ;;  %v381_v57 = vmul.f32 %v380_v31, %v3374_v62 }
  0xb9   :  { %v3360_v51 = vmin.f32 %v537_v43, 16.0  ;;  %v342_v43 = vadd.f32 0.0036580483, %v341_v4  ;;  %v502_v48 = vadd.f32 0.0036580483, %v501_v20 }
  0xba   :  { %v238_v45 = vpop.f32.mrf.mxu0 }
  0xbb   :  { %v3352_v46 = vadd.f32 %v238_v45, %v105_v14  ;;  %v539_v60 = vmul.f32 2.1237322e-06, %v3360_v51  ;;  %v503_v2 = vmul.f32 %v502_v48, %v3357_v49 }
  0xbd   :  { %v3363_v52 = vmul.f32 0.70710677, %v3352_v46  ;;  %v540_v14 = vadd.f32 0.00028619796, %v539_v60  ;;  %v343_v60 = vmul.f32 %v342_v43, %v3354_v47  ;;  %v504_v31 = vadd.f32 0.05243302, %v503_v2 }
  0xbf   :  { %v577_v54 = vmul.f32 %v3363_v52, %v3363_v52  ;;  %v541_v24 = vmul.f32 %v540_v14, %v3360_v51 }
  0xc1   :  { %v3372_v61 = vmin.f32 %v577_v54, 16.0  ;;  %v542_v54 = vadd.f32 0.0036580483, %v541_v24  ;;  %v344_v24 = vadd.f32 0.05243302, %v343_v60 }
  0xc2   :  { %v241_v63 = vpop.f32.mrf.mxu0 }
  0xc3   :  { %v3378_v1 = vadd.f32 %v241_v63, %v110_v16  ;;  %v579_v15 = vmul.f32 2.1237322e-06, %v3372_v61  ;;  %v422_v16 = vadd.f32 0.0036580483, %v421_v3  ;;  %v464_v3 = vadd.f32 0.05243302, %v463_v53 }
  0xc4   :  { %v543_v7 = vmul.f32 %v542_v54, %v3360_v51 }
  0xc5   :  { %v3385_v18 = vmul.f32 0.70710677, %v3378_v1  ;;  %v580_v30 = vadd.f32 0.00028619796, %v579_v15  ;;  %v423_v45 = vmul.f32 %v422_v16, %v3341_v40  ;;  %v382_v15 = vadd.f32 0.0036580483, %v381_v57 }
  0xc6   :  { %v299_v16 = vmul.f32 2.1237322e-06, %v3410_v59  ;;  %v544_v39 = vadd.f32 0.05243302, %v543_v7 }
  0xc7   :  { %v617_v21 = vmul.f32 %v3385_v18, %v3385_v18  ;;  %v581_v55 = vmul.f32 %v580_v30, %v3372_v61  ;;  %v424_v63 = vadd.f32 0.05243302, %v423_v45 }
  0xc8   :  { %v300_v54 = vadd.f32 0.00028619796, %v299_v16  ;;  %v545_v2 = vmul.f32 %v544_v39, %v3360_v51 }
  0xc9   :  { %v3395_v34 = vmin.f32 %v617_v21, 16.0  ;;  %v582_v11 = vadd.f32 0.0036580483, %v581_v55  ;;  %v425_v30 = vmul.f32 %v424_v63, %v3341_v40 }
  0xca   :  { %v244_v36 = vpop.f32.mrf.mxu0 }
  0xcb   :  { %v3400_v41 = vadd.f32 %v244_v36, %v3306_v13  ;;  %v619_v50 = vmul.f32 2.1237322e-06, %v3395_v34  ;;  %v465_v36 = vmul.f32 %v464_v3, %v3345_v42  ;;  %v583_v43 = vmul.f32 %v582_v11, %v3372_v61 }
  0xcc   :  { %v426_v57 = vadd.f32 0.18741608, %v425_v30  ;;  %v3440_v11 = vmul.f32 %v344_v24, %v3354_v47 }
  0xcd   :  { %v3407_v56 = vmul.f32 0.70710677, %v3400_v41  ;;  %v620_v58 = vadd.f32 0.00028619796, %v619_v50  ;;  %v466_v63 = vadd.f32 0.18741608, %v465_v36 }
  0xce   :  { %v584_v3 = vadd.f32 0.05243302, %v583_v43  ;;  %5619 = vst [vmem:[#allocation14_spill] sm:$0xff] %v3440_v11  ;;  %v427_v36 = vmul.f32 %v426_v57, %v3341_v40 }
  0xcf   :  { %v657_v13 = vmul.f32 %v3407_v56, %v3407_v56  ;;  %v621_v17 = vmul.f32 %v620_v58, %v3395_v34  ;;  %v505_v58 = vmul.f32 %v504_v31, %v3357_v49 }
  0xd1   :  { %v3417_v14 = vmin.f32 %v657_v13, 16.0  ;;  %v622_v48 = vadd.f32 0.0036580483, %v621_v17  ;;  %v506_v39 = vadd.f32 0.18741608, %v505_v58 }
  0xd2   :  { %v247_v4 = vpop.f32.mrf.mxu0 }
  0xd3   :  { %v659_v20 = vmul.f32 2.1237322e-06, %v3417_v14  ;;  %v3423_v21 = vadd.f32 %v247_v4, %v3302_v10  ;;  %v670_v22 = vmul.f32 3.8918573e-05, %v3417_v14  ;;  %v383_v10 = vmul.f32 %v382_v15, %v3374_v62 }
  0xd4   :  { %v623_v15 = vmul.f32 %v622_v48, %v3395_v34  ;;  %v546_v48 = vadd.f32 0.18741608, %v545_v2  ;;  %v3467_v2 = vmul.f32 0.5, %v3317_v28 }
  0xd5   :  { %v660_v45 = vadd.f32 0.00028619796, %v659_v20  ;;  %v3430_v50 = vmul.f32 0.70710677, %v3423_v21  ;;  %v671_v53 = vadd.f32 0.001143296, %v670_v22  ;;  %v301_v22 = vmul.f32 %v300_v54, %v3410_v59 }
  0xd6   :  { %v384_v20 = vadd.f32 0.05243302, %v383_v10  ;;  %v624_v54 = vadd.f32 0.05243302, %v623_v15  ;;  %5622 = vst [vmem:[#allocation17_spill] sm:$0xff] %v3467_v2 }
  0xd7   :  { %v661_v55 = vmul.f32 %v660_v45, %v3417_v14  ;;  %v697_v13 = vmul.f32 %v3430_v50, %v3430_v50  ;;  %v672_v60 = vmul.f32 %v671_v53, %v3417_v14  ;;  %v467_v45 = vmul.f32 %v466_v63, %v3345_v42 }
  0xd8   :  { %v585_v53 = vmul.f32 %v584_v3, %v3372_v61  ;;  %v3460_v57 = vmul.f32 %v384_v20, %v3374_v62  ;;  %v3462_v58 = vadd.f32 0.0036580483, %v301_v22  ;;  %v507_v3 = vmul.f32 %v506_v39, %v3357_v49 }
  0xd9   :  { %v662_v7 = vadd.f32 0.0036580483, %v661_v55  ;;  %v3443_v17 = vmin.f32 %v697_v13, 16.0  ;;  %v673_v16 = vadd.f32 0.014752088, %v672_v60  ;;  %v547_v20 = vmul.f32 %v546_v48, %v3360_v51 }
  0xda   :  { %v250_v4 = vpop.f32.mrf.mxu0  ;;  %5620 = vst [vmem:[#allocation15_spill] sm:$0xff] %v3460_v57  ;;  %v3485_v48 = vmul.f32 0.5, %v3322_v32 }
  0xdb   :  { %v663_v30 = vmul.f32 %v662_v7, %v3417_v14  ;;  %v3448_v31 = vadd.f32 %v250_v4, %v3296_v6  ;;  %v699_v24 = vmul.f32 2.1237322e-06, %v3443_v17  ;;  %v710_v43 = vmul.f32 3.8918573e-05, %v3443_v17  ;;  %5621 = vst [vmem:[#allocation16_spill] sm:$0xff] %v3462_v58 }
  0xdc   :  { %v674_v6 = vmul.f32 %v673_v16, %v3417_v14  ;;  %v3472_v4 = vadd.f32 1.1283791, %v427_v36  ;;  %v468_v16 = vadd.f32 1.1283791, %v467_v45  ;;  %v508_v45 = vadd.f32 1.1283791, %v507_v3 }
  0xdd   :  { %v3456_v10 = vmul.f32 0.70710677, %v3448_v31  ;;  %v700_v55 = vadd.f32 0.00028619796, %v699_v24  ;;  %v711_v13 = vadd.f32 0.001143296, %v710_v43  ;;  %v625_v24 = vmul.f32 %v624_v54, %v3395_v34 }
  0xde   :  { %v664_v60 = vadd.f32 0.05243302, %v663_v30  ;;  %5623 = vst [vmem:[#allocation18_spill] sm:$0xff] %v3472_v4  ;;  %v586_v30 = vadd.f32 0.18741608, %v585_v53  ;;  %v3488_v53 = vmul.f32 0.5, %v3352_v46 }
  0xdf   :  { %v737_v63 = vmul.f32 %v3456_v10, %v3456_v10  ;;  %v701_v7 = vmul.f32 %v700_v55, %v3443_v17  ;;  %v712_v15 = vmul.f32 %v711_v13, %v3443_v17  ;;  %v675_v28 = vadd.f32 0.112945676, %v674_v6  ;;  %5624 = vst [vmem:[#allocation19_spill] sm:$0xff] %v3485_v48 }
  0xe0   :  { %v665_v19 = vmul.f32 %v664_v60, %v3417_v14  ;;  %5625 = vst [vmem:[#allocation20_spill] sm:$0xff] %v3488_v53  ;;  %v3491_v13 = vmul.f32 %v468_v16, %v3320_v29  ;;  %v548_v6 = vadd.f32 1.1283791, %v547_v20  ;;  %v587_v32 = vmul.f32 %v586_v30, %v3372_v61 }
  0xe1   :  { %v3475_v22 = vmin.f32 %v737_v63, 16.0  ;;  %v713_v0 = vadd.f32 0.014752088, %v712_v15  ;;  %v702_v54 = vadd.f32 0.0036580483, %v701_v7  ;;  %v676_v3 = vmul.f32 %v675_v28, %v3417_v14 }
  0xe2   :  { %v253_v43 = vpop.f32.mrf.mxu0  ;;  %5626 = vst [vmem:[#allocation21_spill] sm:$0xff] %v3491_v13  ;;  %v626_v15 = vadd.f32 0.18741608, %v625_v24  ;;  %v3500_v46 = vmul.f32 0.5, %v3378_v1  ;;  %v666_v7 = vadd.f32 0.18741608, %v665_v19  ;;  %v3504_v16 = vmul.f32 %v508_v45, %v3330_v35 }
  0xe3   :  { %v739_v39 = vmul.f32 2.1237322e-06, %v3475_v22  ;;  %v3481_v55 = vadd.f32 %v253_v43, %v3304_v12  ;;  %v750_v36 = vmul.f32 3.8918573e-05, %v3475_v22  ;;  %v714_v63 = vmul.f32 %v713_v0, %v3443_v17 }
  0xe4   :  { %5627 = vst [vmem:[#allocation22_spill] sm:$0xff] %v3504_v16  ;;  %v703_v0 = vmul.f32 %v702_v54, %v3443_v17  ;;  %v3511_v28 = vmul.f32 %v548_v6, %v3337_v38  ;;  %v3514_v30 = vmul.f32 0.5, %v3400_v41  ;;  %v677_v54 = vadd.f32 0.4994258, %v676_v3 }
  0xe5   :  { %v740_v60 = vadd.f32 0.00028619796, %v739_v39  ;;  %v3495_v12 = vmul.f32 0.70710677, %v3481_v55  ;;  %v751_v43 = vadd.f32 0.001143296, %v750_v36  ;;  %v627_v39 = vmul.f32 %v626_v15, %v3395_v34 }
  0xe6   :  { %v715_v19 = vadd.f32 0.112945676, %v714_v63  ;;  %v667_v26 = vmul.f32 %v666_v7, %v3417_v14  ;;  %v630_v38 = vmul.f32 3.8918573e-05, %v3395_v34  ;;  %v704_v41 = vadd.f32 0.05243302, %v703_v0 }
  0xe7   :  { %v741_v29 = vmul.f32 %v740_v60, %v3475_v22  ;;  %v777_v20 = vmul.f32 %v3495_v12, %v3495_v12  ;;  %v752_v24 = vmul.f32 %v751_v43, %v3475_v22  ;;  %v3519_v60 = vadd.f32 1.1283791, %v587_v32 }
  0xe8   :  { %v628_v7 = vadd.f32 1.1283791, %v627_v39  ;;  %v678_v0 = vmul.f32 %v677_v54, %v3417_v14  ;;  %v631_v37 = vadd.f32 0.001143296, %v630_v38  ;;  %v668_v33 = vadd.f32 1.1283791, %v667_v26 }
  0xe9   :  { %v742_v1 = vadd.f32 0.0036580483, %v741_v29  ;;  %v3517_v36 = vmin.f32 %v777_v20, 16.0  ;;  %v753_v45 = vadd.f32 0.014752088, %v752_v24  ;;  %v3530_v29 = vmul.f32 0.5, %v3423_v21 }
  0xea   :  { %v256_v35 = vpop.f32.mrf.mxu0  ;;  %v3552_v38 = vadd.f32 1.0, %v678_v0  ;;  %v3564_v0 = vmul.f32 0.5, %v3481_v55 }
  0xeb   :  { %v3523_v43 = vadd.f32 %v256_v35, %v3298_v8  ;;  %v779_v6 = vmul.f32 2.1237322e-06, %v3517_v36  ;;  %v790_v63 = vmul.f32 3.8918573e-05, %v3517_v36  ;;  %v754_v15 = vmul.f32 %v753_v45, %v3475_v22 }
  0xec   :  { %v743_v3 = vmul.f32 %v742_v1, %v3475_v22  ;;  %v716_v8 = vmul.f32 %v715_v19, %v3443_v17  ;;  %v3539_v35 = vmul.f32 0.5, %v3448_v31  ;;  %v705_v1 = vmul.f32 %v704_v41, %v3443_v17 }
  0xed   :  { %v3534_v32 = vmul.f32 0.70710677, %v3523_v43  ;;  %v780_v20 = vadd.f32 0.00028619796, %v779_v6  ;;  %v791_v24 = vadd.f32 0.001143296, %v790_v63  ;;  %v3550_v31 = vmul.f32 %v628_v7, %v3385_v18 }
  0xee   :  { %v755_v21 = vadd.f32 0.112945676, %v754_v15  ;;  %v744_v39 = vadd.f32 0.05243302, %v743_v3  ;;  %v717_v54 = vadd.f32 0.4994258, %v716_v8  ;;  %2897 = vrcp.f32 %v3552_v38 }
  0xef   :  { %v817_v45 = vmul.f32 %v3534_v32, %v3534_v32  ;;  %v781_v44 = vmul.f32 %v780_v20, %v3517_v36  ;;  %v792_v19 = vmul.f32 %v791_v24, %v3517_v36  ;;  %v632_v20 = vmul.f32 %v631_v37, %v3395_v34 }
  0xf0   :  { %v756_v14 = vmul.f32 %v755_v21, %v3475_v22  ;;  %v706_v24 = vadd.f32 0.18741608, %v705_v1  ;;  %v718_v21 = vmul.f32 %v717_v54, %v3443_v17  ;;  %v3572_v1 = vmul.f32 %v668_v33, %v3407_v56 }
  0xf1   :  { %v3546_v6 = vmin.f32 %v817_v45, 16.0  ;;  %v782_v63 = vadd.f32 0.0036580483, %v781_v44  ;;  %v793_v15 = vadd.f32 0.014752088, %v792_v19  ;;  %v745_v44 = vmul.f32 %v744_v39, %v3475_v22 }
  0xf2   :  { %v259_v23 = vpop.f32.mrf.mxu0  ;;  %v757_v7 = vadd.f32 0.4994258, %v756_v14  ;;  %v707_v55 = vmul.f32 %v706_v24, %v3443_v17  ;;  %v3589_v17 = vmul.f32 0.5, %v3523_v43  ;;  %vm685_vm1 = vweird.f32 %v3552_v38 }
  0xf3   :  { %v819_v26 = vmul.f32 2.1237322e-06, %v3546_v6  ;;  %v3556_v41 = vadd.f32 %v259_v23, %v3300_v9  ;;  %v830_v3 = vmul.f32 3.8918573e-05, %v3546_v6  ;;  %v783_v8 = vmul.f32 %v782_v63, %v3517_v36 }
  0xf4   :  { %v794_v18 = vmul.f32 %v793_v15, %v3517_v36  ;;  %v758_v37 = vmul.f32 %v757_v7, %v3475_v22  ;;  %v633_v15 = vadd.f32 0.014752088, %v632_v20  ;;  %v3581_v7 = vadd.f32 1.0, %v718_v21 }
  0xf5   :  { %v820_v45 = vadd.f32 0.00028619796, %v819_v26  ;;  %v784_v9 = vadd.f32 0.05243302, %v783_v8  ;;  %v3568_v23 = vmul.f32 0.70710677, %v3556_v41 }
  0xf6   :  { %v831_v19 = vadd.f32 0.001143296, %v830_v3  ;;  %v795_v63 = vadd.f32 0.112945676, %v794_v18  ;;  %v746_v26 = vadd.f32 0.18741608, %v745_v44  ;;  %2899 = vrcp.f32 %v3581_v7 }
  0xf7   :  { %v821_v14 = vmul.f32 %v820_v45, %v3546_v6  ;;  %v857_v39 = vmul.f32 %v3568_v23, %v3568_v23  ;;  %v785_v33 = vmul.f32 %v784_v9, %v3517_v36  ;;  %v3586_v11 = vadd.f32 1.0, %v758_v37 }
  0xf8   :  { %v832_v54 = vmul.f32 %v831_v19, %v3546_v6  ;;  %v796_v8 = vmul.f32 %v795_v63, %v3517_v36  ;;  %v708_v19 = vadd.f32 1.1283791, %v707_v55  ;;  %v3596_v63 = vpop.eup %2897  ;;  %v747_v37 = vmul.f32 %v746_v26, %v3475_v22 }
  0xf9   :  { %v822_v3 = vadd.f32 0.0036580483, %v821_v14  ;;  %v3584_v56 = vmin.f32 %v857_v39, 16.0  ;;  %2901 = vrcp.f32 %v3586_v11  ;;  %vm765_vm2 = vweird.f32 %v3586_v11 }
  0xfa   :  { %v262_v18 = vpop.f32.mrf.mxu0  ;;  %v833_v45 = vadd.f32 0.014752088, %v832_v54  ;;  %v797_v44 = vadd.f32 0.4994258, %v796_v8  ;;  %v786_v54 = vadd.f32 0.18741608, %v785_v33  ;;  %v3609_v22 = vmul.f32 %v708_v19, %v3430_v50 }
  0xfb   :  { %v823_v24 = vmul.f32 %v822_v3, %v3546_v6  ;;  %v263_v20 = vadd.f32 %v262_v18, %v3294_v5  ;;  %v859_v21 = vmul.f32 2.1237322e-06, %v3584_v56  ;;  %v870_v14 = vmul.f32 3.8918573e-05, %v3584_v56 }
  0xfc   :  { %v834_v9 = vmul.f32 %v833_v45, %v3546_v6  ;;  %v798_v43 = vmul.f32 %v797_v44, %v3517_v36  ;;  %v3614_v33 = vmul.f32 %v633_v15, %v3395_v34  ;;  %v3622_v4 = vpop.eup %2899  ;;  %vm725_vm9 = vweird.f32 %v3581_v7 }
  0xfd   :  { %v3599_v39 = vmul.f32 0.70710677, %v263_v20  ;;  %v860_v5 = vadd.f32 0.00028619796, %v859_v21  ;;  %v871_v3 = vadd.f32 0.001143296, %v870_v14  ;;  %vm726_vm7 = vweird.f32 %v3622_v4 }
  0xfe   :  { %v824_v55 = vadd.f32 0.05243302, %v823_v24  ;;  %v835_v18 = vadd.f32 0.112945676, %v834_v9  ;;  %v3606_v45 = vadd.f32 1.0, %v798_v43  ;;  %v731_v14 = vand.u32 2147483648, %v3581_v7 }
  0xff   :  { %v897_v8 = vmul.f32 %v3599_v39, %v3599_v39  ;;  %v861_v26 = vmul.f32 %v860_v5, %v3584_v56  ;;  %v872_v44 = vmul.f32 %v871_v3, %v3584_v56  ;;  %v748_v9 = vadd.f32 1.1283791, %v747_v37  ;;  %v3627_v27 = vpop.eup %2901 }
 0x100   :  { %v836_v24 = vmul.f32 %v835_v18, %v3546_v6  ;;  %2903 = vrcp.f32 %v3606_v45  ;;  %v787_v43 = vmul.f32 %v786_v54, %v3517_v36  ;;  %v825_v5 = vmul.f32 %v824_v55, %v3546_v6 }
 0x101   :  { %v3616_v21 = vmin.f32 %v897_v8, 16.0  ;;  %v862_v50 = vadd.f32 0.0036580483, %v861_v26  ;;  %v873_v19 = vadd.f32 0.014752088, %v872_v44  ;;  %v3630_v18 = vmul.f32 0.5, %v3556_v41 }
 0x102   :  { %v837_v8 = vadd.f32 0.4994258, %v836_v24  ;;  %v3636_v57 = vor.u32 1.1754944e-38, %v731_v14  ;;  %v3639_v25 = vmul.f32 %v748_v9, %v3456_v10  ;;  %v788_v24 = vadd.f32 1.1283791, %v787_v43 }
 0x103   :  { %v899_v15 = vmul.f32 2.1237322e-06, %v3616_v21  ;;  %v910_v3 = vmul.f32 3.8918573e-05, %v3616_v21  ;;  %v863_v37 = vmul.f32 %v862_v50, %v3584_v56  ;;  %v874_v36 = vmul.f32 %v873_v19, %v3584_v56 }
 0x104   :  { %v838_v55 = vmul.f32 %v837_v8, %v3546_v6  ;;  %v826_v13 = vadd.f32 0.18741608, %v825_v5  ;;  %v761_v14 = vmul.f32 %v3627_v27, %v3586_v11  ;;  %v3651_v10 = vmul.f32 %v3622_v4, %v3581_v7 }
 0x105   :  { %v900_v26 = vadd.f32 0.00028619796, %v899_v15  ;;  %v911_v44 = vadd.f32 0.001143296, %v910_v3  ;;  %v864_v58 = vadd.f32 0.05243302, %v863_v37  ;;  %v3657_v8 = vmul.f32 %v788_v24, %v3495_v12 }
 0x106   :  { %v875_v2 = vadd.f32 0.112945676, %v874_v36  ;;  %v2904_v41 = vpop.eup %2903  ;;  %v3643_v48 = vadd.f32 1.0, %v838_v55  ;;  %v3653_v9 = vmul.f32 0.5, %v263_v20  ;;  %v3662_v36 = vmul.f32 %v3596_v63, %v3552_v38 }
 0x107   :  { %v901_v50 = vmul.f32 %v900_v26, %v3616_v21  ;;  %v912_v19 = vmul.f32 %v911_v44, %v3616_v21  ;;  %v801_v3 = vmul.f32 %v2904_v41, %v3606_v45  ;;  %v827_v26 = vmul.f32 %v826_v13, %v3546_v6 }
 0x108   :  { %v876_v15 = vmul.f32 %v875_v2, %v3584_v56  ;;  %2905 = vrcp.f32 %v3643_v48  ;;  %v865_v2 = vmul.f32 %v864_v58, %v3584_v56  ;;  %v811_v12 = vand.u32 2147483648, %v3606_v45 }
 0x109   :  { %v902_v43 = vadd.f32 0.0036580483, %v901_v50  ;;  %v913_v5 = vadd.f32 0.014752088, %v912_v19  ;;  %v802_v55 = vsub.f32 1.0, %v801_v3  ;;  %v762_v24 = vsub.f32 1.0, %v761_v14 }
 0x10a   :  { %v877_v37 = vadd.f32 0.4994258, %v876_v15  ;;  %v769_v58 = vand.u32 2147483647, %v3586_v11  ;;  %v809_v53 = vand.u32 2147483647, %v3606_v45  ;;  %vm806_vm3 = vweird.f32 %v2904_v41 }
 0x10b   :  { %v903_v44 = vmul.f32 %v902_v43, %v3616_v21  ;;  %v914_v20 = vmul.f32 %v913_v5, %v3616_v21  ;;  %v803_v54 = vmul.f32 %v2904_v41, %v802_v55  ;;  %v866_v13 = vadd.f32 0.18741608, %v865_v2 }
 0x10c   :  { %v878_v50 = vmul.f32 %v877_v37, %v3584_v56  ;;  %v763_v3 = vmul.f32 %v3627_v27, %v762_v24  ;;  %v828_v5 = vadd.f32 1.1283791, %v827_v26  ;;  %vm805_vm4 = vweird.f32 %v3606_v45 }
 0x10d   :  { %v904_v19 = vadd.f32 0.05243302, %v903_v44  ;;  %v915_v15 = vadd.f32 0.112945676, %v914_v20  ;;  %v804_v16 = vadd.f32 %v2904_v41, %v803_v54  ;;  %v849_v44 = vand.u32 2147483647, %v3643_v48  ;;  %vm807_vm5 = vmor %vm805_vm4, %vm806_vm3 }
 0x10e   :  { %v3672_v6 = vadd.f32 1.0, %v878_v50  ;;  %v3675_v43 = vpop.eup %2905  ;;  %v812_v2 = vor.u32 1.1754944e-38, %v811_v12  ;;  %vm766_vm6 = vweird.f32 %v3627_v27  ;;  %v867_v26 = vmul.f32 %v866_v13, %v3584_v56 }
 0x10f   :  { %v905_v37 = vmul.f32 %v904_v19, %v3616_v21  ;;  %v916_v14 = vmul.f32 %v915_v15, %v3616_v21  ;;  %v841_v50 = vmul.f32 %v3675_v43, %v3643_v48  ;;  %v808_v54 = vsel %vm807_vm5, %v2904_v41, %v804_v16  ;;  %vm3698_vm11 = vmor %vm765_vm2, %vm766_vm6 }
 0x110   :  { %2907 = vrcp.f32 %v3672_v6  ;;  %v764_v24 = vadd.f32 %v3627_v27, %v763_v3  ;;  %v771_v19 = vand.u32 2147483648, %v3586_v11  ;;  %v3690_v45 = vmul.f32 %v828_v5, %v3534_v32  ;;  %vm3757_vm5 = vmor %vm725_vm9, %vm726_vm7 }
 0x111   :  { %v906_v20 = vadd.f32 0.18741608, %v905_v37  ;;  %v917_v55 = vadd.f32 0.4994258, %v916_v14  ;;  %v842_v15 = vsub.f32 1.0, %v841_v50  ;;  %vm810_vm8 = vcmp.eq.f32.partialorder %v809_v53, 8.507059e+37 }
 0x112   :  { %vm845_vm10 = vweird.f32 %v3643_v48  ;;  %v851_v37 = vand.u32 2147483648, %v3643_v48  ;;  %v813_v14 = vsel %vm810_vm8, %v812_v2, %v808_v54  ;;  %v722_v32 = vsub.f32 1.0, %v3651_v10 }
 0x113   :  { %v918_v12 = vmul.f32 %v917_v55, %v3616_v21  ;;  %v907_v56 = vmul.f32 %v906_v20, %v3616_v21  ;;  %v843_v53 = vmul.f32 %v3675_v43, %v842_v15  ;;  %v768_v13 = vsel %vm3698_vm11, %v3627_v27, %v764_v24 }
 0x114   :  { %v868_v5 = vadd.f32 1.1283791, %v867_v26  ;;  %vm3710_vm12 = vcmp.eq.f32.partialorder %v849_v44, 8.507059e+37  ;;  %vm770_vm13 = vcmp.eq.f32.partialorder %v769_v58, 8.507059e+37  ;;  %v772_v2 = vor.u32 1.1754944e-38, %v771_v19 }
 0x115   :  { %v3704_v41 = vadd.f32 1.0, %v918_v12  ;;  %v723_v10 = vmul.f32 %v3622_v4, %v722_v32  ;;  %v889_v21 = vand.u32 2147483647, %v3672_v6  ;;  %vm846_vm14 = vweird.f32 %v3675_v43 }
 0x116   :  { %v2908_v3 = vpop.eup %2907  ;;  %v814_v20 = vmul.f32 %v813_v14, %v3657_v8  ;;  %v5632_v27 = vand.u32 2147483647, %v3581_v7  ;;  %v844_v58 = vadd.f32 %v3675_v43, %v843_v53  ;;  %v773_v50 = vsel %vm770_vm13, %v772_v2, %v768_v13  ;;  %vm3743_vm3 = vmor %vm845_vm10, %vm846_vm14 }
 0x117   :  { %2909 = vrcp.f32 %v3704_v41  ;;  %v881_v44 = vmul.f32 %v2908_v3, %v3672_v6  ;;  %v682_v26 = vsub.f32 1.0, %v3662_v36  ;;  %v908_v54 = vadd.f32 1.1283791, %v907_v56 }
 0x118   :  { %vm3721_vm15 = vcmp.eq.f32.partialorder %v5632_v27, 8.507059e+37  ;;  %v891_v24 = vand.u32 2147483648, %v3672_v6  ;;  %v852_v19 = vor.u32 1.1754944e-38, %v851_v37  ;;  %v724_v12 = vadd.f32 %v3622_v4, %v723_v10 }
 0x119   :  { %v869_v8 = vmul.f32 %v868_v5, %v3568_v23  ;;  %v929_v15 = vand.u32 2147483647, %v3704_v41  ;;  %v882_v14 = vsub.f32 1.0, %v881_v44  ;;  %vm885_vm0 = vweird.f32 %v3672_v6 }
 0x11a   :  { %v931_v16 = vand.u32 2147483648, %v3704_v41  ;;  %vm3735_vm2 = vcmp.eq.f32.partialorder %v889_v21, 8.507059e+37  ;;  %v2824_v23 = vclamps-f32 %v814_v20, 1.0  ;;  %v3748_v37 = vmul.f32 %v773_v50, %v3639_v25 }
 0x11b   :  { %v883_v56 = vmul.f32 %v2908_v3, %v882_v14  ;;  %vm886_vm4 = vweird.f32 %v2908_v3  ;;  %v848_v53 = vsel %vm3743_vm3, %v3675_v43, %v844_v58  ;;  %v683_v13 = vmul.f32 %v3596_v63, %v682_v26 }
 0x11c   :  { %v909_v25 = vmul.f32 %v908_v54, %v3599_v39  ;;  %v892_v2 = vor.u32 1.1754944e-38, %v891_v24  ;;  %v728_v10 = vsel %vm3757_vm5, %v3622_v4, %v724_v12  ;;  %vm686_vm6 = vweird.f32 %v3596_v63  ;;  %vm887_vm9 = vmor %vm885_vm0, %vm886_vm4 }
 0x11d   :  { %v2910_v5 = vpop.eup %2909  ;;  %vm925_vm8 = vweird.f32 %v3704_v41  ;;  %vm3769_vm7 = vcmp.eq.f32.partialorder %v929_v15, 8.507059e+37  ;;  %v884_v21 = vadd.f32 %v2908_v3, %v883_v56  ;;  %v932_v20 = vor.u32 1.1754944e-38, %v931_v16  ;;  %vm3793_vm11 = vmor %vm685_vm1, %vm686_vm6 }
 0x11e   :  { %v921_v43 = vmul.f32 %v2910_v5, %v3704_v41  ;;  %v853_v39 = vsel %vm3710_vm12, %v852_v19, %v848_v53  ;;  %v949_v27 = vadd.f32 1.0, %v2824_v23  ;;  %v2823_v4 = vclamps-f32 %v3748_v37, 1.0 }
 0x11f   :  { %v888_v58 = vsel %vm887_vm9, %v2908_v3, %v884_v21  ;;  %v733_v50 = vsel %vm3721_vm15, %v3636_v57, %v728_v10  ;;  %v684_v26 = vadd.f32 %v3596_v63, %v683_v13  ;;  %v689_v6 = vand.u32 2147483647, %v3552_v38 }
 0x120   :  { %v922_v44 = vsub.f32 1.0, %v921_v43  ;;  %v893_v54 = vsel %vm3735_vm2, %v892_v2, %v888_v58  ;;  %v635_v24 = vadd.f32 0.112945676, %v3614_v33  ;;  %v590_v11 = vmul.f32 3.8918573e-05, %v3372_v61 }
 0x121   :  { %vm926_vm10 = vweird.f32 %v2910_v5  ;;  %v854_v12 = vmul.f32 %v853_v39, %v3690_v45  ;;  %v691_v3 = vand.u32 2147483648, %v3552_v38  ;;  %v894_v15 = vmul.f32 %v893_v54, %v869_v8 }
 0x122   :  { %v923_v19 = vmul.f32 %v2910_v5, %v922_v44  ;;  %v636_v55 = vmul.f32 %v635_v24, %v3395_v34  ;;  %v591_v33 = vadd.f32 0.001143296, %v590_v11  ;;  %v550_v14 = vmul.f32 3.8918573e-05, %v3360_v51  ;;  %vm927_vm12 = vmor %vm925_vm8, %vm926_vm10 }
 0x123   :  { %v734_v32 = vmul.f32 %v733_v50, %v3609_v22  ;;  %v688_v45 = vsel %vm3793_vm11, %v3596_v63, %v684_v26  ;;  %v510_v8 = vmul.f32 3.8918573e-05, %v3357_v49  ;;  %vm690_vm13 = vcmp.eq.f32.partialorder %v689_v6, 8.507059e+37 }
 0x124   :  { %v924_v16 = vadd.f32 %v2910_v5, %v923_v19  ;;  %v637_v38 = vadd.f32 0.4994258, %v636_v55  ;;  %v592_v36 = vmul.f32 %v591_v33, %v3372_v61  ;;  %v551_v23 = vadd.f32 0.001143296, %v550_v14 }
 0x125   :  { %v692_v56 = vor.u32 1.1754944e-38, %v691_v3  ;;  %v511_v53 = vadd.f32 0.001143296, %v510_v8  ;;  %v470_v48 = vmul.f32 3.8918573e-05, %v3345_v42  ;;  %v2826_v13 = vclamps-f32 %v894_v15, 1.0 }
 0x126   :  { %v928_v37 = vsel %vm927_vm12, %v2910_v5, %v924_v16  ;;  %v638_v63 = vmul.f32 %v637_v38, %v3395_v34  ;;  %v593_v2 = vadd.f32 0.014752088, %v592_v36  ;;  %v552_v43 = vmul.f32 %v551_v23, %v3360_v51 }
 0x127   :  { %v933_v22 = vsel %vm3769_vm7, %v932_v20, %v928_v37  ;;  %v693_v41 = vsel %vm690_vm13, %v692_v56, %v688_v45  ;;  %v512_v21 = vmul.f32 %v511_v53, %v3357_v49  ;;  %v2825_v39 = vclamps-f32 %v854_v12, 1.0 }
 0x128   :  { %v934_v10 = vmul.f32 %v933_v22, %v909_v25  ;;  %v3813_v44 = vadd.f32 1.0, %v638_v63  ;;  %v594_v5 = vmul.f32 %v593_v2, %v3372_v61  ;;  %v471_v58 = vadd.f32 0.001143296, %v470_v48 }
 0x129   :  { %v2822_v26 = vclamps-f32 %v734_v32, 1.0  ;;  %v553_v7 = vadd.f32 0.014752088, %v552_v43  ;;  %v513_v20 = vadd.f32 0.014752088, %v512_v21  ;;  %v965_v54 = vmul.f32 %v949_v27, %v3564_v0 }
 0x12a   :  { %v2827_v50 = vclamps-f32 %v934_v10, 1.0  ;;  %v948_v34 = vadd.f32 1.0, %v2823_v4  ;;  %v694_v25 = vmul.f32 %v693_v41, %v3572_v1  ;;  %2911 = vrcp.f32 %v3813_v44 }
 0x12b   :  { %v951_v24 = vadd.f32 1.0, %v2826_v13  ;;  %v595_v11 = vadd.f32 0.112945676, %v594_v5  ;;  %v554_v19 = vmul.f32 %v553_v7, %v3360_v51  ;;  %v950_v12 = vadd.f32 1.0, %v2825_v39 }
 0x12c   :  { %v952_v6 = vadd.f32 1.0, %v2827_v50  ;;  %v514_v3 = vmul.f32 %v513_v20, %v3357_v49  ;;  %v472_v15 = vmul.f32 %v471_v58, %v3345_v42  ;;  %v430_v57 = vmul.f32 3.8918573e-05, %v3341_v40 }
 0x12d   :  { %v947_v0 = vadd.f32 1.0, %v2822_v26  ;;  %v596_v27 = vmul.f32 %v595_v11, %v3372_v61  ;;  %v555_v1 = vadd.f32 0.112945676, %v554_v19  ;;  %v964_v4 = vmul.f32 %v948_v34, %v3539_v35 }
 0x12e   :  { %v968_v55 = vmul.f32 %v952_v6, %v3653_v9  ;;  %v515_v33 = vadd.f32 0.112945676, %v514_v3  ;;  %v473_v14 = vadd.f32 0.014752088, %v472_v15  ;;  %v431_v16 = vadd.f32 0.001143296, %v430_v57 }
 0x12f   :  { %v967_v32 = vmul.f32 %v951_v24, %v3630_v18  ;;  %v2821_v45 = vclamps-f32 %v694_v25, 1.0  ;;  %v597_v8 = vadd.f32 0.4994258, %v596_v27  ;;  %v556_v38 = vmul.f32 %v555_v1, %v3360_v51 }
 0x130   :  { %1081 = vmatpush.msra.mxu1 %v968_v55  ;;  %2860 = vmatpush.msra.mxu3 %v968_v55  ;;  %v2912_v36 = vpop.eup %2911  ;;  %v966_v9 = vmul.f32 %v950_v12, %v3589_v17  ;;  %v516_v23 = vmul.f32 %v515_v33, %v3357_v49  ;;  %v474_v37 = vmul.f32 %v473_v14, %v3345_v42  ;;  %v390_v48 = vmul.f32 3.8918573e-05, %v3374_v62 }
 0x131   :  { %v432_v35 = vmul.f32 %v431_v16, %v3341_v40  ;;  %v641_v56 = vmul.f32 %v2912_v36, %v3813_v44  ;;  %v598_v53 = vmul.f32 %v597_v8, %v3372_v61  ;;  %v557_v18 = vadd.f32 0.4994258, %v556_v38 }
 0x132   :  { %1082 = vmatpush.msra.mxu1 %v967_v32  ;;  %2861 = vmatpush.msra.mxu3 %v967_v32  ;;  %v963_v22 = vmul.f32 %v947_v0, %v3530_v29  ;;  %v517_v13 = vadd.f32 0.4994258, %v516_v23  ;;  %v475_v63 = vadd.f32 0.112945676, %v474_v37  ;;  %v946_v2 = vadd.f32 1.0, %v2821_v45 }
 0x133   :  { %v433_v17 = vadd.f32 0.014752088, %v432_v35  ;;  %v642_v10 = vsub.f32 1.0, %v641_v56  ;;  %v3836_v41 = vadd.f32 1.0, %v598_v53  ;;  %v558_v43 = vmul.f32 %v557_v18, %v3360_v51 }
 0x134   :  { %1083 = vmatpush.msra.mxu1 %v966_v9  ;;  %2862 = vmatpush.msra.mxu3 %v966_v9  ;;  %v651_v21 = vand.u32 2147483648, %v3813_v44  ;;  %v518_v61 = vmul.f32 %v517_v13, %v3357_v49  ;;  %v476_v39 = vmul.f32 %v475_v63, %v3345_v42  ;;  %vm646_vm14 = vweird.f32 %v2912_v36 }
 0x135   :  { %v434_v5 = vmul.f32 %v433_v17, %v3341_v40  ;;  %v643_v29 = vmul.f32 %v2912_v36, %v642_v10  ;;  %v649_v58 = vand.u32 2147483647, %v3813_v44  ;;  %2913 = vrcp.f32 %v3836_v41 }
 0x136   :  { %1084 = vmatpush.msra.mxu1 %v965_v54  ;;  %2863 = vmatpush.msra.mxu3 %v965_v54  ;;  %v3845_v50 = vadd.f32 1.0, %v558_v43  ;;  %v3847_v26 = vadd.f32 1.0, %v518_v61  ;;  %v391_v51 = vadd.f32 0.001143296, %v390_v48  ;;  %v350_v7 = vmul.f32 3.8918573e-05, %v3354_v47 }
 0x137   :  { %v644_v49 = vadd.f32 %v2912_v36, %v643_v29  ;;  %vm645_vm15 = vweird.f32 %v3813_v44  ;;  %v477_v20 = vadd.f32 0.4994258, %v476_v39  ;;  %v435_v54 = vadd.f32 0.112945676, %v434_v5  ;;  %v5655_v48 = vld [vmem:[#allocation17_spill] sm:$0xff] }
 0x138   :  { %1085 = vmatpush.msra.mxu1 %v964_v4  ;;  %2864 = vmatpush.msra.mxu3 %v964_v4  ;;  %vm647_vm0 = vmor %vm645_vm15, %vm646_vm14  ;;  %v652_v34 = vor.u32 1.1754944e-38, %v651_v21  ;;  %v609_v25 = vand.u32 2147483647, %v3836_v41  ;;  %v611_v6 = vand.u32 2147483648, %v3836_v41  ;;  %2915 = vrcp.f32 %v3845_v50 }
 0x139   :  { %v962_v24 = vmul.f32 %v946_v2, %v3514_v30  ;;  %v648_v11 = vsel %vm647_vm0, %v2912_v36, %v644_v49  ;;  %vm650_vm1 = vcmp.eq.f32.partialorder %v649_v58, 8.507059e+37  ;;  %2917 = vrcp.f32 %v3847_v26 }
 0x13a   :  { %1086 = vmatpush.msra.mxu1 %v963_v22  ;;  %2865 = vmatpush.msra.mxu3 %v963_v22  ;;  %v589_v44 = vmul.f32 %v3519_v60, %v3363_v52  ;;  %v653_v19 = vsel %vm650_vm1, %v652_v34, %v648_v11  ;;  %v392_v12 = vmul.f32 %v391_v51, %v3374_v62  ;;  %v351_v3 = vadd.f32 0.001143296, %v350_v7 }
 0x13b   :  { %v2914_v15 = vpop.eup %2913  ;;  %v654_v57 = vmul.f32 %v653_v19, %v3550_v31  ;;  %v569_v55 = vand.u32 2147483647, %v3845_v50  ;;  %v478_v30 = vmul.f32 %v477_v20, %v3345_v42  ;;  %v436_v0 = vmul.f32 %v435_v54, %v3341_v40 }
 0x13c   :  { %1087 = vmatpush.msra.mxu1 %v962_v24  ;;  %2866 = vmatpush.msra.mxu3 %v962_v24  ;;  %v601_v27 = vmul.f32 %v2914_v15, %v3836_v41  ;;  %vm605_vm2 = vweird.f32 %v3836_v41  ;;  %vm3865_vm3 = vcmp.eq.f32.partialorder %v609_v25, 8.507059e+37  ;;  %v612_v60 = vor.u32 1.1754944e-38, %v611_v6 }
 0x13d   :  { %v2820_v1 = vclamps-f32 %v654_v57, 1.0  ;;  %vm565_vm4 = vweird.f32 %v3845_v50  ;;  %v571_v31 = vand.u32 2147483648, %v3845_v50  ;;  %v529_v4 = vand.u32 2147483647, %v3847_v26 }
 0x13e   :  { %v3872_v33 = vadd.f32 1.0, %v478_v30  ;;  %v2916_v42 = vpop.eup %2915  ;;  %v602_v14 = vsub.f32 1.0, %v601_v27  ;;  %vm525_vm5 = vweird.f32 %v3847_v26  ;;  %v437_v16 = vadd.f32 0.4994258, %v436_v0  ;;  %v5652_v27 = vld [vmem:[#allocation20_spill] sm:$0xff] }
 0x13f   :  { %v393_v32 = vadd.f32 0.014752088, %v392_v12  ;;  %v2918_v45 = vpop.eup %2917  ;;  %v945_v8 = vadd.f32 1.0, %v2820_v1  ;;  %v561_v38 = vmul.f32 %v2916_v42, %v3845_v50  ;;  %vm3876_vm6 = vcmp.eq.f32.partialorder %v569_v55, 8.507059e+37  ;;  %v5651_v12 = vld [vmem:[#allocation22_spill] sm:$0xff] }
 0x140   :  { %2919 = vrcp.f32 %v3872_v33  ;;  %v352_v9 = vmul.f32 %v351_v3, %v3354_v47  ;;  %v603_v23 = vmul.f32 %v2914_v15, %v602_v14  ;;  %vm606_vm8 = vweird.f32 %v2914_v15 }
 0x141   :  { %v521_v37 = vmul.f32 %v2918_v45, %v3847_v26  ;;  %v531_v35 = vand.u32 2147483648, %v3847_v26  ;;  %v961_v56 = vmul.f32 %v945_v8, %v3500_v46  ;;  %v562_v53 = vsub.f32 1.0, %v561_v38  ;;  %vm607_vm9 = vmor %vm605_vm2, %vm606_vm8  ;;  %v5653_v8 = vld [vmem:[#allocation19_spill] sm:$0xff] }
 0x142   :  { %v572_v18 = vor.u32 1.1754944e-38, %v571_v31  ;;  %vm3885_vm7 = vcmp.eq.f32.partialorder %v529_v4, 8.507059e+37  ;;  %v604_v22 = vadd.f32 %v2914_v15, %v603_v23  ;;  %v438_v63 = vmul.f32 %v437_v16, %v3341_v40 }
 0x143   :  { %v522_v13 = vsub.f32 1.0, %v521_v37  ;;  %v394_v17 = vmul.f32 %v393_v32, %v3374_v62  ;;  %1088 = vmatpush.msra.mxu1 %v961_v56  ;;  %2867 = vmatpush.msra.mxu3 %v961_v56  ;;  %v563_v2 = vmul.f32 %v2916_v42, %v562_v53  ;;  %vm566_vm10 = vweird.f32 %v2916_v42  ;;  %v5654_v37 = vld [vmem:[#allocation21_spill] sm:$0xff] }
 0x144   :  { %v353_v46 = vadd.f32 0.014752088, %v352_v9  ;;  %v310_v10 = vmul.f32 3.8918573e-05, %v3410_v59  ;;  %v608_v43 = vsel %vm607_vm9, %v2914_v15, %v604_v22  ;;  %vm526_vm11 = vweird.f32 %v2918_v45  ;;  %vm567_vm12 = vmor %vm565_vm4, %vm566_vm10 }
 0x145   :  { %v523_v21 = vmul.f32 %v2918_v45, %v522_v13  ;;  %v3894_v61 = vadd.f32 1.0, %v438_v63  ;;  %v613_v40 = vsel %vm3865_vm3, %v612_v60, %v608_v43  ;;  %v564_v5 = vadd.f32 %v2916_v42, %v563_v2  ;;  %vm527_vm13 = vmor %vm525_vm5, %vm526_vm11  ;;  %v5656_v43 = vld [vmem:[#allocation16_spill] sm:$0xff] }
 0x146   :  { %v2920_v39 = vpop.eup %2919  ;;  %v532_v29 = vor.u32 1.1754944e-38, %v531_v35  ;;  %v489_v58 = vand.u32 2147483647, %v3872_v33  ;;  %v614_v41 = vmul.f32 %v613_v40, %v589_v44  ;;  %v395_v49 = vadd.f32 0.112945676, %v394_v17 }
 0x147   :  { %v524_v51 = vadd.f32 %v2918_v45, %v523_v21  ;;  %v481_v7 = vmul.f32 %v2920_v39, %v3872_v33  ;;  %v568_v20 = vsel %vm567_vm12, %v2916_v42, %v564_v5  ;;  %2921 = vrcp.f32 %v3894_v61 }
 0x148   :  { %v354_v54 = vmul.f32 %v353_v46, %v3354_v47  ;;  %v311_v34 = vadd.f32 0.001143296, %v310_v10  ;;  %v2819_v25 = vclamps-f32 %v614_v41, 1.0  ;;  %v573_v6 = vsel %vm3876_vm6, %v572_v18, %v568_v20  ;;  %v5660_v20 = vld [vmem:[#allocation18_spill] sm:$0xff] }
 0x149   :  { %v528_v24 = vsel %vm527_vm13, %v2918_v45, %v524_v51  ;;  %v482_v50 = vsub.f32 1.0, %v481_v7  ;;  %v574_v11 = vmul.f32 %v573_v6, %v3511_v28  ;;  %vm486_vm14 = vweird.f32 %v2920_v39  ;;  %v5658_v51 = vld [vmem:[#allocation15_spill] sm:$0xff] }
 0x14a   :  { %v533_v44 = vsel %vm3885_vm7, %v532_v29, %v528_v24  ;;  %v491_v26 = vand.u32 2147483648, %v3872_v33  ;;  %v944_v19 = vadd.f32 1.0, %v2819_v25  ;;  %v396_v57 = vmul.f32 %v395_v49, %v3374_v62  ;;  %v5659_v49 = vld [vmem:[#allocation8_spill] sm:$0xff] }
 0x14b   :  { %v534_v3 = vmul.f32 %v533_v44, %v5651_v12  ;;  %v483_v15 = vmul.f32 %v2920_v39, %v482_v50  ;;  %v2818_v55 = vclamps-f32 %v574_v11, 1.0  ;;  %vm485_vm15 = vweird.f32 %v3872_v33  ;;  %v5661_v11 = vld [vmem:[#allocation14_spill] sm:$0xff] }
 0x14c   :  { %v355_v30 = vadd.f32 0.112945676, %v354_v54  ;;  %v312_v0 = vmul.f32 %v311_v34, %v3410_v59  ;;  %v960_v28 = vmul.f32 %v944_v19, %v5652_v27  ;;  %v397_v1 = vadd.f32 0.4994258, %v396_v57  ;;  %vm487_vm0 = vmor %vm485_vm15, %vm486_vm14 }
 0x14d   :  { %v2817_v52 = vclamps-f32 %v534_v3, 1.0  ;;  %v484_v60 = vadd.f32 %v2920_v39, %v483_v15  ;;  %v2922_v31 = vpop.eup %2921  ;;  %v943_v4 = vadd.f32 1.0, %v2818_v55  ;;  %v492_v42 = vor.u32 1.1754944e-38, %v491_v26 }
 0x14e   :  { %v356_v14 = vmul.f32 %v355_v30, %v3354_v47  ;;  %v313_v16 = vadd.f32 0.014752088, %v312_v0  ;;  %1089 = vmatpush.msra.mxu1 %v960_v28  ;;  %2868 = vmatpush.msra.mxu3 %v960_v28  ;;  %vm490_vm1 = vcmp.eq.f32.partialorder %v489_v58, 8.507059e+37  ;;  %v441_v45 = vmul.f32 %v2922_v31, %v3894_v61  ;;  %v5662_v28 = vld [vmem:[#allocation5_spill] sm:$0xff] }
 0x14f   :  { %v942_v32 = vadd.f32 1.0, %v2817_v52  ;;  %v488_v33 = vsel %vm487_vm0, %v2920_v39, %v484_v60  ;;  %v959_v38 = vmul.f32 %v943_v4, %v5653_v8  ;;  %v398_v9 = vmul.f32 %v397_v1, %v3374_v62  ;;  %v5657_v39 = vld [vmem:[#allocation6_spill] sm:$0xff] }
 0x150   :  { %v493_v36 = vsel %vm490_vm1, %v492_v42, %v488_v33  ;;  %v357_v23 = vadd.f32 0.4994258, %v356_v14  ;;  %v442_v56 = vsub.f32 1.0, %v441_v45  ;;  %v449_v53 = vand.u32 2147483647, %v3894_v61 }
 0x151   :  { %v494_v35 = vmul.f32 %v493_v36, %v5654_v37  ;;  %v314_v18 = vmul.f32 %v313_v16, %v3410_v59  ;;  %1090 = vmatpush.msra.mxu1 %v959_v38  ;;  %2869 = vmatpush.msra.mxu3 %v959_v38  ;;  %v958_v22 = vmul.f32 %v942_v32, %v5655_v48  ;;  %v451_v13 = vand.u32 2147483648, %v3894_v61 }
 0x152   :  { %v3927_v63 = vadd.f32 1.0, %v398_v9  ;;  %v358_v17 = vmul.f32 %v357_v23, %v3354_v47  ;;  %v443_v46 = vmul.f32 %v2922_v31, %v442_v56  ;;  %vm446_vm2 = vweird.f32 %v2922_v31  ;;  %v5663_v23 = vld [vmem:[#allocation11_spill] sm:$0xff] }
 0x153   :  { %v2816_v2 = vclamps-f32 %v494_v35, 1.0  ;;  %v315_v10 = vadd.f32 0.112945676, %v314_v18  ;;  %v303_v21 = vmul.f32 %v5656_v43, %v3410_v59  ;;  %v269_v40 = vmul.f32 0.5, %v5657_v39  ;;  %1091 = vmatpush.msra.mxu1 %v958_v22  ;;  %2870 = vmatpush.msra.mxu3 %v958_v22  ;;  %v5665_v39 = vld [vmem:[#allocation10_spill] sm:$0xff] }
 0x154   :  { %vm445_vm3 = vweird.f32 %v3894_v61  ;;  %2923 = vrcp.f32 %v3927_v63  ;;  %v444_v29 = vadd.f32 %v2922_v31, %v443_v46  ;;  %v3935_v58 = vadd.f32 1.0, %v358_v17  ;;  %v5664_v17 = vld [vmem:[#allocation9_spill] sm:$0xff] }
 0x155   :  { %v941_v5 = vadd.f32 1.0, %v2816_v2  ;;  %v316_v41 = vmul.f32 %v315_v10, %v3410_v59  ;;  %v386_v7 = vadd.f32 0.18741608, %v5658_v51  ;;  %v429_v54 = vmul.f32 %v5660_v20, %v5659_v49  ;;  %vm447_vm4 = vmor %vm445_vm3, %vm446_vm2 }
 0x156   :  { %v452_v34 = vor.u32 1.1754944e-38, %v451_v13  ;;  %v448_v6 = vsel %vm447_vm4, %v2922_v31, %v444_v29  ;;  %vm450_vm5 = vcmp.eq.f32.partialorder %v449_v53, 8.507059e+37  ;;  %2925 = vrcp.f32 %v3935_v58 }
 0x157   :  { %v957_v25 = vmul.f32 %v941_v5, %v269_v40  ;;  %v304_v61 = vadd.f32 0.05243302, %v303_v21  ;;  %v317_v50 = vadd.f32 0.4994258, %v316_v41  ;;  %v346_v44 = vadd.f32 0.18741608, %v5661_v11 }
 0x158   :  { %v453_v24 = vsel %vm450_vm5, %v452_v34, %v448_v6  ;;  %v387_v12 = vmul.f32 %v386_v7, %v3374_v62  ;;  %v268_v52 = vmul.f32 0.5, %v5662_v28  ;;  %v411_v4 = vand.u32 2147483648, %v3927_v63  ;;  %v971_v28 = vld [vmem:[%s5556_s3 + $0x10] sm:$0xff] }
 0x159   :  { %1092 = vmatpush.msra.mxu1 %v957_v25  ;;  %2871 = vmatpush.msra.mxu3 %v957_v25  ;;  %v454_v26 = vmul.f32 %v453_v24, %v429_v54  ;;  %v318_v3 = vmul.f32 %v317_v50, %v3410_v59  ;;  %v305_v55 = vmul.f32 %v304_v61, %v3410_v59  ;;  %v409_v16 = vand.u32 2147483647, %v3927_v63  ;;  %v5666_v54 = vld [vmem:[#allocation7_spill] sm:$0xff]  ;;  %v5667_v61 = vld [vmem:[#allocation13_spill] sm:$0xff] }
 0x15a   :  { %v2924_v19 = vpop.eup %2923  ;;  %v347_v27 = vmul.f32 %v346_v44, %v3354_v47  ;;  %v388_v31 = vadd.f32 1.1283791, %v387_v12  ;;  %vm405_vm8 = vweird.f32 %v3927_v63  ;;  %v371_v8 = vand.u32 2147483648, %v3935_v58  ;;  %v5668_v12 = vld [vmem:[#allocation12_spill] sm:$0xff] }
 0x15b   :  { %v2815_v15 = vclamps-f32 %v454_v26, 1.0  ;;  %v401_v57 = vmul.f32 %v2924_v19, %v3927_v63  ;;  %v3947_v30 = vadd.f32 1.0, %v318_v3  ;;  %vm406_vm6 = vweird.f32 %v2924_v19 }
 0x15c   :  { %v2926_v0 = vpop.eup %2925  ;;  %v306_v32 = vadd.f32 0.18741608, %v305_v55  ;;  %v348_v45 = vadd.f32 1.1283791, %v347_v27  ;;  %vm407_vm7 = vmor %vm405_vm8, %vm406_vm6  ;;  %v412_v38 = vor.u32 1.1754944e-38, %v411_v4  ;;  %v389_v37 = vmul.f32 %v388_v31, %v5663_v23  ;;  %v969_v55 = vld [vmem:[%s5556_s3] sm:$0xff] }
 0x15d   :  { %v940_v60 = vadd.f32 1.0, %v2815_v15  ;;  %v402_v1 = vsub.f32 1.0, %v401_v57  ;;  %v361_v62 = vmul.f32 %v2926_v0, %v3935_v58  ;;  %2927 = vrcp.f32 %v3947_v30  ;;  %v982_v27 = vld [vmem:[%s5556_s3 + $0x68] sm:$0xff]  ;;  %v973_v31 = vld [vmem:[%s5556_s3 + $0x20] sm:$0xff] }
 0x15e   :  { %vm366_vm9 = vweird.f32 %v2926_v0  ;;  %v369_v9 = vand.u32 2147483647, %v3935_v58  ;;  %vm410_vm10 = vcmp.eq.f32.partialorder %v409_v16, 8.507059e+37  ;;  %v307_v53 = vmul.f32 %v306_v32, %v3410_v59  ;;  %v974_v4 = vld [vmem:[%s5556_s3 + $0x28] sm:$0xff]  ;;  %v979_v32 = vld [vmem:[%s5556_s3 + $0x50] sm:$0xff] }
 0x15f   :  { %v956_v42 = vmul.f32 %v940_v60, %v268_v52  ;;  %v403_v14 = vmul.f32 %v2924_v19, %v402_v1  ;;  %v362_v33 = vsub.f32 1.0, %v361_v62  ;;  %vm365_vm11 = vweird.f32 %v3935_v58  ;;  %v983_v52 = vld [vmem:[%s5556_s3 + $0x70] sm:$0xff]  ;;  %v972_v60 = vld [vmem:[%s5556_s3 + $0x18] sm:$0xff]  ;;  %v978_v16 = vld [vmem:[%s5556_s3 + $0x48] sm:$0xff] }
 0x160   :  { %vm367_vm12 = vmor %vm365_vm11, %vm366_vm9  ;;  %v372_v13 = vor.u32 1.1754944e-38, %v371_v8  ;;  %v349_v2 = vmul.f32 %v348_v45, %v5664_v17  ;;  %vm370_vm13 = vcmp.eq.f32.partialorder %v369_v9, 8.507059e+37  ;;  %v267_v40 = vmul.f32 0.5, %v5665_v39  ;;  %v984_v1 = vld [vmem:[%s5556_s3 + $0x78] sm:$0xff]  ;;  %v975_v62 = vld [vmem:[%s5556_s3 + $0x30] sm:$0xff] }
 0x161   :  { %1093 = vmatpush.msra.mxu1 %v956_v42  ;;  %2872 = vmatpush.msra.mxu3 %v956_v42  ;;  %v404_v47 = vadd.f32 %v2924_v19, %v403_v14  ;;  %v363_v36 = vmul.f32 %v2926_v0, %v362_v33  ;;  %v308_v5 = vadd.f32 1.1283791, %v307_v53  ;;  %v331_v29 = vand.u32 2147483648, %v3947_v30  ;;  %v976_v42 = vld [vmem:[%s5556_s3 + $0x38] sm:$0xff]  ;;  %v977_v14 = vld [vmem:[%s5556_s3 + $0x40] sm:$0xff] }
 0x162   :  { %v329_v51 = vand.u32 2147483647, %v3947_v30  ;;  %vm325_vm15 = vweird.f32 %v3947_v30  ;;  %v266_v34 = vmul.f32 0.5, %v5666_v54  ;;  %v265_v3 = vmul.f32 0.5, %v5668_v12  ;;  %v980_v33 = vld [vmem:[%s5556_s3 + $0x58] sm:$0xff] }
 0x163   :  { %v408_v35 = vsel %vm407_vm7, %v2924_v19, %v404_v47  ;;  %v2928_v56 = vpop.eup %2927  ;;  %v364_v48 = vadd.f32 %v2926_v0, %v363_v36  ;;  %v332_v6 = vor.u32 1.1754944e-38, %v331_v29  ;;  %v309_v24 = vmul.f32 %v308_v5, %v5667_v61  ;;  %v1074_v47 = vpop.permute.xlu2 %1073 }
 0x164   :  { %v413_v18 = vsel %vm410_vm10, %v412_v38, %v408_v35  ;;  %v321_v63 = vmul.f32 %v2928_v56, %v3947_v30  ;;  %vm326_vm14 = vweird.f32 %v2928_v56  ;;  %vm330_vm1 = vcmp.eq.f32.partialorder %v329_v51, 8.507059e+37  ;;  %v981_v30 = vld [vmem:[%s5556_s3 + $0x60] sm:$0xff]  ;;  %v1079_v36 = vpop.permute.xlu1 %1078 }
 0x165   :  { %v414_v22 = vmul.f32 %v413_v18, %v389_v37  ;;  %v368_v46 = vsel %vm367_vm12, %v2926_v0, %v364_v48  ;;  %vm327_vm0 = vmor %vm325_vm15, %vm326_vm14  ;;  %v970_v0 = vld [vmem:[%s5556_s3 + $0x8] sm:$0xff]  ;;  %v1069_v37 = vpop.permute.xlu0 %1068 }
 0x166   :  { %v373_v43 = vsel %vm370_vm13, %v372_v13, %v368_v46  ;;  %v322_v21 = vsub.f32 1.0, %v321_v63 }
 0x167   :  { %v2814_v10 = vclamps-f32 %v414_v22, 1.0  ;;  %v374_v59 = vmul.f32 %v373_v43, %v349_v2 }
 0x168   :  { %v323_v58 = vmul.f32 %v2928_v56, %v322_v21 }
 0x169   :  { %v939_v41 = vadd.f32 1.0, %v2814_v10  ;;  %v2813_v7 = vclamps-f32 %v374_v59, 1.0 }
 0x16a   :  { %v324_v20 = vadd.f32 %v2928_v56, %v323_v58 }
 0x16b   :  { %v955_v49 = vmul.f32 %v939_v41, %v267_v40  ;;  %v938_v25 = vadd.f32 1.0, %v2813_v7  ;;  %v4020_v38 = vpop.permute.xlu2 %1058 }
 0x16c   :  { %v328_v50 = vsel %vm327_vm0, %v2928_v56, %v324_v20  ;;  %v1064_v56 = vpop.permute.xlu1 %1063 }
 0x16d   :  { %1094 = vmatpush.msra.mxu1 %v955_v49  ;;  %2873 = vmatpush.msra.mxu3 %v955_v49  ;;  %v954_v11 = vmul.f32 %v938_v25, %v266_v34  ;;  %v333_v44 = vsel %vm330_vm1, %v332_v6, %v328_v50  ;;  %v4024_v48 = vpop.permute.xlu0 %1053 }
 0x16e   :  { %v334_v26 = vmul.f32 %v333_v44, %v309_v24 }
 0x16f   :  { %1095 = vmatpush.msra.mxu1 %v954_v11  ;;  %2874 = vmatpush.msra.mxu3 %v954_v11 }
 0x170   :  { %v2812_v19 = vclamps-f32 %v334_v26, 1.0 }
 0x172   :  { %v937_v15 = vadd.f32 1.0, %v2812_v19 }
 0x173   :  { %v4022_v35 = vpop.permute.xlu2 %1043 }
 0x174   :  { %v953_v57 = vmul.f32 %v937_v15, %v265_v3  ;;  %v4026_v13 = vpop.permute.xlu1 %1048 }
 0x175   :  { %v4028_v2 = vpop.permute.xlu0 %1038 }
 0x176   :  { %1096 = vmatpush.msra.mxu1 %v953_v57  ;;  %2875 = vmatpush.msra.mxu3 %v953_v57 }
 0x177   :  { %1097 = vmatmul.f32.vlgmr.msra.gmra.mxu1 %v969_v55  ;;  %1133 = vmatmul.f32.vlgmr.msra.gmra.mxu3 %v981_v30 }
 0x17b   :  { %v1029_v22 = vpop.permute.xlu2 %1028 }
 0x17c   :  { %v4032_v43 = vpop.permute.xlu1 %1033 }
 0x17d   :  { %v1024_v51 = vpop.permute.xlu0 %1023 }
 0x17f   :  { %1100 = vmatmul.f32.gmra.mxu1 %v970_v0  ;;  %1136 = vmatmul.f32.gmra.mxu3 %v982_v27 }
 0x183   :  { %v1014_v10 = vpop.permute.xlu2 %1013 }
 0x184   :  { %v1019_v34 = vpop.permute.xlu1 %1018 }
 0x185   :  { %v1009_v3 = vpop.permute.xlu0 %1008 }
 0x187   :  { %1103 = vmatmul.f32.gmra.mxu1 %v971_v28  ;;  %1139 = vmatmul.f32.gmra.mxu3 %v983_v52 }
 0x18f   :  { %1106 = vmatmul.f32.gmra.mxu1 %v972_v60  ;;  %1142 = vmatmul.f32.gmra.mxu3 %v984_v1 }
 0x197   :  { %1109 = vmatmul.f32.gmra.mxu1 %v973_v31 }
 0x19f   :  { %1112 = vmatmul.f32.gmra.mxu1 %v974_v4 }
 0x1a7   :  { %1115 = vmatmul.f32.gmra.mxu1 %v975_v62 }
 0x1af   :  { %1118 = vmatmul.f32.gmra.mxu1 %v976_v42 }
 0x1b7   :  { %1121 = vmatmul.f32.gmra.mxu1 %v977_v14 }
 0x1bf   :  { %1124 = vmatmul.f32.gmra.mxu1 %v978_v16  ;;  %v1004_v16 = vpop.permute.xlu1 %1003 }
 0x1c7   :  { %1127 = vmatmul.f32.gmra.mxu1 %v979_v32 }
 0x1cf   :  { %1130 = vmatmul.f32.gmra.mxu1 %v980_v33 }
 0x1f4   :  { %v4018_v45 = vpop.f32.mrf.mxu1 }
 0x1f5   :  { %v4103_v33 = vadd.f32 %v4018_v45, %v1004_v16 }
 0x1f7   :  { %5675 = vst [vmem:[#allocation6_spill] sm:$0xff] %v4103_v33  ;;  %v4120_v45 = vmul.f32 0.70710677, %v4103_v33 }
 0x1f9   :  { %5676 = vst [vmem:[#allocation15_spill] sm:$0xff] %v4120_v45 }
 0x1fa   :  { %v1134_v23 = vpop.f32.mrf.mxu3 }
 0x1fb   :  { %v4030_v46 = vadd.f32 %v1134_v23, %v1064_v56 }
 0x1fc   :  { %v1101_v8 = vpop.f32.mrf.mxu1 }
 0x1fd   :  { %v4037_v40 = vmul.f32 0.70710677, %v4030_v46  ;;  %v4083_v0 = vadd.f32 %v1101_v8, %v1009_v3 }
 0x1ff   :  { %v1658_v29 = vmul.f32 %v4037_v40, %v4037_v40  ;;  %5672 = vst [vmem:[#allocation21_spill] sm:$0xff] %v4083_v0  ;;  %v4098_v42 = vmul.f32 0.70710677, %v4083_v0 }
 0x201   :  { %v4053_v20 = vmin.f32 %v1658_v29, 16.0  ;;  %5673 = vst [vmem:[#allocation17_spill] sm:$0xff] %v4098_v42  ;;  %v1218_v56 = vmul.f32 %v4098_v42, %v4098_v42 }
 0x202   :  { %v1137_v18 = vpop.f32.mrf.mxu3 }
 0x203   :  { %v4034_v21 = vadd.f32 %v1137_v18, %v1069_v37  ;;  %v1660_v44 = vmul.f32 2.1237322e-06, %v4053_v20 }
 0x204   :  { %v1104_v9 = vpop.f32.mrf.mxu1 }
 0x205   :  { %v4039_v5 = vadd.f32 %v1104_v9, %v1014_v10  ;;  %v4042_v59 = vmul.f32 0.70710677, %v4034_v21  ;;  %v1661_v30 = vadd.f32 0.00028619796, %v1660_v44 }
 0x207   :  { %5669 = vst [vmem:[#allocation22_spill] sm:$0xff] %v4039_v5  ;;  %v4047_v41 = vmul.f32 0.70710677, %v4039_v5  ;;  %v1698_v7 = vmul.f32 %v4042_v59, %v4042_v59  ;;  %v1662_v62 = vmul.f32 %v1661_v30, %v4053_v20 }
 0x209   :  { %v1258_v54 = vmul.f32 %v4047_v41, %v4047_v41  ;;  %v4061_v24 = vmin.f32 %v1698_v7, 16.0  ;;  %v1663_v37 = vadd.f32 0.0036580483, %v1662_v62 }
 0x20a   :  { %v1140_v17 = vpop.f32.mrf.mxu3 }
 0x20b   :  { %v4057_v6 = vadd.f32 %v1140_v17, %v1074_v47  ;;  %v4069_v26 = vmin.f32 %v1258_v54, 16.0  ;;  %v1700_v15 = vmul.f32 2.1237322e-06, %v4061_v24  ;;  %v1664_v29 = vmul.f32 %v1663_v37, %v4053_v20 }
 0x20c   :  { %v1107_v53 = vpop.f32.mrf.mxu1 }
 0x20d   :  { %v4059_v61 = vadd.f32 %v1107_v53, %v1019_v34  ;;  %v4072_v19 = vmul.f32 0.70710677, %v4057_v6  ;;  %v1260_v27 = vmul.f32 2.1237322e-06, %v4069_v26  ;;  %v1701_v60 = vadd.f32 0.00028619796, %v1700_v15 }
 0x20e   :  { %v1178_v34 = vmul.f32 %v4120_v45, %v4120_v45 }
 0x20f   :  { %5670 = vst [vmem:[#allocation20_spill] sm:$0xff] %v4059_v61  ;;  %v4075_v12 = vmul.f32 0.70710677, %v4059_v61  ;;  %v1738_v28 = vmul.f32 %v4072_v19, %v4072_v19  ;;  %v1261_v14 = vadd.f32 0.00028619796, %v1260_v27 }
 0x210   :  { %v1665_v27 = vadd.f32 0.05243302, %v1664_v29 }
 0x211   :  { %v1298_v52 = vmul.f32 %v4075_v12, %v4075_v12  ;;  %v4105_v47 = vmin.f32 %v1738_v28, 16.0  ;;  %v1262_v53 = vmul.f32 %v1261_v14, %v4069_v26  ;;  %v4142_v14 = vmin.f32 %v1178_v34, 16.0 }
 0x212   :  { %v1143_v58 = vpop.f32.mrf.mxu3 }
 0x213   :  { %v4051_v49 = vadd.f32 %v1143_v58, %v1079_v36  ;;  %v4107_v8 = vmin.f32 %v1298_v52, 16.0  ;;  %v1702_v36 = vmul.f32 %v1701_v60, %v4061_v24  ;;  %v4126_v58 = vmin.f32 %v1218_v56, 16.0  ;;  %5677 = vst [vmem:[#allocation8_spill] sm:$0xff] %v4142_v14 }
 0x214   :  { %v1110_v63 = vpop.f32.mrf.mxu1 }
 0x215   :  { %v4064_v50 = vmul.f32 0.70710677, %v4051_v49  ;;  %v4066_v11 = vadd.f32 %v1110_v63, %v1024_v51  ;;  %v1300_v63 = vmul.f32 2.1237322e-06, %v4107_v8  ;;  %v1703_v17 = vadd.f32 0.0036580483, %v1702_v36 }
 0x216   :  { %v1263_v51 = vadd.f32 0.0036580483, %v1262_v53  ;;  %v1220_v28 = vmul.f32 2.1237322e-06, %v4126_v58 }
 0x217   :  { %5671 = vst [vmem:[#allocation19_spill] sm:$0xff] %v4066_v11  ;;  %v1778_v57 = vmul.f32 %v4064_v50, %v4064_v50  ;;  %v4081_v55 = vmul.f32 0.70710677, %v4066_v11  ;;  %v1301_v3 = vadd.f32 0.00028619796, %v1300_v63  ;;  %v1704_v15 = vmul.f32 %v1703_v17, %v4061_v24 }
 0x218   :  { %v1264_v52 = vmul.f32 %v1263_v51, %v4069_v26  ;;  %v1221_v63 = vadd.f32 0.00028619796, %v1220_v28 }
 0x219   :  { %v4090_v1 = vmin.f32 %v1778_v57, 16.0  ;;  %v1338_v31 = vmul.f32 %v4081_v55, %v4081_v55  ;;  %v1302_v36 = vmul.f32 %v1301_v3, %v4107_v8 }
 0x21b   :  { %v1780_v9 = vmul.f32 2.1237322e-06, %v4090_v1  ;;  %v4111_v23 = vmin.f32 %v1338_v31, 16.0  ;;  %v1791_v62 = vmul.f32 3.8918573e-05, %v4090_v1 }
 0x21c   :  { %v1113_v39 = vpop.f32.mrf.mxu1  ;;  %v1303_v51 = vadd.f32 0.0036580483, %v1302_v36 }
 0x21d   :  { %v4100_v32 = vadd.f32 %v1113_v39, %v1029_v22  ;;  %v1740_v22 = vmul.f32 2.1237322e-06, %v4105_v47  ;;  %v1781_v10 = vadd.f32 0.00028619796, %v1780_v9  ;;  %v1340_v39 = vmul.f32 2.1237322e-06, %v4111_v23 }
 0x21e   :  { %v1705_v9 = vadd.f32 0.05243302, %v1704_v15  ;;  %v1792_v53 = vadd.f32 0.001143296, %v1791_v62 }
 0x21f   :  { %5674 = vst [vmem:[#allocation16_spill] sm:$0xff] %v4100_v32  ;;  %v4117_v18 = vmul.f32 0.70710677, %v4100_v32  ;;  %v1741_v44 = vadd.f32 0.00028619796, %v1740_v22  ;;  %v1782_v57 = vmul.f32 %v1781_v10, %v4090_v1  ;;  %v1666_v22 = vmul.f32 %v1665_v27, %v4053_v20 }
 0x220   :  { %v1341_v30 = vadd.f32 0.00028619796, %v1340_v39  ;;  %v1793_v10 = vmul.f32 %v1792_v53, %v4090_v1  ;;  %v1180_v39 = vmul.f32 2.1237322e-06, %v4142_v14  ;;  %v1304_v53 = vmul.f32 %v1303_v51, %v4107_v8 }
 0x221   :  { %v1378_v7 = vmul.f32 %v4117_v18, %v4117_v18  ;;  %v1742_v16 = vmul.f32 %v1741_v44, %v4105_v47  ;;  %v1783_v37 = vadd.f32 0.0036580483, %v1782_v57  ;;  %v1667_v57 = vadd.f32 0.18741608, %v1666_v22 }
 0x222   :  { %v1342_v56 = vmul.f32 %v1341_v30, %v4111_v23  ;;  %v1794_v15 = vadd.f32 0.014752088, %v1793_v10  ;;  %v1222_v30 = vmul.f32 %v1221_v63, %v4126_v58 }
 0x223   :  { %v4139_v31 = vmin.f32 %v1378_v7, 16.0  ;;  %v1743_v29 = vadd.f32 0.0036580483, %v1742_v16  ;;  %v1706_v7 = vmul.f32 %v1705_v9, %v4061_v24  ;;  %v1784_v34 = vmul.f32 %v1783_v37, %v4090_v1 }
 0x224   :  { %v1116_v25 = vpop.f32.mrf.mxu1  ;;  %v1343_v44 = vadd.f32 0.0036580483, %v1342_v56  ;;  %v1795_v36 = vmul.f32 %v1794_v15, %v4090_v1  ;;  %v1181_v9 = vadd.f32 0.00028619796, %v1180_v39  ;;  %v4169_v37 = vmul.f32 0.5, %v4034_v21 }
 0x225   :  { %v4137_v60 = vadd.f32 %v1116_v25, %v4032_v43  ;;  %v1265_v43 = vadd.f32 0.05243302, %v1264_v52  ;;  %v1380_v17 = vmul.f32 2.1237322e-06, %v4139_v31  ;;  %v4161_v52 = vmul.f32 0.5, %v4030_v46 }
 0x226   :  { %v1744_v56 = vmul.f32 %v1743_v29, %v4105_v47  ;;  %v1707_v22 = vadd.f32 0.18741608, %v1706_v7  ;;  %v1785_v63 = vadd.f32 0.05243302, %v1784_v34  ;;  %v1344_v46 = vmul.f32 %v1343_v44, %v4111_v23 }
 0x227   :  { %v4149_v25 = vmul.f32 0.70710677, %v4137_v60  ;;  %v1266_v27 = vmul.f32 %v1265_v43, %v4069_v26  ;;  %v1381_v62 = vadd.f32 0.00028619796, %v1380_v17  ;;  %v1796_v43 = vadd.f32 0.112945676, %v1795_v36 }
 0x228   :  { %v1668_v17 = vmul.f32 %v1667_v57, %v4053_v20  ;;  %v1223_v10 = vadd.f32 0.0036580483, %v1222_v30  ;;  %v4186_v7 = vmul.f32 %v1181_v9, %v4142_v14  ;;  %v1745_v34 = vadd.f32 0.05243302, %v1744_v56 }
 0x229   :  { %v1418_v28 = vmul.f32 %v4149_v25, %v4149_v25  ;;  %v1382_v39 = vmul.f32 %v1381_v62, %v4139_v31  ;;  %v1797_v51 = vmul.f32 %v1796_v43, %v4090_v1  ;;  %v1305_v44 = vadd.f32 0.05243302, %v1304_v53 }
 0x22a   :  { %5680 = vst [vmem:[#allocation5_spill] sm:$0xff] %v4186_v7  ;;  %v1751_v15 = vmul.f32 3.8918573e-05, %v4105_v47  ;;  %v1708_v57 = vmul.f32 %v1707_v22, %v4061_v24  ;;  %v1786_v30 = vmul.f32 %v1785_v63, %v4090_v1  ;;  %v1669_v62 = vadd.f32 1.1283791, %v1668_v17 }
 0x22b   :  { %v1383_v43 = vadd.f32 0.0036580483, %v1382_v39  ;;  %v1746_v63 = vmul.f32 %v1745_v34, %v4105_v47  ;;  %v4209_v45 = vmul.f32 %v1223_v10, %v4126_v58 }
 0x22c   :  { %v4094_v4 = vpop.f32.mrf.mxu1  ;;  %v1787_v39 = vadd.f32 0.18741608, %v1786_v30 }
 0x22d   :  { %v4165_v16 = vadd.f32 %v4094_v4, %v4028_v2  ;;  %v1267_v2 = vadd.f32 0.18741608, %v1266_v27  ;;  %v4175_v4 = vmin.f32 %v1418_v28, 16.0  ;;  %v1345_v27 = vadd.f32 0.05243302, %v1344_v46  ;;  %5681 = vst [vmem:[#allocation11_spill] sm:$0xff] %v4209_v45 }
 0x22e   :  { %v1798_v28 = vadd.f32 0.4994258, %v1797_v51  ;;  %v1306_v46 = vmul.f32 %v1305_v44, %v4107_v8  ;;  %v1709_v51 = vadd.f32 1.1283791, %v1708_v57  ;;  %v1384_v34 = vmul.f32 %v1383_v43, %v4139_v31 }
 0x22f   :  { %5678 = vst [vmem:[#allocation18_spill] sm:$0xff] %v4165_v16  ;;  %v4179_v21 = vmul.f32 0.70710677, %v4165_v16  ;;  %v1268_v36 = vmul.f32 %v1267_v2, %v4069_v26  ;;  %v4229_v43 = vmul.f32 %v1669_v62, %v4037_v40 }
 0x230   :  { %v1799_v22 = vmul.f32 %v1798_v28, %v4090_v1  ;;  %v1307_v57 = vadd.f32 0.18741608, %v1306_v46 }
 0x231   :  { %v1458_v9 = vmul.f32 %v4179_v21, %v4179_v21  ;;  %v1269_v0 = vadd.f32 1.1283791, %v1268_v36  ;;  %v4225_v36 = vmul.f32 0.5, %v4051_v49 }
 0x232   :  { %v4206_v33 = vadd.f32 1.0, %v1799_v22 }
 0x233   :  { %v4212_v44 = vmin.f32 %v1458_v9, 16.0  ;;  %v4232_v9 = vmul.f32 %v1709_v51, %v4042_v59 }
 0x234   :  { %v1122_v54 = vpop.f32.mrf.mxu1  ;;  %2929 = vrcp.f32 %v4206_v33  ;;  %vm1806_vm3 = vweird.f32 %v4206_v33 }
 0x235   :  { %v4182_v29 = vadd.f32 %v1122_v54, %v4022_v35  ;;  %v1420_v35 = vmul.f32 2.1237322e-06, %v4175_v4  ;;  %v1752_v54 = vadd.f32 0.001143296, %v1751_v15  ;;  %v1346_v15 = vmul.f32 %v1345_v27, %v4111_v23 }
 0x236   :  { %v4222_v27 = vmul.f32 0.5, %v4057_v6  ;;  %v1385_v6 = vadd.f32 0.05243302, %v1384_v34  ;;  %v1460_v46 = vmul.f32 2.1237322e-06, %v4212_v44 }
 0x237   :  { %5679 = vst [vmem:[#allocation14_spill] sm:$0xff] %v4182_v29  ;;  %v4196_v56 = vmul.f32 0.70710677, %v4182_v29  ;;  %v1753_v2 = vmul.f32 %v1752_v54, %v4105_v47  ;;  %v1421_v28 = vadd.f32 0.00028619796, %v1420_v35  ;;  %v1788_v35 = vmul.f32 %v1787_v39, %v4090_v1 }
 0x238   :  { %v1347_v54 = vadd.f32 0.18741608, %v1346_v15  ;;  %v1711_v15 = vmul.f32 3.8918573e-05, %v4061_v24 }
 0x239   :  { %v1754_v42 = vadd.f32 0.014752088, %v1753_v2  ;;  %v1422_v22 = vmul.f32 %v1421_v28, %v4175_v4  ;;  %v1308_v2 = vmul.f32 %v1307_v57, %v4107_v8  ;;  %v1789_v51 = vadd.f32 1.1283791, %v1788_v35 }
 0x23a   :  { %v2930_v62 = vpop.eup %2929  ;;  %v1348_v39 = vmul.f32 %v1347_v54, %v4111_v23  ;;  %v1386_v57 = vmul.f32 %v1385_v6, %v4139_v31 }
 0x23b   :  { %v1755_v10 = vmul.f32 %v1754_v42, %v4105_v47  ;;  %v4236_v42 = vmul.f32 %v1269_v0, %v4047_v41  ;;  %v1423_v28 = vadd.f32 0.0036580483, %v1422_v22  ;;  %v1802_v34 = vmul.f32 %v2930_v62, %v4206_v33 }
 0x23c   :  { %v1125_v3 = vpop.f32.mrf.mxu1  ;;  %vm1807_vm2 = vweird.f32 %v2930_v62 }
 0x23d   :  { %v4202_v17 = vadd.f32 %v1125_v3, %v4026_v13  ;;  %v1498_v13 = vmul.f32 %v4196_v56, %v4196_v56  ;;  %v1747_v3 = vadd.f32 0.18741608, %v1746_v63  ;;  %v1756_v63 = vadd.f32 0.112945676, %v1755_v10  ;;  %5682 = vst [vmem:[#allocation9_spill] sm:$0xff] %v4236_v42  ;;  %vm1808_vm4 = vmor %vm1806_vm3, %vm1807_vm2 }
 0x23e   :  { %v1461_v10 = vadd.f32 0.00028619796, %v1460_v46 }
 0x23f   :  { %v4218_v30 = vmul.f32 0.70710677, %v4202_v17  ;;  %v4239_v49 = vmin.f32 %v1498_v13, 16.0  ;;  %v1748_v1 = vmul.f32 %v1747_v3, %v4105_v47  ;;  %v1757_v59 = vmul.f32 %v1756_v63, %v4105_v47 }
 0x240   :  { %v1712_v63 = vadd.f32 0.001143296, %v1711_v15  ;;  %v1462_v15 = vmul.f32 %v1461_v10, %v4212_v44  ;;  %v1790_v10 = vmul.f32 %v1789_v51, %v4064_v50  ;;  %v1349_v51 = vadd.f32 1.1283791, %v1348_v39 }
 0x241   :  { %v1538_v40 = vmul.f32 %v4218_v30, %v4218_v30  ;;  %v1758_v13 = vadd.f32 0.4994258, %v1757_v59  ;;  %v1500_v35 = vmul.f32 2.1237322e-06, %v4239_v49  ;;  %v1812_v59 = vand.u32 2147483648, %v4206_v33 }
 0x242   :  { %v1713_v6 = vmul.f32 %v1712_v63, %v4061_v24  ;;  %v1749_v32 = vadd.f32 1.1283791, %v1748_v1  ;;  %v1463_v45 = vadd.f32 0.0036580483, %v1462_v15 }
 0x243   :  { %v4257_v54 = vmin.f32 %v1538_v40, 16.0 }
 0x244   :  { %v1128_v53 = vpop.f32.mrf.mxu1 }
 0x245   :  { %v4248_v41 = vadd.f32 %v1128_v53, %v4024_v48  ;;  %v1803_v48 = vsub.f32 1.0, %v1802_v34  ;;  %v1759_v53 = vmul.f32 %v1758_v13, %v4105_v47  ;;  %v1424_v47 = vmul.f32 %v1423_v28, %v4175_v4 }
 0x246   :  { %v1501_v34 = vadd.f32 0.00028619796, %v1500_v35  ;;  %v1714_v13 = vadd.f32 0.014752088, %v1713_v6  ;;  %v1540_v61 = vmul.f32 2.1237322e-06, %v4257_v54 }
 0x247   :  { %v4264_v22 = vmul.f32 0.70710677, %v4248_v41  ;;  %v1804_v46 = vmul.f32 %v2930_v62, %v1803_v48  ;;  %v1813_v48 = vor.u32 1.1754944e-38, %v1812_v59  ;;  %v1387_v35 = vadd.f32 0.18741608, %v1386_v57 }
 0x248   :  { %v1715_v28 = vmul.f32 %v1714_v13, %v4061_v24  ;;  %v1425_v7 = vadd.f32 0.05243302, %v1424_v47  ;;  %v1502_v14 = vmul.f32 %v1501_v34, %v4239_v49  ;;  %v1309_v59 = vadd.f32 1.1283791, %v1308_v2 }
 0x249   :  { %v1805_v11 = vadd.f32 %v2930_v62, %v1804_v46  ;;  %v1578_v63 = vmul.f32 %v4264_v22, %v4264_v22  ;;  %v1671_v57 = vmul.f32 3.8918573e-05, %v4053_v20  ;;  %v1464_v2 = vmul.f32 %v1463_v45, %v4212_v44 }
 0x24a   :  { %v1716_v42 = vadd.f32 0.112945676, %v1715_v28 }
 0x24b   :  { %v1809_v6 = vsel %vm1808_vm4, %v2930_v62, %v1805_v11  ;;  %v4286_v16 = vmin.f32 %v1578_v63, 16.0  ;;  %v1388_v11 = vmul.f32 %v1387_v35, %v4139_v31  ;;  %v1672_v63 = vadd.f32 0.001143296, %v1671_v57 }
 0x24c   :  { %v1131_v0 = vpop.f32.mrf.mxu1  ;;  %v1717_v13 = vmul.f32 %v1716_v42, %v4061_v24 }
 0x24d   :  { %v4253_v3 = vadd.f32 %v1131_v0, %v4020_v38  ;;  %v1810_v38 = vand.u32 2147483647, %v4206_v33  ;;  %v4269_v0 = vadd.f32 1.0, %v1759_v53  ;;  %v1580_v39 = vmul.f32 2.1237322e-06, %v4286_v16 }
 0x24e   :  { %v1718_v15 = vadd.f32 0.4994258, %v1717_v13  ;;  %v1673_v35 = vmul.f32 %v1672_v63, %v4053_v20 }
 0x24f   :  { %v4261_v5 = vmul.f32 0.70710677, %v4253_v3  ;;  %2931 = vrcp.f32 %v4269_v0  ;;  %vm1811_vm5 = vcmp.eq.f32.partialorder %v1810_v38, 8.507059e+37  ;;  %v1426_v38 = vmul.f32 %v1425_v7, %v4175_v4 }
 0x250   :  { %v1814_v46 = vsel %vm1811_vm5, %v1813_v48, %v1809_v6  ;;  %v1770_v7 = vand.u32 2147483647, %v4269_v0  ;;  %vm1766_vm8 = vweird.f32 %v4269_v0  ;;  %v1581_v57 = vadd.f32 0.00028619796, %v1580_v39 }
 0x251   :  { %v1618_v40 = vmul.f32 %v4261_v5, %v4261_v5  ;;  %v1815_v29 = vmul.f32 %v1814_v46, %v1790_v10  ;;  %v1772_v10 = vand.u32 2147483648, %v4269_v0  ;;  %v1750_v46 = vmul.f32 %v1749_v32, %v4072_v19 }
 0x252   :  { %v1389_v19 = vadd.f32 1.1283791, %v1388_v11  ;;  %vm1771_vm9 = vcmp.eq.f32.partialorder %v1770_v7, 8.507059e+37  ;;  %v1582_v11 = vmul.f32 %v1581_v57, %v4286_v16 }
 0x253   :  { %v4280_v53 = vmin.f32 %v1618_v40, 16.0  ;;  %v1541_v40 = vadd.f32 0.00028619796, %v1540_v61  ;;  %v2843_v62 = vclamps-f32 %v1815_v29, 1.0  ;;  %v1503_v61 = vadd.f32 0.0036580483, %v1502_v14 }
 0x254   :  { %v1719_v29 = vmul.f32 %v1718_v15, %v4061_v24  ;;  %v1674_v24 = vadd.f32 0.014752088, %v1673_v35  ;;  %v4311_v15 = vmul.f32 0.5, %v4137_v60  ;;  %v4330_v35 = vmul.f32 0.5, %v4202_v17 }
 0x255   :  { %v1620_v33 = vmul.f32 2.1237322e-06, %v4280_v53  ;;  %v2932_v50 = vpop.eup %2931  ;;  %v1833_v34 = vadd.f32 1.0, %v2843_v62  ;;  %v1542_v42 = vmul.f32 %v1541_v40, %v4257_v54  ;;  %v1465_v40 = vadd.f32 0.05243302, %v1464_v2 }
 0x256   :  { %v1762_v1 = vmul.f32 %v2932_v50, %v4269_v0  ;;  %vm1767_vm6 = vweird.f32 %v2932_v50  ;;  %v4302_v14 = vadd.f32 1.0, %v1719_v29 }
 0x257   :  { %v1621_v47 = vadd.f32 0.00028619796, %v1620_v33  ;;  %v1849_v28 = vmul.f32 %v1833_v34, %v4225_v36  ;;  %v1427_v33 = vadd.f32 0.18741608, %v1426_v38  ;;  %v1504_v36 = vmul.f32 %v1503_v61, %v4239_v49  ;;  %vm1768_vm7 = vmor %vm1766_vm8, %vm1767_vm6 }
 0x258   :  { %v1763_v48 = vsub.f32 1.0, %v1762_v1  ;;  %2933 = vrcp.f32 %v4302_v14  ;;  %v1543_v62 = vadd.f32 0.0036580483, %v1542_v42  ;;  %v1773_v1 = vor.u32 1.1754944e-38, %v1772_v10 }
 0x259   :  { %v1622_v45 = vmul.f32 %v1621_v47, %v4280_v53  ;;  %1962 = vmatpush.msra.mxu2 %v1849_v28  ;;  %2876 = vmatpush.msrb.mxu3 %v1849_v28  ;;  %v1675_v47 = vmul.f32 %v1674_v24, %v4053_v20  ;;  %v1428_v2 = vmul.f32 %v1427_v33, %v4175_v4  ;;  %v1505_v42 = vadd.f32 0.05243302, %v1504_v36 }
 0x25a   :  { %v1764_v6 = vmul.f32 %v2932_v50, %v1763_v48  ;;  %v4315_v34 = vmul.f32 %v1309_v59, %v4075_v12  ;;  %v1466_v63 = vmul.f32 %v1465_v40, %v4212_v44  ;;  %v4319_v48 = vmul.f32 %v1349_v51, %v4081_v55 }
 0x25b   :  { %v1623_v38 = vadd.f32 0.0036580483, %v1622_v45  ;;  %v1676_v0 = vadd.f32 0.112945676, %v1675_v47  ;;  %v4325_v28 = vmul.f32 %v1389_v19, %v4117_v18  ;;  %v1631_v59 = vmul.f32 3.8918573e-05, %v4280_v53 }
 0x25c   :  { %v1765_v13 = vadd.f32 %v2932_v50, %v1764_v6  ;;  %v1429_v10 = vadd.f32 1.1283791, %v1428_v2  ;;  %v1467_v6 = vadd.f32 0.18741608, %v1466_v63  ;;  %v1506_v45 = vmul.f32 %v1505_v42, %v4239_v49 }
 0x25d   :  { %v1677_v60 = vmul.f32 %v1676_v0, %v4053_v20  ;;  %v1624_v12 = vmul.f32 %v1623_v38, %v4280_v53  ;;  %v1632_v33 = vadd.f32 0.001143296, %v1631_v59  ;;  %v1583_v18 = vadd.f32 0.0036580483, %v1582_v11 }
 0x25e   :  { %v1769_v32 = vsel %vm1768_vm7, %v2932_v50, %v1765_v13  ;;  %v1544_v50 = vmul.f32 %v1543_v62, %v4257_v54  ;;  %v2934_v29 = vpop.eup %2933  ;;  %v1732_v57 = vand.u32 2147483648, %v4302_v14  ;;  %v1730_v47 = vand.u32 2147483647, %v4302_v14 }
 0x25f   :  { %v1774_v61 = vsel %vm1771_vm9, %v1773_v1, %v1769_v32  ;;  %v1722_v55 = vmul.f32 %v2934_v29, %v4302_v14  ;;  %v1678_v51 = vadd.f32 0.4994258, %v1677_v60  ;;  %v1625_v62 = vadd.f32 0.05243302, %v1624_v12 }
 0x260   :  { %v1775_v39 = vmul.f32 %v1774_v61, %v1750_v46  ;;  %v1545_v40 = vadd.f32 0.05243302, %v1544_v50  ;;  %v1633_v17 = vmul.f32 %v1632_v33, %v4280_v53  ;;  %vm1727_vm10 = vweird.f32 %v2934_v29 }
 0x261   :  { %v1723_v24 = vsub.f32 1.0, %v1722_v55  ;;  %v1679_v36 = vmul.f32 %v1678_v51, %v4053_v20  ;;  %v1468_v32 = vmul.f32 %v1467_v6, %v4212_v44  ;;  %v1507_v38 = vadd.f32 0.18741608, %v1506_v45 }
 0x262   :  { %v2842_v7 = vclamps-f32 %v1775_v39, 1.0  ;;  %v1634_v2 = vadd.f32 0.014752088, %v1633_v17  ;;  %v1271_v20 = vmul.f32 3.8918573e-05, %v4069_v26  ;;  %vm1726_vm11 = vweird.f32 %v4302_v14 }
 0x263   :  { %v1724_v1 = vmul.f32 %v2934_v29, %v1723_v24  ;;  %v4339_v19 = vadd.f32 1.0, %v1679_v36  ;;  %v1584_v0 = vmul.f32 %v1583_v18, %v4286_v16  ;;  %vm1728_vm12 = vmor %vm1726_vm11, %vm1727_vm10  ;;  %v1733_v63 = vor.u32 1.1754944e-38, %v1732_v57 }
 0x264   :  { %v1832_v46 = vadd.f32 1.0, %v2842_v7  ;;  %v1635_v42 = vmul.f32 %v1634_v2, %v4280_v53  ;;  %v1311_v39 = vmul.f32 3.8918573e-05, %v4107_v8  ;;  %v1626_v50 = vmul.f32 %v1625_v62, %v4280_v53 }
 0x265   :  { %v1725_v61 = vadd.f32 %v2934_v29, %v1724_v1  ;;  %2935 = vrcp.f32 %v4339_v19  ;;  %vm1731_vm13 = vcmp.eq.f32.partialorder %v1730_v47, 8.507059e+37  ;;  %v1272_v60 = vadd.f32 0.001143296, %v1271_v20 }
 0x266   :  { %v1848_v13 = vmul.f32 %v1832_v46, %v4222_v27  ;;  %v1546_v27 = vmul.f32 %v1545_v40, %v4257_v54  ;;  %v4351_v7 = vmul.f32 %v1429_v10, %v4149_v25  ;;  %v1636_v14 = vadd.f32 0.112945676, %v1635_v42 }
 0x267   :  { %v1729_v11 = vsel %vm1728_vm12, %v2934_v29, %v1725_v61  ;;  %v1312_v59 = vadd.f32 0.001143296, %v1311_v39  ;;  %v1469_v55 = vadd.f32 1.1283791, %v1468_v32  ;;  %v4354_v6 = vmul.f32 0.5, %v4248_v41 }
 0x268   :  { %1963 = vmatpush.msra.mxu2 %v1848_v13  ;;  %2877 = vmatpush.msrb.mxu3 %v1848_v13  ;;  %v1734_v12 = vsel %vm1731_vm13, %v1733_v63, %v1729_v11  ;;  %v1547_v51 = vadd.f32 0.18741608, %v1546_v27  ;;  %v1508_v46 = vmul.f32 %v1507_v38, %v4239_v49  ;;  %v1585_v33 = vadd.f32 0.05243302, %v1584_v0 }
 0x269   :  { %v1735_v45 = vmul.f32 %v1734_v12, %v4232_v9  ;;  %v1637_v29 = vmul.f32 %v1636_v14, %v4280_v53  ;;  %v1313_v40 = vmul.f32 %v1312_v59, %v4107_v8  ;;  %v1627_v25 = vadd.f32 0.18741608, %v1626_v50 }
 0x26a   :  { %v1591_v24 = vmul.f32 3.8918573e-05, %v4286_v16  ;;  %v1273_v36 = vmul.f32 %v1272_v60, %v4069_v26  ;;  %v1690_v41 = vand.u32 2147483647, %v4339_v19  ;;  %v1548_v57 = vmul.f32 %v1547_v51, %v4257_v54 }
 0x26b   :  { %v2936_v18 = vpop.eup %2935  ;;  %v2841_v10 = vclamps-f32 %v1735_v45, 1.0  ;;  %v1638_v62 = vadd.f32 0.4994258, %v1637_v29  ;;  %v1314_v9 = vadd.f32 0.014752088, %v1313_v40  ;;  %v1692_v38 = vand.u32 2147483648, %v4339_v19 }
 0x26c   :  { %v1682_v13 = vmul.f32 %v2936_v18, %v4339_v19  ;;  %v1592_v1 = vadd.f32 0.001143296, %v1591_v24  ;;  %v1351_v47 = vmul.f32 3.8918573e-05, %v4111_v23  ;;  %v1274_v63 = vadd.f32 0.014752088, %v1273_v36 }
 0x26d   :  { %v1831_v17 = vadd.f32 1.0, %v2841_v10  ;;  %v1639_v2 = vmul.f32 %v1638_v62, %v4280_v53  ;;  %v1315_v20 = vmul.f32 %v1314_v9, %v4107_v8  ;;  %vm1687_vm14 = vweird.f32 %v2936_v18 }
 0x26e   :  { %v1683_v32 = vsub.f32 1.0, %v1682_v13  ;;  %v1593_v61 = vmul.f32 %v1592_v1, %v4286_v16  ;;  %v1352_v0 = vadd.f32 0.001143296, %v1351_v47  ;;  %v1586_v11 = vmul.f32 %v1585_v33, %v4286_v16 }
 0x26f   :  { %v1847_v27 = vmul.f32 %v1831_v17, %v4169_v37  ;;  %v4371_v39 = vadd.f32 1.0, %v1639_v2  ;;  %v1316_v50 = vadd.f32 0.112945676, %v1315_v20  ;;  %v1628_v60 = vmul.f32 %v1627_v25, %v4280_v53 }
 0x270   :  { %v1684_v42 = vmul.f32 %v2936_v18, %v1683_v32  ;;  %v1594_v12 = vadd.f32 0.014752088, %v1593_v61  ;;  %v1353_v14 = vmul.f32 %v1352_v0, %v4111_v23  ;;  %vm1686_vm15 = vweird.f32 %v4339_v19 }
 0x271   :  { %1964 = vmatpush.msra.mxu2 %v1847_v27  ;;  %2878 = vmatpush.msrb.mxu3 %v1847_v27  ;;  %v1693_v37 = vor.u32 1.1754944e-38, %v1692_v38  ;;  %2937 = vrcp.f32 %v4371_v39  ;;  %vm1688_vm0 = vmor %vm1686_vm15, %vm1687_vm14  ;;  %v1317_v29 = vmul.f32 %v1316_v50, %v4107_v8  ;;  %v1275_v33 = vmul.f32 %v1274_v63, %v4069_v26 }
 0x272   :  { %v1685_v59 = vadd.f32 %v2936_v18, %v1684_v42  ;;  %v1595_v51 = vmul.f32 %v1594_v12, %v4286_v16  ;;  %v1354_v45 = vadd.f32 0.014752088, %v1353_v14  ;;  %v4382_v53 = vmul.f32 %v1469_v55, %v4179_v21 }
 0x273   :  { %v1509_v40 = vadd.f32 1.1283791, %v1508_v46  ;;  %vm1691_vm1 = vcmp.eq.f32.partialorder %v1690_v41, 8.507059e+37  ;;  %v4384_v10 = vadd.f32 1.1283791, %v1548_v57  ;;  %v1652_v61 = vand.u32 2147483648, %v4371_v39 }
 0x274   :  { %v1689_v25 = vsel %vm1688_vm0, %v2936_v18, %v1685_v59  ;;  %v1596_v24 = vadd.f32 0.112945676, %v1595_v51  ;;  %v1391_v36 = vmul.f32 3.8918573e-05, %v4139_v31  ;;  %v1587_v13 = vadd.f32 0.18741608, %v1586_v11 }
 0x275   :  { %v1694_v19 = vsel %vm1691_vm1, %v1693_v37, %v1689_v25  ;;  %v1629_v62 = vadd.f32 1.1283791, %v1628_v60  ;;  %v1355_v17 = vmul.f32 %v1354_v45, %v4111_v23  ;;  %v1318_v21 = vadd.f32 0.4994258, %v1317_v29 }
 0x276   :  { %v1695_v9 = vmul.f32 %v1694_v19, %v4229_v43  ;;  %v1597_v1 = vmul.f32 %v1596_v24, %v4286_v16  ;;  %v1392_v47 = vadd.f32 0.001143296, %v1391_v36  ;;  %v1276_v55 = vadd.f32 0.112945676, %v1275_v33 }
 0x277   :  { %v2938_v46 = vpop.eup %2937  ;;  %v4391_v18 = vmul.f32 %v1509_v40, %v4196_v56  ;;  %v1551_v57 = vmul.f32 3.8918573e-05, %v4257_v54  ;;  %v1356_v32 = vadd.f32 0.112945676, %v1355_v17  ;;  %v1650_v2 = vand.u32 2147483647, %v4371_v39 }
 0x278   :  { %v2840_v41 = vclamps-f32 %v1695_v9, 1.0  ;;  %v1642_v38 = vmul.f32 %v2938_v46, %v4371_v39  ;;  %v1598_v43 = vadd.f32 0.4994258, %v1597_v1  ;;  %v1393_v20 = vmul.f32 %v1392_v47, %v4139_v31 }
 0x279   :  { %v1552_v0 = vadd.f32 0.001143296, %v1551_v57  ;;  %v1357_v63 = vmul.f32 %v1356_v32, %v4111_v23  ;;  %v1319_v11 = vmul.f32 %v1318_v21, %v4107_v8  ;;  %vm1647_vm2 = vweird.f32 %v2938_v46 }
 0x27a   :  { %v1830_v27 = vadd.f32 1.0, %v2840_v41  ;;  %v1643_v42 = vsub.f32 1.0, %v1642_v38  ;;  %v1599_v56 = vmul.f32 %v1598_v43, %v4286_v16  ;;  %v1394_v50 = vadd.f32 0.014752088, %v1393_v20 }
 0x27b   :  { %v1553_v12 = vmul.f32 %v1552_v0, %v4257_v54  ;;  %v1358_v14 = vadd.f32 0.4994258, %v1357_v63  ;;  %v1431_v51 = vmul.f32 3.8918573e-05, %v4175_v4  ;;  %v1588_v29 = vmul.f32 %v1587_v13, %v4286_v16 }
 0x27c   :  { %v1846_v60 = vmul.f32 %v1830_v27, %v4161_v52  ;;  %v1644_v59 = vmul.f32 %v2938_v46, %v1643_v42  ;;  %v4403_v37 = vadd.f32 1.0, %v1599_v56  ;;  %v1395_v45 = vmul.f32 %v1394_v50, %v4139_v31 }
 0x27d   :  { %v1157_v33 = vmul.f32 0.5, %v4253_v3  ;;  %v1554_v8 = vadd.f32 0.014752088, %v1553_v12  ;;  %v1277_v52 = vmul.f32 %v1276_v55, %v4069_v26  ;;  %vm1646_vm3 = vweird.f32 %v4371_v39 }
 0x27e   :  { %1965 = vmatpush.msra.mxu2 %v1846_v60  ;;  %2879 = vmatpush.msrb.mxu3 %v1846_v60  ;;  %v1645_v40 = vadd.f32 %v2938_v46, %v1644_v59  ;;  %2939 = vrcp.f32 %v4403_v37  ;;  %v1359_v25 = vmul.f32 %v1358_v14, %v4111_v23  ;;  %vm1648_vm4 = vmor %vm1646_vm3, %vm1647_vm2  ;;  %v1653_v19 = vor.u32 1.1754944e-38, %v1652_v61 }
 0x27f   :  { %v1555_v24 = vmul.f32 %v1554_v8, %v4257_v54  ;;  %v1432_v16 = vadd.f32 0.001143296, %v1431_v51  ;;  %v1396_v36 = vadd.f32 0.112945676, %v1395_v45  ;;  %v1630_v3 = vmul.f32 %v1629_v62, %v4261_v5 }
 0x280   :  { %v1649_v13 = vsel %vm1648_vm4, %v2938_v46, %v1645_v40  ;;  %vm1651_vm5 = vcmp.eq.f32.partialorder %v1650_v2, 8.507059e+37  ;;  %v4416_v9 = vadd.f32 1.0, %v1319_v11  ;;  %v1589_v17 = vadd.f32 1.1283791, %v1588_v29 }
 0x281   :  { %v1654_v1 = vsel %vm1651_vm5, %v1653_v19, %v1649_v13  ;;  %v1556_v39 = vadd.f32 0.112945676, %v1555_v24  ;;  %v1433_v47 = vmul.f32 %v1432_v16, %v4175_v4  ;;  %v4419_v23 = vadd.f32 1.0, %v1359_v25 }
 0x282   :  { %v1655_v21 = vmul.f32 %v1654_v1, %v1630_v3  ;;  %v1278_v55 = vadd.f32 0.4994258, %v1277_v52  ;;  %v1231_v41 = vmul.f32 3.8918573e-05, %v4126_v58  ;;  %v1610_v57 = vand.u32 2147483647, %v4403_v37 }
 0x283   :  { %v1557_v32 = vmul.f32 %v1556_v39, %v4257_v54  ;;  %v1434_v5 = vadd.f32 0.014752088, %v1433_v47  ;;  %v1397_v62 = vmul.f32 %v1396_v36, %v4139_v31  ;;  %v1511_v2 = vmul.f32 3.8918573e-05, %v4239_v49 }
 0x284   :  { %v2940_v46 = vpop.eup %2939  ;;  %v2839_v38 = vclamps-f32 %v1655_v21, 1.0  ;;  %v1471_v43 = vmul.f32 3.8918573e-05, %v4212_v44  ;;  %2941 = vrcp.f32 %v4416_v9  ;;  %v1612_v27 = vand.u32 2147483648, %v4403_v37 }
 0x285   :  { %v1602_v20 = vmul.f32 %v2940_v46, %v4403_v37  ;;  %v1558_v61 = vadd.f32 0.4994258, %v1557_v32  ;;  %v1435_v0 = vmul.f32 %v1434_v5, %v4175_v4  ;;  %v1512_v42 = vadd.f32 0.001143296, %v1511_v2 }
 0x286   :  { %v1829_v63 = vadd.f32 1.0, %v2839_v38  ;;  %v1472_v56 = vadd.f32 0.001143296, %v1471_v43  ;;  %2943 = vrcp.f32 %v4419_v23  ;;  %v1398_v12 = vadd.f32 0.4994258, %v1397_v62 }
 0x287   :  { %v1603_v50 = vsub.f32 1.0, %v1602_v20  ;;  %v1559_v11 = vmul.f32 %v1558_v61, %v4257_v54  ;;  %v1436_v60 = vadd.f32 0.112945676, %v1435_v0  ;;  %vm1607_vm6 = vweird.f32 %v2940_v46 }
 0x288   :  { %v1845_v14 = vmul.f32 %v1829_v63, %v1157_v33  ;;  %v1513_v59 = vmul.f32 %v1512_v42, %v4239_v49  ;;  %v1473_v51 = vmul.f32 %v1472_v56, %v4212_v44  ;;  %v1399_v52 = vmul.f32 %v1398_v12, %v4139_v31 }
 0x289   :  { %v1604_v45 = vmul.f32 %v2940_v46, %v1603_v50  ;;  %v4435_v29 = vadd.f32 1.0, %v1559_v11  ;;  %v1437_v8 = vmul.f32 %v1436_v60, %v4175_v4  ;;  %v4443_v54 = vmul.f32 %v4384_v10, %v4218_v30 }
 0x28a   :  { %v4439_v40 = vpop.eup %2941  ;;  %1966 = vmatpush.msra.mxu2 %v1845_v14  ;;  %2880 = vmatpush.msrb.mxu3 %v1845_v14  ;;  %v1514_v33 = vadd.f32 0.014752088, %v1513_v59  ;;  %v1474_v25 = vadd.f32 0.014752088, %v1473_v51  ;;  %v1232_v19 = vadd.f32 0.001143296, %v1231_v41  ;;  %vm1606_vm8 = vweird.f32 %v4403_v37 }
 0x28b   :  { %v1605_v24 = vadd.f32 %v2940_v46, %v1604_v45  ;;  %2945 = vrcp.f32 %v4435_v29  ;;  %v1279_v16 = vmul.f32 %v1278_v55, %v4069_v26  ;;  %vm1608_vm7 = vmor %vm1606_vm8, %vm1607_vm6  ;;  %v1613_v31 = vor.u32 1.1754944e-38, %v1612_v27 }
 0x28c   :  { %v4448_v36 = vpop.eup %2943  ;;  %v1515_v30 = vmul.f32 %v1514_v33, %v4239_v49  ;;  %v1475_v10 = vmul.f32 %v1474_v25, %v4212_v44  ;;  %v1438_v3 = vadd.f32 0.4994258, %v1437_v8  ;;  %v1590_v13 = vmul.f32 %v1589_v17, %v4264_v22 }
 0x28d   :  { %v1609_v1 = vsel %vm1608_vm7, %v2940_v46, %v1605_v24  ;;  %vm1611_vm9 = vcmp.eq.f32.partialorder %v1610_v57, 8.507059e+37  ;;  %v4454_v39 = vadd.f32 1.0, %v1399_v52  ;;  %v4457_v26 = vmul.f32 %v1232_v19, %v4126_v58 }
 0x28e   :  { %v1614_v37 = vsel %vm1611_vm9, %v1613_v31, %v1609_v1  ;;  %v1516_v47 = vadd.f32 0.112945676, %v1515_v30  ;;  %v1476_v21 = vadd.f32 0.112945676, %v1475_v10  ;;  %v1439_v41 = vmul.f32 %v1438_v3, %v4175_v4 }
 0x28f   :  { %v1615_v55 = vmul.f32 %v1614_v37, %v1590_v13  ;;  %2947 = vrcp.f32 %v4454_v39  ;;  %v1372_v32 = vand.u32 2147483648, %v4419_v23  ;;  %v1330_v17 = vand.u32 2147483647, %v4416_v9 }
 0x290   :  { %v1517_v5 = vmul.f32 %v1516_v47, %v4239_v49  ;;  %v1477_v22 = vmul.f32 %v1476_v21, %v4212_v44  ;;  %v4465_v57 = vadd.f32 1.0, %v1279_v16  ;;  %v4467_v38 = vadd.f32 1.0, %v1439_v41 }
 0x291   :  { %v2946_v62 = vpop.eup %2945  ;;  %v2838_v46 = vclamps-f32 %v1615_v55, 1.0  ;;  %v1362_v2 = vmul.f32 %v4448_v36, %v4419_v23  ;;  %v1370_v4 = vand.u32 2147483647, %v4419_v23  ;;  %v1322_v61 = vmul.f32 %v4439_v40, %v4416_v9 }
 0x292   :  { %v1562_v43 = vmul.f32 %v2946_v62, %v4435_v29  ;;  %v1518_v20 = vadd.f32 0.4994258, %v1517_v5  ;;  %v1478_v27 = vadd.f32 0.4994258, %v1477_v22  ;;  %v1570_v63 = vand.u32 2147483647, %v4435_v29 }
 0x293   :  { %v1828_v0 = vadd.f32 1.0, %v2838_v46  ;;  %2949 = vrcp.f32 %v4467_v38  ;;  %v4477_v42 = vor.u32 1.1754944e-38, %v1372_v32  ;;  %vm1566_vm10 = vweird.f32 %v4435_v29 }
 0x294   :  { %v1563_v56 = vsub.f32 1.0, %v1562_v43  ;;  %v1519_v50 = vmul.f32 %v1518_v20, %v4239_v49  ;;  %v1479_v11 = vmul.f32 %v1478_v27, %v4212_v44  ;;  %vm1567_vm11 = vweird.f32 %v2946_v62 }
 0x295   :  { %v4482_v60 = vpop.eup %2947  ;;  %v1844_v12 = vmul.f32 %v1828_v0, %v4354_v6  ;;  %v1572_v14 = vand.u32 2147483648, %v4435_v29  ;;  %v1363_v59 = vsub.f32 1.0, %v1362_v2  ;;  %v1450_v52 = vand.u32 2147483647, %v4467_v38  ;;  %vm1568_vm14 = vmor %vm1566_vm10, %vm1567_vm11 }
 0x296   :  { %v1564_v51 = vmul.f32 %v2946_v62, %v1563_v56  ;;  %v4486_v45 = vadd.f32 1.0, %v1519_v50  ;;  %v4488_v8 = vadd.f32 1.0, %v1479_v11  ;;  %vm4491_vm12 = vcmp.eq.f32.partialorder %v1570_v63, 8.507059e+37 }
 0x297   :  { %1967 = vmatpush.msra.mxu2 %v1844_v12  ;;  %2881 = vmatpush.msrb.mxu3 %v1844_v12  ;;  %v1452_v44 = vand.u32 2147483648, %v4467_v38  ;;  %v1410_v6 = vand.u32 2147483647, %v4454_v39  ;;  %v1412_v33 = vand.u32 2147483648, %v4454_v39  ;;  %v1402_v19 = vmul.f32 %v4482_v60, %v4454_v39 }
 0x298   :  { %v1565_v25 = vadd.f32 %v2946_v62, %v1564_v51  ;;  %2951 = vrcp.f32 %v4486_v45  ;;  %vm1367_vm13 = vweird.f32 %v4448_v36  ;;  %v1323_v24 = vsub.f32 1.0, %v1322_v61 }
 0x299   :  { %v2950_v16 = vpop.eup %2949  ;;  %v1573_v31 = vor.u32 1.1754944e-38, %v1572_v14  ;;  %2953 = vrcp.f32 %v4488_v8  ;;  %vm1406_vm15 = vweird.f32 %v4454_v39  ;;  %v1364_v30 = vmul.f32 %v4448_v36, %v1363_v59 }
 0x29a   :  { %v1569_v10 = vsel %vm1568_vm14, %v2946_v62, %v1565_v25  ;;  %v1442_v3 = vmul.f32 %v2950_v16, %v4467_v38  ;;  %vm1446_vm0 = vweird.f32 %v4467_v38  ;;  %vm4510_vm1 = vcmp.eq.f32.partialorder %v1450_v52, 8.507059e+37 }
 0x29b   :  { %vm1366_vm2 = vweird.f32 %v4419_v23  ;;  %v1574_v29 = vsel %vm4491_vm12, %v1573_v31, %v1569_v10  ;;  %v1453_v1 = vor.u32 1.1754944e-38, %v1452_v44  ;;  %vm1407_vm3 = vweird.f32 %v4482_v60 }
 0x29c   :  { %vm4518_vm4 = vcmp.eq.f32.partialorder %v1410_v6, 8.507059e+37  ;;  %v1413_v47 = vor.u32 1.1754944e-38, %v1412_v33  ;;  %vm1326_vm5 = vweird.f32 %v4416_v9  ;;  %v1575_v21 = vmul.f32 %v1574_v29, %v4443_v54  ;;  %vm1408_vm14 = vmor %vm1406_vm15, %vm1407_vm3 }
 0x29d   :  { %v1443_v55 = vsub.f32 1.0, %v1442_v3  ;;  %v1403_v41 = vsub.f32 1.0, %v1402_v19  ;;  %v1324_v32 = vmul.f32 %v4439_v40, %v1323_v24  ;;  %vm1526_vm6 = vweird.f32 %v4486_v45 }
 0x29e   :  { %v1530_v5 = vand.u32 2147483647, %v4486_v45  ;;  %v1532_v22 = vand.u32 2147483648, %v4486_v45  ;;  %v1365_v62 = vadd.f32 %v4448_v36, %v1364_v30  ;;  %v2952_v46 = vpop.eup %2951  ;;  %v2837_v2 = vclamps-f32 %v1575_v21, 1.0 }
 0x29f   :  { %v1444_v43 = vmul.f32 %v2950_v16, %v1443_v55  ;;  %vm1447_vm8 = vweird.f32 %v2950_v16  ;;  %v1404_v20 = vmul.f32 %v4482_v60, %v1403_v41  ;;  %vm4532_vm7 = vcmp.eq.f32.partialorder %v1370_v4, 8.507059e+37  ;;  %v2954_v27 = vpop.eup %2953 }
 0x2a0   :  { %v1522_v61 = vmul.f32 %v2952_v46, %v4486_v45  ;;  %v1490_v0 = vand.u32 2147483647, %v4488_v8  ;;  %v1492_v63 = vand.u32 2147483648, %v4488_v8  ;;  %vm4542_vm10 = vcmp.eq.f32.partialorder %v1330_v17, 8.507059e+37  ;;  %vm1448_vm11 = vmor %vm1446_vm0, %vm1447_vm8 }
 0x2a1   :  { %v1827_v50 = vadd.f32 1.0, %v2837_v2  ;;  %v1482_v4 = vmul.f32 %v2954_v27, %v4488_v8  ;;  %v1445_v11 = vadd.f32 %v2950_v16, %v1444_v43  ;;  %v1325_v12 = vadd.f32 %v4439_v40, %v1324_v32  ;;  %vm4566_vm0 = vmor %vm1366_vm2, %vm1367_vm13 }
 0x2a2   :  { %v1523_v14 = vsub.f32 1.0, %v1522_v61  ;;  %v1405_v59 = vadd.f32 %v4482_v60, %v1404_v20  ;;  %vm1327_vm12 = vweird.f32 %v4439_v40  ;;  %v1332_v51 = vand.u32 2147483648, %v4416_v9 }
 0x2a3   :  { %v1843_v17 = vmul.f32 %v1827_v50, %v4330_v35  ;;  %v1483_v52 = vsub.f32 1.0, %v1482_v4  ;;  %v1449_v49 = vsel %vm1448_vm11, %v2950_v16, %v1445_v11  ;;  %2955 = vrcp.f32 %v4465_v57 }
 0x2a4   :  { %v1524_v44 = vmul.f32 %v2952_v46, %v1523_v14  ;;  %vm1527_vm9 = vweird.f32 %v2952_v46  ;;  %v1454_v38 = vsel %vm4510_vm1, %v1453_v1, %v1449_v49  ;;  %v1409_v6 = vsel %vm1408_vm14, %v4482_v60, %v1405_v59  ;;  %vm4579_vm1 = vmor %vm1326_vm5, %vm1327_vm12  ;;  %v5698_v1 = vld [vmem:[#allocation18_spill] sm:$0xff]  ;;  %v5702_v49 = vld [vmem:[#allocation16_spill] sm:$0xff] }
 0x2a5   :  { %1968 = vmatpush.msra.mxu2 %v1843_v17  ;;  %2882 = vmatpush.msrb.mxu3 %v1843_v17  ;;  %v1484_v39 = vmul.f32 %v2954_v27, %v1483_v52  ;;  %vm1487_vm15 = vweird.f32 %v2954_v27  ;;  %v1414_v33 = vsel %vm4518_vm4, %v1413_v47, %v1409_v6  ;;  %v1369_v25 = vsel %vm4566_vm0, %v4448_v36, %v1365_v62  ;;  %vm1528_vm2 = vmor %vm1526_vm6, %vm1527_vm9  ;;  %v5701_v52 = vld [vmem:[#allocation11_spill] sm:$0xff] }
 0x2a6   :  { %v1525_v60 = vadd.f32 %v2952_v46, %v1524_v44  ;;  %vm1531_vm13 = vcmp.eq.f32.partialorder %v1530_v5, 8.507059e+37  ;;  %v1533_v19 = vor.u32 1.1754944e-38, %v1532_v22  ;;  %v1329_v24 = vsel %vm4579_vm1, %v4439_v40, %v1325_v12 }
 0x2a7   :  { %v1485_v36 = vadd.f32 %v2954_v27, %v1484_v39  ;;  %vm1491_vm3 = vcmp.eq.f32.partialorder %v1490_v0, 8.507059e+37  ;;  %v1455_v16 = vmul.f32 %v1454_v38, %v4351_v7  ;;  %v1333_v9 = vor.u32 1.1754944e-38, %v1332_v51 }
 0x2a8   :  { %v1529_v31 = vsel %vm1528_vm2, %v2952_v46, %v1525_v60  ;;  %vm5697_vm4 = vweird.f32 %v4488_v8  ;;  %v1493_v30 = vor.u32 1.1754944e-38, %v1492_v63  ;;  %v1415_v10 = vmul.f32 %v1414_v33, %v4325_v28  ;;  %v5699_v28 = vld [vmem:[#allocation14_spill] sm:$0xff]  ;;  %v5703_v33 = vld [vmem:[#allocation9_spill] sm:$0xff] }
 0x2a9   :  { %vm1488_vm5 = vmor %vm5697_vm4, %vm1487_vm15  ;;  %v1374_v40 = vsel %vm4532_vm7, %v4477_v42, %v1369_v25  ;;  %v2956_v3 = vpop.eup %2955  ;;  %v1534_v13 = vsel %vm1531_vm13, %v1533_v19, %v1529_v31  ;;  %v1334_v29 = vsel %vm4542_vm10, %v1333_v9, %v1329_v24  ;;  %v1234_v7 = vadd.f32 0.014752088, %v4457_v26  ;;  %v5704_v60 = vld [vmem:[#allocation5_spill] sm:$0xff]  ;;  %v5705_v24 = vld [vmem:[#allocation19_spill] sm:$0xff] }
 0x2aa   :  { %v1489_v45 = vsel %vm1488_vm5, %v2954_v27, %v1485_v36  ;;  %v1153_v37 = vmul.f32 0.5, %v5698_v1  ;;  %v1535_v8 = vmul.f32 %v1534_v13, %v4391_v18  ;;  %v1282_v21 = vmul.f32 %v2956_v3, %v4465_v57  ;;  %v5700_v27 = vld [vmem:[#allocation8_spill] sm:$0xff] }
 0x2ab   :  { %v1494_v47 = vsel %vm1491_vm3, %v1493_v30, %v1489_v45  ;;  %v1154_v55 = vmul.f32 0.5, %v5699_v28  ;;  %v2834_v42 = vclamps-f32 %v1455_v16, 1.0  ;;  %v1375_v32 = vmul.f32 %v1374_v40, %v4319_v48  ;;  %v5706_v40 = vld [vmem:[#allocation20_spill] sm:$0xff] }
 0x2ac   :  { %v1495_v41 = vmul.f32 %v1494_v47, %v4382_v53  ;;  %v2836_v5 = vclamps-f32 %v1535_v8, 1.0  ;;  %v1335_v22 = vmul.f32 %v1334_v29, %v4315_v34  ;;  %v1283_v62 = vsub.f32 1.0, %v1282_v21 }
 0x2ad   :  { %v1290_v26 = vand.u32 2147483647, %v4465_v57  ;;  %v2833_v2 = vclamps-f32 %v1415_v10, 1.0  ;;  %v1292_v18 = vand.u32 2147483648, %v4465_v57  ;;  %v1235_v43 = vmul.f32 %v1234_v7, %v4126_v58 }
 0x2ae   :  { %v2835_v46 = vclamps-f32 %v1495_v41, 1.0  ;;  %v1826_v20 = vadd.f32 1.0, %v2836_v5  ;;  %v1284_v54 = vmul.f32 %v2956_v3, %v1283_v62  ;;  %vm1287_vm6 = vweird.f32 %v2956_v3 }
 0x2af   :  { %v1191_v53 = vmul.f32 3.8918573e-05, %v5700_v27  ;;  %v2832_v0 = vclamps-f32 %v1375_v32, 1.0  ;;  %vm1286_vm8 = vweird.f32 %v4465_v57  ;;  %v1236_v48 = vadd.f32 0.112945676, %v1235_v43 }
 0x2b0   :  { %v1825_v61 = vadd.f32 1.0, %v2835_v46  ;;  %v1842_v34 = vmul.f32 %v1826_v20, %v1154_v55  ;;  %v1824_v63 = vadd.f32 1.0, %v2834_v42  ;;  %v1285_v56 = vadd.f32 %v2956_v3, %v1284_v54  ;;  %vm1288_vm7 = vmor %vm1286_vm8, %vm1287_vm6 }
 0x2b1   :  { %v1192_v50 = vadd.f32 0.001143296, %v1191_v53  ;;  %v1823_v4 = vadd.f32 1.0, %v2833_v2  ;;  %v2831_v11 = vclamps-f32 %v1335_v22, 1.0  ;;  %v1293_v12 = vor.u32 1.1754944e-38, %v1292_v18 }
 0x2b2   :  { %v1237_v14 = vmul.f32 %v1236_v48, %v4126_v58  ;;  %1969 = vmatpush.msra.mxu2 %v1842_v34  ;;  %2883 = vmatpush.msrb.mxu3 %v1842_v34  ;;  %v1841_v59 = vmul.f32 %v1825_v61, %v1153_v37  ;;  %v1289_v51 = vsel %vm1288_vm7, %v2956_v3, %v1285_v56  ;;  %vm1291_vm9 = vcmp.eq.f32.partialorder %v1290_v26, 8.507059e+37  ;;  %v5707_v37 = vld [vmem:[#allocation22_spill] sm:$0xff]  ;;  %v5708_v34 = vld [vmem:[#allocation17_spill] sm:$0xff] }
 0x2b3   :  { %v1193_v17 = vmul.f32 %v1192_v50, %v5700_v27  ;;  %v1225_v57 = vadd.f32 0.05243302, %v5701_v52  ;;  %v1151_v44 = vmul.f32 0.5, %v5702_v49  ;;  %v1294_v38 = vsel %vm1291_vm9, %v1293_v12, %v1289_v51 }
 0x2b4   :  { %v1238_v6 = vadd.f32 0.4994258, %v1237_v14  ;;  %1970 = vmatpush.msra.mxu2 %v1841_v59  ;;  %2884 = vmatpush.msrb.mxu3 %v1841_v59  ;;  %v1840_v35 = vmul.f32 %v1824_v63, %v4311_v15  ;;  %v1822_v39 = vadd.f32 1.0, %v2832_v0  ;;  %v1295_v25 = vmul.f32 %v1294_v38, %v5703_v33 }
 0x2b5   :  { %v1194_v23 = vadd.f32 0.014752088, %v1193_v17  ;;  %v1183_v19 = vadd.f32 0.0036580483, %v5704_v60  ;;  %v1150_v36 = vmul.f32 0.5, %v5705_v24  ;;  %v1839_v9 = vmul.f32 %v1823_v4, %v1151_v44 }
 0x2b6   :  { %v1239_v16 = vmul.f32 %v1238_v6, %v4126_v58  ;;  %1971 = vmatpush.msra.mxu2 %v1840_v35  ;;  %2885 = vmatpush.msrb.mxu3 %v1840_v35  ;;  %v1821_v31 = vadd.f32 1.0, %v2831_v11  ;;  %v2830_v30 = vclamps-f32 %v1295_v25, 1.0  ;;  %v1149_v3 = vmul.f32 0.5, %v5706_v40  ;;  %v1852_v40 = vld [vmem:[%s5558_s5 + $0x10] sm:$0xff] }
 0x2b7   :  { %v1195_v10 = vmul.f32 %v1194_v23, %v5700_v27  ;;  %v1226_v13 = vmul.f32 %v1225_v57, %v4126_v58  ;;  %v1838_v45 = vmul.f32 %v1822_v39, %v1150_v36  ;;  %v1184_v1 = vmul.f32 %v1183_v19, %v5700_v27  ;;  %v5709_v57 = vld [vmem:[#allocation21_spill] sm:$0xff]  ;;  %v5710_v39 = vld [vmem:[#allocation15_spill] sm:$0xff]  ;;  %v5711_v19 = vld [vmem:[#allocation6_spill] sm:$0xff] }
 0x2b8   :  { %v1240_v15 = vadd.f32 1.0, %v1239_v16  ;;  %1972 = vmatpush.msra.mxu2 %v1839_v9  ;;  %2886 = vmatpush.msrb.mxu3 %v1839_v9  ;;  %v1820_v29 = vadd.f32 1.0, %v2830_v30  ;;  %v1148_v8 = vmul.f32 0.5, %v5707_v37  ;;  %v1837_v47 = vmul.f32 %v1821_v31, %v1149_v3  ;;  %v1850_v9 = vld [vmem:[%s5558_s5] sm:$0xff]  ;;  %v1851_v30 = vld [vmem:[%s5558_s5 + $0x8] sm:$0xff]  ;;  %v1864_v3 = vld [vmem:[%s5558_s5 + $0x70] sm:$0xff] }
 0x2b9   :  { %v1196_v7 = vadd.f32 0.112945676, %v1195_v10  ;;  %v1227_v28 = vadd.f32 0.18741608, %v1226_v13  ;;  %v1185_v42 = vadd.f32 0.05243302, %v1184_v1 }
 0x2ba   :  { %2957 = vrcp.f32 %v1240_v15  ;;  %1973 = vmatpush.msra.mxu2 %v1838_v45  ;;  %2887 = vmatpush.msrb.mxu3 %v1838_v45  ;;  %v1836_v55 = vmul.f32 %v1820_v29, %v1148_v8  ;;  %v1252_v18 = vand.u32 2147483648, %v1240_v15  ;;  %v1250_v54 = vand.u32 2147483647, %v1240_v15  ;;  %v1862_v31 = vld [vmem:[%s5558_s5 + $0x60] sm:$0xff]  ;;  %v1863_v10 = vld [vmem:[%s5558_s5 + $0x68] sm:$0xff]  ;;  %v1865_v13 = vld [vmem:[%s5558_s5 + $0x78] sm:$0xff] }
 0x2bb   :  { %v1197_v21 = vmul.f32 %v1196_v7, %v5700_v27  ;;  %v1228_v22 = vmul.f32 %v1227_v28, %v4126_v58  ;;  %v1186_v46 = vmul.f32 %v1185_v42, %v5700_v27  ;;  %vm1246_vm11 = vweird.f32 %v1240_v15  ;;  %v1854_v45 = vld [vmem:[%s5558_s5 + $0x20] sm:$0xff]  ;;  %v1855_v29 = vld [vmem:[%s5558_s5 + $0x28] sm:$0xff]  ;;  %v1856_v7 = vld [vmem:[%s5558_s5 + $0x30] sm:$0xff]  ;;  %v4682_v28 = vpop.permute.xlu2 %1959  ;;  %v1950_v42 = vpop.permute.xlu1 %1949 }
 0x2bc   :  { %1974 = vmatpush.msra.mxu2 %v1837_v47  ;;  %2888 = vmatpush.msrb.mxu3 %v1837_v47  ;;  %v1253_v0 = vor.u32 1.1754944e-38, %v1252_v18  ;;  %vm1251_vm14 = vcmp.eq.f32.partialorder %v1250_v54, 8.507059e+37  ;;  %v1147_v49 = vmul.f32 0.5, %v5709_v57  ;;  %v1146_v24 = vmul.f32 0.5, %v5711_v19  ;;  %v1857_v1 = vld [vmem:[%s5558_s5 + $0x38] sm:$0xff]  ;;  %v1858_v37 = vld [vmem:[%s5558_s5 + $0x40] sm:$0xff] }
 0x2bd   :  { %v1198_v41 = vadd.f32 0.4994258, %v1197_v21  ;;  %v1229_v43 = vadd.f32 1.1283791, %v1228_v22  ;;  %v1187_v53 = vadd.f32 0.18741608, %v1186_v46 }
 0x2be   :  { %1975 = vmatpush.msra.mxu2 %v1836_v55  ;;  %2889 = vmatpush.msrb.mxu3 %v1836_v55  ;;  %v1859_v8 = vld [vmem:[%s5558_s5 + $0x48] sm:$0xff]  ;;  %v1860_v47 = vld [vmem:[%s5558_s5 + $0x50] sm:$0xff]  ;;  %v1861_v21 = vld [vmem:[%s5558_s5 + $0x58] sm:$0xff] }
 0x2bf   :  { %v1199_v32 = vmul.f32 %v1198_v41, %v5700_v27  ;;  %v1230_v63 = vmul.f32 %v1229_v43, %v5708_v34  ;;  %v1188_v56 = vmul.f32 %v1187_v53, %v5700_v27  ;;  %v1955_v53 = vpop.permute.xlu0 %1954 }
 0x2c0   :  { %v2958_v5 = vpop.eup %2957 }
 0x2c1   :  { %v1242_v62 = vmul.f32 %v2958_v5, %v1240_v15  ;;  %v1200_v26 = vadd.f32 1.0, %v1199_v32  ;;  %vm1247_vm10 = vweird.f32 %v2958_v5  ;;  %v1189_v51 = vadd.f32 1.1283791, %v1188_v56  ;;  %v1853_v15 = vld [vmem:[%s5558_s5 + $0x18] sm:$0xff] }
 0x2c2   :  { %vm1248_vm12 = vmor %vm1246_vm11, %vm1247_vm10 }
 0x2c3   :  { %v1243_v2 = vsub.f32 1.0, %v1242_v62  ;;  %2959 = vrcp.f32 %v1200_v26  ;;  %v1212_v59 = vand.u32 2147483648, %v1200_v26  ;;  %v1210_v52 = vand.u32 2147483647, %v1200_v26  ;;  %v1945_v55 = vpop.permute.xlu2 %1944 }
 0x2c4   :  { %vm1206_vm15 = vweird.f32 %v1200_v26  ;;  %v1190_v27 = vmul.f32 %v1189_v51, %v5710_v39 }
 0x2c5   :  { %v1244_v20 = vmul.f32 %v2958_v5, %v1243_v2  ;;  %v1213_v35 = vor.u32 1.1754944e-38, %v1212_v59  ;;  %vm1211_vm13 = vcmp.eq.f32.partialorder %v1210_v52, 8.507059e+37 }
 0x2c7   :  { %v1245_v61 = vadd.f32 %v2958_v5, %v1244_v20 }
 0x2c9   :  { %v2960_v48 = vpop.eup %2959  ;;  %v1249_v58 = vsel %vm1248_vm12, %v2958_v5, %v1245_v61  ;;  %v4688_v5 = vpop.permute.xlu1 %1934 }
 0x2ca   :  { %v1254_v50 = vsel %vm1251_vm14, %v1253_v0, %v1249_v58  ;;  %v1202_v4 = vmul.f32 %v2960_v48, %v1200_v26  ;;  %vm1207_vm0 = vweird.f32 %v2960_v48 }
 0x2cb   :  { %v1255_v11 = vmul.f32 %v1254_v50, %v1230_v63  ;;  %vm1208_vm1 = vmor %vm1206_vm15, %vm1207_vm0  ;;  %v4684_v41 = vpop.permute.xlu2 %1929 }
 0x2cc   :  { %v1203_v12 = vsub.f32 1.0, %v1202_v4  ;;  %v4715_v4 = vpop.permute.xlu0 %1939 }
 0x2cd   :  { %v2829_v14 = vclamps-f32 %v1255_v11, 1.0 }
 0x2ce   :  { %v1204_v17 = vmul.f32 %v2960_v48, %v1203_v12 }
 0x2cf   :  { %v1819_v44 = vadd.f32 1.0, %v2829_v14 }
 0x2d0   :  { %v1205_v38 = vadd.f32 %v2960_v48, %v1204_v17 }
 0x2d1   :  { %v1835_v6 = vmul.f32 %v1819_v44, %v1147_v49  ;;  %v4692_v62 = vpop.permute.xlu1 %1919 }
 0x2d2   :  { %v1209_v33 = vsel %vm1208_vm1, %v2960_v48, %v1205_v38 }
 0x2d3   :  { %1976 = vmatpush.msra.mxu2 %v1835_v6  ;;  %2890 = vmatpush.msrb.mxu3 %v1835_v6  ;;  %v1214_v25 = vsel %vm1211_vm13, %v1213_v35, %v1209_v33  ;;  %v4686_v32 = vpop.permute.xlu2 %1914 }
 0x2d4   :  { %v1215_v23 = vmul.f32 %v1214_v25, %v1190_v27  ;;  %v4728_v44 = vpop.permute.xlu0 %1924 }
 0x2d6   :  { %v2828_v60 = vclamps-f32 %v1215_v23, 1.0 }
 0x2d8   :  { %v1818_v36 = vadd.f32 1.0, %v2828_v60 }
 0x2d9   :  { %v4696_v43 = vpop.permute.xlu1 %1904 }
 0x2da   :  { %v1834_v16 = vmul.f32 %v1818_v36, %v1146_v24 }
 0x2db   :  { %v4690_v22 = vpop.permute.xlu2 %1899 }
 0x2dc   :  { %1977 = vmatpush.msra.mxu2 %v1834_v16  ;;  %2891 = vmatpush.msrb.mxu3 %v1834_v16  ;;  %v4737_v24 = vpop.permute.xlu0 %1909 }
 0x2dd   :  { %1978 = vmatmul.f32.vlgmr.msra.gmra.mxu2 %v1850_v9  ;;  %2014 = vmatmul.f32.vlgmr.msrb.gmra.mxu3 %v1862_v31 }
 0x2e1   :  { %v1890_v63 = vpop.permute.xlu1 %1889 }
 0x2e3   :  { %v1885_v46 = vpop.permute.xlu2 %1884 }
 0x2e5   :  { %1981 = vmatmul.f32.gmra.mxu2 %v1851_v30  ;;  %2017 = vmatmul.f32.gmra.mxu3 %v1863_v10 }
 0x2ed   :  { %1984 = vmatmul.f32.gmra.mxu2 %v1852_v40  ;;  %2020 = vmatmul.f32.gmra.mxu3 %v1864_v3 }
 0x2f5   :  { %1987 = vmatmul.f32.gmra.mxu2 %v1853_v15  ;;  %2023 = vmatmul.f32.gmra.mxu3 %v1865_v13 }
 0x2fd   :  { %1990 = vmatmul.f32.gmra.mxu2 %v1854_v45 }
 0x305   :  { %1993 = vmatmul.f32.gmra.mxu2 %v1855_v29 }
 0x30d   :  { %1996 = vmatmul.f32.gmra.mxu2 %v1856_v7 }
 0x315   :  { %1999 = vmatmul.f32.gmra.mxu2 %v1857_v1 }
 0x31d   :  { %2002 = vmatmul.f32.gmra.mxu2 %v1858_v37 }
 0x325   :  { %2005 = vmatmul.f32.gmra.mxu2 %v1859_v8 }
 0x32d   :  { %2008 = vmatmul.f32.gmra.mxu2 %v1860_v47 }
 0x335   :  { %2011 = vmatmul.f32.gmra.mxu2 %v1861_v21 }
 0x360   :  { %v1979_v26 = vpop.f32.mrf.mxu2  ;;  %v2015_v18 = vpop.f32.mrf.mxu3 }
 0x361   :  { %v4694_v2 = vadd.f32 %v1979_v26, %v1885_v46  ;;  %v4701_v54 = vadd.f32 %v2015_v18, %v1945_v55 }
 0x363   :  { %5712 = vst [vmem:[#allocation10_spill] sm:$0xff] %v4694_v2  ;;  %v4699_v20 = vmul.f32 0.70710677, %v4694_v2  ;;  %v4706_v0 = vmul.f32 0.70710677, %v4701_v54 }
 0x365   :  { %5713 = vst [vmem:[#allocation7_spill] sm:$0xff] %v4699_v20  ;;  %v2059_v61 = vmul.f32 %v4699_v20, %v4699_v20  ;;  %v2539_v58 = vmul.f32 %v4706_v0, %v4706_v0 }
 0x367   :  { %v4708_v48 = vmin.f32 %v2059_v61, 16.0  ;;  %v4717_v11 = vmin.f32 %v2539_v58, 16.0 }
 0x368   :  { %v1982_v34 = vpop.f32.mrf.mxu2  ;;  %v2018_v59 = vpop.f32.mrf.mxu3 }
 0x369   :  { %v4712_v56 = vadd.f32 %v1982_v34, %v1890_v63  ;;  %v2072_v50 = vmul.f32 3.8918573e-05, %v4708_v48  ;;  %v2552_v51 = vmul.f32 3.8918573e-05, %v4717_v11  ;;  %v4735_v19 = vadd.f32 %v2018_v59, %v1950_v42  ;;  %v1895_v42 = vpop.permute.xlu0 %1894 }
 0x36a   :  { %v2061_v9 = vmul.f32 2.1237322e-06, %v4708_v48  ;;  %v2541_v13 = vmul.f32 2.1237322e-06, %v4717_v11 }
 0x36b   :  { %5714 = vst [vmem:[#allocation13_spill] sm:$0xff] %v4712_v56  ;;  %v4720_v12 = vmul.f32 0.70710677, %v4712_v56  ;;  %v2073_v14 = vadd.f32 0.001143296, %v2072_v50 }
 0x36c   :  { %v2553_v57 = vadd.f32 0.001143296, %v2552_v51  ;;  %v4747_v10 = vmul.f32 0.70710677, %v4735_v19  ;;  %v2062_v15 = vadd.f32 0.00028619796, %v2061_v9 }
 0x36d   :  { %5715 = vst [vmem:[#allocation12_spill] sm:$0xff] %v4720_v12  ;;  %v2099_v17 = vmul.f32 %v4720_v12, %v4720_v12  ;;  %v2074_v52 = vmul.f32 %v2073_v14, %v4708_v48  ;;  %v2542_v21 = vadd.f32 0.00028619796, %v2541_v13 }
 0x36e   :  { %v2554_v6 = vmul.f32 %v2553_v57, %v4717_v11  ;;  %v2579_v7 = vmul.f32 %v4747_v10, %v4747_v10  ;;  %v2063_v47 = vmul.f32 %v2062_v15, %v4708_v48 }
 0x36f   :  { %v4726_v49 = vmin.f32 %v2099_v17, 16.0  ;;  %v2075_v38 = vadd.f32 0.014752088, %v2074_v52  ;;  %v2543_v63 = vmul.f32 %v2542_v21, %v4717_v11 }
 0x370   :  { %v2021_v39 = vpop.f32.mrf.mxu3  ;;  %v2555_v33 = vadd.f32 0.014752088, %v2554_v6  ;;  %v1985_v1 = vpop.f32.mrf.mxu2  ;;  %v4760_v46 = vmin.f32 %v2579_v7, 16.0  ;;  %v2064_v34 = vadd.f32 0.0036580483, %v2063_v47 }
 0x371   :  { %v2112_v35 = vmul.f32 3.8918573e-05, %v4726_v49  ;;  %v2076_v27 = vmul.f32 %v2075_v38, %v4708_v48  ;;  %v4733_v25 = vadd.f32 %v2021_v39, %v1955_v53  ;;  %v4762_v18 = vadd.f32 %v1985_v1, %v1895_v42 }
 0x372   :  { %v2556_v36 = vmul.f32 %v2555_v33, %v4717_v11  ;;  %v2592_v14 = vmul.f32 3.8918573e-05, %v4760_v46  ;;  %v2065_v52 = vmul.f32 %v2064_v34, %v4708_v48  ;;  %v2544_v57 = vadd.f32 0.0036580483, %v2543_v63 }
 0x373   :  { %v2113_v23 = vadd.f32 0.001143296, %v2112_v35  ;;  %v2077_v60 = vadd.f32 0.112945676, %v2076_v27  ;;  %v4741_v16 = vmul.f32 0.70710677, %v4733_v25 }
 0x374   :  { %v2557_v40 = vadd.f32 0.112945676, %v2556_v36  ;;  %5716 = vst [vmem:[#allocation18_spill] sm:$0xff] %v4762_v18  ;;  %v4770_v59 = vmul.f32 0.70710677, %v4762_v18 }
 0x375   :  { %v2114_v31 = vmul.f32 %v2113_v23, %v4726_v49  ;;  %v2078_v30 = vmul.f32 %v2077_v60, %v4708_v48  ;;  %v2619_v3 = vmul.f32 %v4741_v16, %v4741_v16  ;;  %v2581_v35 = vmul.f32 2.1237322e-06, %v4760_v46 }
 0x376   :  { %v2558_v37 = vmul.f32 %v2557_v40, %v4717_v11  ;;  %5717 = vst [vmem:[#allocation14_spill] sm:$0xff] %v4770_v59  ;;  %v2593_v39 = vadd.f32 0.001143296, %v2592_v14  ;;  %v2101_v27 = vmul.f32 2.1237322e-06, %v4726_v49  ;;  %v2139_v33 = vmul.f32 %v4770_v59, %v4770_v59 }
 0x377   :  { %v2115_v45 = vadd.f32 0.014752088, %v2114_v31  ;;  %v2079_v29 = vadd.f32 0.4994258, %v2078_v30  ;;  %v4755_v8 = vmin.f32 %v2619_v3, 16.0  ;;  %v2545_v30 = vmul.f32 %v2544_v57, %v4717_v11 }
 0x378   :  { %v2559_v53 = vadd.f32 0.4994258, %v2558_v37  ;;  %v1988_v6 = vpop.f32.mrf.mxu2  ;;  %v2024_v23 = vpop.f32.mrf.mxu3  ;;  %v2066_v31 = vadd.f32 0.05243302, %v2065_v52  ;;  %v2582_v3 = vadd.f32 0.00028619796, %v2581_v35  ;;  %v2594_v15 = vmul.f32 %v2593_v39, %v4760_v46 }
 0x379   :  { %v2116_v55 = vmul.f32 %v2115_v45, %v4726_v49  ;;  %v2080_v26 = vmul.f32 %v2079_v29, %v4708_v48  ;;  %v2632_v61 = vmul.f32 3.8918573e-05, %v4755_v8  ;;  %v4784_v9 = vadd.f32 %v2024_v23, %v4682_v28 }
 0x37a   :  { %v2560_v51 = vmul.f32 %v2559_v53, %v4717_v11  ;;  %v2102_v13 = vadd.f32 0.00028619796, %v2101_v27  ;;  %v4788_v45 = vmin.f32 %v2139_v33, 16.0  ;;  %v2067_v28 = vmul.f32 %v2066_v31, %v4708_v48 }
 0x37b   :  { %v2117_v58 = vadd.f32 0.112945676, %v2116_v55  ;;  %v4766_v50 = vadd.f32 1.0, %v2080_v26  ;;  %v2633_v17 = vadd.f32 0.001143296, %v2632_v61  ;;  %v2583_v21 = vmul.f32 %v2582_v3, %v4760_v46 }
 0x37c   :  { %v4780_v60 = vadd.f32 1.0, %v2560_v51  ;;  %v4794_v1 = vmul.f32 0.70710677, %v4784_v9  ;;  %v2546_v37 = vadd.f32 0.05243302, %v2545_v30  ;;  %v2103_v53 = vmul.f32 %v2102_v13, %v4726_v49 }
 0x37d   :  { %v2118_v38 = vmul.f32 %v2117_v58, %v4726_v49  ;;  %2961 = vrcp.f32 %v4766_v50  ;;  %v2634_v36 = vmul.f32 %v2633_v17, %v4755_v8  ;;  %v2595_v55 = vadd.f32 0.014752088, %v2594_v15 }
 0x37e   :  { %2963 = vrcp.f32 %v4780_v60  ;;  %v2659_v42 = vmul.f32 %v4794_v1, %v4794_v1  ;;  %v2152_v61 = vmul.f32 3.8918573e-05, %v4788_v45  ;;  %v2068_v14 = vadd.f32 0.18741608, %v2067_v28 }
 0x37f   :  { %v2119_v40 = vadd.f32 0.4994258, %v2118_v38  ;;  %v2635_v7 = vadd.f32 0.014752088, %v2634_v36  ;;  %v2547_v51 = vmul.f32 %v2546_v37, %v4717_v11  ;;  %v2584_v57 = vadd.f32 0.0036580483, %v2583_v21 }
 0x380   :  { %v4805_v34 = vpop.f32.mrf.mxu2  ;;  %v4808_v58 = vmin.f32 %v2659_v42, 16.0  ;;  %v2596_v38 = vmul.f32 %v2595_v55, %v4760_v46  ;;  %v2104_v33 = vadd.f32 0.0036580483, %v2103_v53  ;;  %v2153_v23 = vadd.f32 0.001143296, %v2152_v61 }
 0x381   :  { %v2120_v47 = vmul.f32 %v2119_v40, %v4726_v49  ;;  %v2636_v63 = vmul.f32 %v2635_v7, %v4755_v8  ;;  %v4819_v31 = vadd.f32 %v1988_v6, %v4690_v22  ;;  %v2069_v3 = vmul.f32 %v2068_v14, %v4708_v48 }
 0x382   :  { %v2661_v35 = vmul.f32 2.1237322e-06, %v4808_v58  ;;  %v2672_v39 = vmul.f32 3.8918573e-05, %v4808_v58  ;;  %v2548_v15 = vadd.f32 0.18741608, %v2547_v51  ;;  %v2585_v7 = vmul.f32 %v2584_v57, %v4760_v46 }
 0x383   :  { %v4790_v29 = vpop.eup %2961  ;;  %v4811_v17 = vadd.f32 1.0, %v2120_v47  ;;  %v2637_v36 = vadd.f32 0.112945676, %v2636_v63  ;;  %5719 = vst [vmem:[#allocation11_spill] sm:$0xff] %v4819_v31  ;;  %v2597_v28 = vadd.f32 0.112945676, %v2596_v38  ;;  %v2105_v6 = vmul.f32 %v2104_v33, %v4726_v49 }
 0x384   :  { %5718 = vst [vmem:[#allocation8_spill] sm:$0xff] %v4790_v29  ;;  %v2083_v26 = vmul.f32 %v4790_v29, %v4766_v50  ;;  %v4813_v52 = vpop.eup %2963  ;;  %v2662_v30 = vadd.f32 0.00028619796, %v2661_v35  ;;  %v2673_v40 = vadd.f32 0.001143296, %v2672_v39  ;;  %v2154_v48 = vmul.f32 %v2153_v23, %v4788_v45 }
 0x385   :  { %v2563_v13 = vmul.f32 %v4813_v52, %v4780_v60  ;;  %2965 = vrcp.f32 %v4811_v17  ;;  %v2638_v55 = vmul.f32 %v2637_v36, %v4755_v8  ;;  %v4835_v42 = vmul.f32 0.70710677, %v4819_v31 }
 0x386   :  { %v2084_v27 = vsub.f32 1.0, %v2083_v26  ;;  %v2663_v37 = vmul.f32 %v2662_v30, %v4808_v58  ;;  %v2674_v47 = vmul.f32 %v2673_v40, %v4808_v58  ;;  %v4837_v53 = vadd.f32 1.1283791, %v2069_v3 }
 0x387   :  { %5720 = vst [vmem:[#allocation16_spill] sm:$0xff] %v4835_v42  ;;  %v4840_v61 = vmul.f32 0.5, %v4701_v54  ;;  %v2549_v63 = vmul.f32 %v2548_v15, %v4717_v11  ;;  %v2564_v14 = vsub.f32 1.0, %v2563_v13  ;;  %vm2087_vm2 = vweird.f32 %v4766_v50 }
 0x388   :  { %v2085_v22 = vmul.f32 %v4790_v29, %v2084_v27  ;;  %v4830_v21 = vpop.f32.mrf.mxu2  ;;  %v2675_v26 = vadd.f32 0.014752088, %v2674_v47  ;;  %5721 = vst [vmem:[#allocation9_spill] sm:$0xff] %v4837_v53  ;;  %v2586_v57 = vadd.f32 0.05243302, %v2585_v7  ;;  %v2598_v38 = vmul.f32 %v2597_v28, %v4760_v46 }
 0x389   :  { %v2664_v35 = vadd.f32 0.0036580483, %v2663_v37  ;;  %vm2088_vm3 = vweird.f32 %v4790_v29  ;;  %v2106_v33 = vadd.f32 0.05243302, %v2105_v6  ;;  %v2155_v23 = vadd.f32 0.014752088, %v2154_v48 }
 0x38a   :  { %v2676_v54 = vmul.f32 %v2675_v26, %v4808_v58  ;;  %v4852_v11 = vadd.f32 %v4790_v29, %v2085_v22  ;;  %v2639_v36 = vadd.f32 0.4994258, %v2638_v55  ;;  %v2179_v30 = vmul.f32 %v4835_v42, %v4835_v42  ;;  %vm4879_vm6 = vmor %vm2087_vm2, %vm2088_vm3 }
 0x38b   :  { %v4846_v39 = vpop.eup %2965  ;;  %v2550_v40 = vadd.f32 1.1283791, %v2549_v63  ;;  %v2565_v3 = vmul.f32 %v4813_v52, %v2564_v14  ;;  %vm2567_vm4 = vweird.f32 %v4780_v60  ;;  %v2587_v7 = vmul.f32 %v2586_v57, %v4760_v46 }
 0x38c   :  { %5722 = vst [vmem:[#allocation5_spill] sm:$0xff] %v4846_v39  ;;  %v2677_v15 = vadd.f32 0.112945676, %v2676_v54  ;;  %v2123_v13 = vmul.f32 %v4846_v39, %v4811_v17  ;;  %v2599_v28 = vadd.f32 0.4994258, %v2598_v38  ;;  %v2665_v37 = vmul.f32 %v2664_v35, %v4808_v58 }
 0x38d   :  { %5723 = vst [vmem:[#allocation19_spill] sm:$0xff] %v4852_v11  ;;  %v2107_v47 = vmul.f32 %v2106_v33, %v4726_v49  ;;  %v2141_v22 = vmul.f32 2.1237322e-06, %v4788_v45  ;;  %v2621_v6 = vmul.f32 2.1237322e-06, %v4755_v8  ;;  %v2156_v63 = vmul.f32 %v2155_v23, %v4788_v45 }
 0x38e   :  { %v2678_v48 = vmul.f32 %v2677_v15, %v4808_v58  ;;  %v2571_v26 = vand.u32 2147483647, %v4780_v60  ;;  %v2640_v14 = vmul.f32 %v2639_v36, %v4755_v8  ;;  %v4869_v54 = vmin.f32 %v2179_v30, 16.0 }
 0x38f   :  { %v2566_v57 = vadd.f32 %v4813_v52, %v2565_v3  ;;  %vm2568_vm5 = vweird.f32 %v4813_v52  ;;  %v2573_v38 = vand.u32 2147483648, %v4780_v60  ;;  %v2124_v33 = vsub.f32 1.0, %v2123_v13 }
 0x390   :  { %v1997_v55 = vpop.f32.mrf.mxu2  ;;  %v2679_v35 = vadd.f32 0.4994258, %v2678_v48  ;;  %v2588_v27 = vadd.f32 0.18741608, %v2587_v7  ;;  %v2600_v15 = vmul.f32 %v2599_v28, %v4760_v46  ;;  %v2666_v51 = vadd.f32 0.05243302, %v2665_v37  ;;  %vm4890_vm8 = vmor %vm2567_vm4, %vm2568_vm5 }
 0x391   :  { %v5724_v23 = vmov 0  ;;  %v2108_v36 = vadd.f32 0.18741608, %v2107_v47  ;;  %v2142_v30 = vadd.f32 0.00028619796, %v2141_v22  ;;  %v4894_v37 = vadd.f32 1.0, %v2640_v14 }
 0x392   :  { %v5725_v23 = vsel %vm4879_vm6, 4294967295, %v5724_v23  ;;  %v2622_v3 = vadd.f32 0.00028619796, %v2621_v6  ;;  %v2680_v2 = vmul.f32 %v2679_v35, %v4808_v58  ;;  %v2157_v28 = vadd.f32 0.112945676, %v2156_v63 }
 0x393   :  { %5726 = vst [vmem:[#allocation20_spill] sm:$0xff] %v5725_v23  ;;  %v2192_v47 = vmul.f32 3.8918573e-05, %v4869_v54  ;;  %v2570_v22 = vsel %vm4890_vm8, %v4813_v52, %v2566_v57  ;;  %v2574_v6 = vor.u32 1.1754944e-38, %v2573_v38  ;;  %v4904_v35 = vadd.f32 %v4805_v34, %v4696_v43 }
 0x394   :  { %v4900_v48 = vadd.f32 1.0, %v2680_v2  ;;  %v2125_v60 = vmul.f32 %v4846_v39, %v2124_v33  ;;  %v2589_v13 = vmul.f32 %v2588_v27, %v4760_v46  ;;  %v4908_v63 = vadd.f32 1.0, %v2600_v15 }
 0x395   :  { %5729 = vst [vmem:[#allocation22_spill] sm:$0xff] %v4904_v35  ;;  %v2667_v14 = vmul.f32 %v2666_v51, %v4808_v58  ;;  %v2109_v56 = vmul.f32 %v2108_v36, %v4726_v49  ;;  %v2143_v7 = vmul.f32 %v2142_v30, %v4788_v45  ;;  %v2623_v52 = vmul.f32 %v2622_v3, %v4755_v8 }
 0x396   :  { %2967 = vrcp.f32 %v4900_v48  ;;  %vm2572_vm7 = vcmp.eq.f32.partialorder %v2571_v26, 8.507059e+37  ;;  %v2158_v2 = vmul.f32 %v2157_v28, %v4788_v45  ;;  %v2193_v43 = vadd.f32 0.001143296, %v2192_v47 }
 0x397   :  { %2969 = vrcp.f32 %v4894_v37  ;;  %v2575_v46 = vsel %vm2572_vm7, %v2574_v6, %v2570_v22  ;;  %vm2128_vm9 = vweird.f32 %v4846_v39  ;;  %v4921_v51 = vmul.f32 0.5, %v4735_v19 }
 0x398   :  { %v4917_v34 = vpop.f32.mrf.mxu2  ;;  %v4924_v49 = vmul.f32 0.70710677, %v4904_v35  ;;  %v4927_v27 = vadd.f32 %v4846_v39, %v2125_v60  ;;  %v2590_v26 = vadd.f32 1.1283791, %v2589_v13  ;;  %2971 = vrcp.f32 %v4908_v63 }
 0x399   :  { %v2668_v57 = vadd.f32 0.18741608, %v2667_v14  ;;  %v2551_v38 = vmul.f32 %v2550_v40, %v4706_v0  ;;  %v4931_v33 = vadd.f32 1.1283791, %v2109_v56  ;;  %v2144_v15 = vadd.f32 0.0036580483, %v2143_v7 }
 0x39a   :  { %5730 = vst [vmem:[#allocation17_spill] sm:$0xff] %v4924_v49  ;;  %v2624_v36 = vadd.f32 0.0036580483, %v2623_v52  ;;  %vm2127_vm10 = vweird.f32 %v4811_v17  ;;  %v2159_v30 = vadd.f32 0.4994258, %v2158_v2  ;;  %v2194_v3 = vmul.f32 %v2193_v43, %v4869_v54 }
 0x39b   :  { %5731 = vst [vmem:[#allocation21_spill] sm:$0xff] %v4927_v27  ;;  %v4936_v47 = vmul.f32 %v2575_v46, %v2551_v38  ;;  %vm4940_vm11 = vmor %vm2127_vm10, %vm2128_vm9  ;;  %v5733_v13 = vmov 0  ;;  %v2219_v56 = vmul.f32 %v4924_v49, %v4924_v49  ;;  %v4948_v40 = vadd.f32 %v1997_v55, %v4686_v32 }
 0x39c   :  { %5732 = vst [vmem:[#allocation15_spill] sm:$0xff] %v4931_v33  ;;  %v2968_v28 = vpop.eup %2967  ;;  %v5734_v13 = vsel %vm4940_vm11, 4294967295, %v5733_v13  ;;  %v4957_v60 = vmul.f32 %v2590_v26, %v4747_v10  ;;  %v2669_v14 = vmul.f32 %v2668_v57, %v4808_v58  ;;  %v2613_v52 = vand.u32 2147483648, %v4908_v63 }
 0x39d   :  { %5735 = vst [vmem:[#allocation6_spill] sm:$0xff] %v5734_v13  ;;  %v4950_v22 = vpop.eup %2969  ;;  %v2683_v7 = vmul.f32 %v2968_v28, %v4900_v48  ;;  %v2145_v2 = vmul.f32 %v2144_v15, %v4788_v45  ;;  %v2625_v32 = vmul.f32 %v2624_v36, %v4755_v8  ;;  %v2181_v55 = vmul.f32 2.1237322e-06, %v4869_v54 }
 0x39e   :  { %5736 = vst [vmem:[#allocation23_spill] sm:$0xff] %v4948_v40  ;;  %v4965_v43 = vpop.eup %2971  ;;  %v2160_v46 = vmul.f32 %v2159_v30, %v4788_v45  ;;  %v2195_v38 = vadd.f32 0.014752088, %v2194_v3  ;;  %v4970_v10 = vadd.f32 %v4830_v21, %v4737_v24  ;;  %v2643_v58 = vmul.f32 %v4950_v22, %v4894_v37 }
 0x39f   :  { %v2684_v6 = vsub.f32 1.0, %v2683_v7  ;;  %v2693_v26 = vand.u32 2147483648, %v4900_v48  ;;  %v4975_v57 = vmin.f32 %v2219_v56, 16.0  ;;  %v4978_v15 = vmul.f32 0.70710677, %v4948_v40 }
 0x3a0   :  { %5737 = vst [vmem:[#allocation24_spill] sm:$0xff] %v4970_v10  ;;  %v2670_v36 = vadd.f32 1.1283791, %v2669_v14  ;;  %vm2688_vm12 = vweird.f32 %v2968_v28  ;;  %v2691_v30 = vand.u32 2147483647, %v4900_v48  ;;  %v2003_v3 = vpop.f32.mrf.mxu2  ;;  %v2603_v24 = vmul.f32 %v4965_v43, %v4908_v63 }
 0x3a1   :  { %v2685_v0 = vmul.f32 %v2968_v28, %v2684_v6  ;;  %v2146_v21 = vadd.f32 0.05243302, %v2145_v2  ;;  %v2626_v7 = vadd.f32 0.05243302, %v2625_v32  ;;  %v2182_v19 = vadd.f32 0.00028619796, %v2181_v55 }
 0x3a2   :  { %v2196_v18 = vmul.f32 %v2195_v38, %v4869_v54  ;;  %vm2687_vm14 = vweird.f32 %v4900_v48  ;;  %v4986_v56 = vmul.f32 0.70710677, %v4970_v10  ;;  %v4988_v14 = vadd.f32 1.0, %v2160_v46 }
 0x3a3   :  { %v2686_v31 = vadd.f32 %v2968_v28, %v2685_v0  ;;  %v2644_v6 = vsub.f32 1.0, %v2643_v58  ;;  %vm2689_vm0 = vmor %vm2687_vm14, %vm2688_vm12  ;;  %v2694_v35 = vor.u32 1.1754944e-38, %v2693_v26  ;;  %v2232_v40 = vmul.f32 3.8918573e-05, %v4975_v57 }
 0x3a4   :  { %v2671_v53 = vmul.f32 %v2670_v36, %v4794_v1  ;;  %vm2692_vm15 = vcmp.eq.f32.partialorder %v2691_v30, 8.507059e+37  ;;  %v2299_v32 = vmul.f32 %v4978_v15, %v4978_v15  ;;  %v2627_v0 = vmul.f32 %v2626_v7, %v4755_v8 }
 0x3a5   :  { %v2690_v2 = vsel %vm2689_vm0, %v2968_v28, %v2686_v31  ;;  %v2183_v48 = vmul.f32 %v2182_v19, %v4869_v54  ;;  %v4997_v46 = vadd.f32 %v2003_v3, %v4728_v44  ;;  %v2611_v38 = vand.u32 2147483647, %v4908_v63 }
 0x3a6   :  { %v2695_v55 = vsel %vm2692_vm15, %v2694_v35, %v2690_v2  ;;  %v2197_v58 = vadd.f32 0.112945676, %v2196_v18  ;;  %v2259_v1 = vmul.f32 %v4986_v56, %v4986_v56  ;;  %v2604_v31 = vsub.f32 1.0, %v2603_v24 }
 0x3a7   :  { %5738 = vst [vmem:[#allocation25_spill] sm:$0xff] %v4997_v46  ;;  %v2696_v26 = vmul.f32 %v2695_v55, %v2671_v53  ;;  %v5002_v28 = vor.u32 1.1754944e-38, %v2613_v52  ;;  %v2645_v36 = vmul.f32 %v4950_v22, %v2644_v6  ;;  %v5007_v30 = vadd.f32 %v4917_v34, %v4692_v62 }
 0x3a8   :  { %2973 = vrcp.f32 %v4988_v14  ;;  %v2233_v35 = vadd.f32 0.001143296, %v2232_v40  ;;  %v5010_v19 = vmin.f32 %v2299_v32, 16.0  ;;  %v2147_v18 = vmul.f32 %v2146_v21, %v4788_v45  ;;  %v2006_v34 = vpop.f32.mrf.mxu2 }
 0x3a9   :  { %5739 = vst [vmem:[#allocation26_spill] sm:$0xff] %v5007_v30  ;;  %v2859_v44 = vclamps-f32 %v2696_v26, 1.0  ;;  %v2628_v53 = vadd.f32 0.18741608, %v2627_v0  ;;  %v2184_v3 = vadd.f32 0.0036580483, %v2183_v48  ;;  %v2198_v52 = vmul.f32 %v2197_v58, %v4869_v54 }
 0x3aa   :  { %v5014_v24 = vmul.f32 0.70710677, %v4997_v46  ;;  %v2042_v7 = vmul.f32 0.5, %v4784_v9  ;;  %v5018_v62 = vmin.f32 %v2259_v1, 16.0  ;;  %v2605_v2 = vmul.f32 %v4965_v43, %v2604_v31 }
 0x3ab   :  { %v2714_v6 = vadd.f32 1.0, %v2859_v44  ;;  %vm2607_vm1 = vweird.f32 %v4908_v63  ;;  %v2646_v40 = vadd.f32 %v4950_v22, %v2645_v36  ;;  %vm2648_vm13 = vweird.f32 %v4950_v22 }
 0x3ac   :  { %v5025_v21 = vmul.f32 0.70710677, %v5007_v30  ;;  %vm2608_vm2 = vweird.f32 %v4965_v43  ;;  %v2234_v9 = vmul.f32 %v2233_v35, %v4975_v57  ;;  %v2312_v0 = vmul.f32 3.8918573e-05, %v5010_v19 }
 0x3ad   :  { %v2730_v32 = vmul.f32 %v2714_v6, %v2042_v7  ;;  %v2629_v48 = vmul.f32 %v2628_v53, %v4755_v8  ;;  %vm2647_vm3 = vweird.f32 %v4894_v37  ;;  %v2653_v55 = vand.u32 2147483648, %v4894_v37  ;;  %vm5071_vm7 = vmor %vm2607_vm1, %vm2608_vm2 }
 0x3ae   :  { %v2379_v58 = vmul.f32 %v5014_v24, %v5014_v24  ;;  %v5035_v26 = vpop.eup %2973  ;;  %vm5037_vm4 = vmor %vm2647_vm3, %vm2648_vm13  ;;  %v2651_v31 = vand.u32 2147483647, %v4894_v37  ;;  %v2185_v36 = vmul.f32 %v2184_v3, %v4869_v54  ;;  %v2199_v44 = vadd.f32 0.4994258, %v2198_v52 }
 0x3af   :  { %5740 = vst [vmem:[#allocation27_spill] sm:$0xff] %v5035_v26  ;;  %v2272_v8 = vmul.f32 3.8918573e-05, %v5018_v62  ;;  %2738 = vmatpush.msra.mxu3 %v2730_v32  ;;  %v2606_v35 = vadd.f32 %v4965_v43, %v2605_v2  ;;  %v2148_v53 = vadd.f32 0.18741608, %v2147_v18  ;;  %v2650_v7 = vsel %vm5037_vm4, %v4950_v22, %v2646_v40 }
 0x3b0   :  { %v2339_v6 = vmul.f32 %v5025_v21, %v5025_v21  ;;  %vm5050_vm5 = vcmp.eq.f32.partialorder %v2611_v38, 8.507059e+37  ;;  %v2221_v37 = vmul.f32 2.1237322e-06, %v4975_v57  ;;  %v2235_v3 = vadd.f32 0.014752088, %v2234_v9 }
 0x3b1   :  { %v2313_v52 = vadd.f32 0.001143296, %v2312_v0  ;;  %v5056_v32 = vadd.f32 %v2006_v34, %v4684_v41  ;;  %v2163_v18 = vmul.f32 %v5035_v26, %v4988_v14  ;;  %v2630_v2 = vadd.f32 1.1283791, %v2629_v48 }
 0x3b2   :  { %v2654_v1 = vor.u32 1.1754944e-38, %v2653_v55  ;;  %v5060_v22 = vmin.f32 %v2379_v58, 16.0  ;;  %vm2652_vm8 = vcmp.eq.f32.partialorder %v2651_v31, 8.507059e+37  ;;  %v2186_v40 = vadd.f32 0.05243302, %v2185_v36 }
 0x3b3   :  { %5745 = vst [vmem:[#allocation28_spill] sm:$0xff] %v5056_v32  ;;  %v2200_v38 = vmul.f32 %v2199_v44, %v4869_v54  ;;  %v2273_v20 = vadd.f32 0.001143296, %v2272_v8  ;;  %v2149_v30 = vmul.f32 %v2148_v53, %v4788_v45  ;;  %v2041_v9 = vmul.f32 0.5, %v4733_v25  ;;  %v2009_v25 = vpop.f32.mrf.mxu2 }
 0x3b4   :  { %v2655_v0 = vsel %vm2652_vm8, %v2654_v1, %v2650_v7  ;;  %v5065_v33 = vmin.f32 %v2339_v6, 16.0  ;;  %v2222_v34 = vadd.f32 0.00028619796, %v2221_v37  ;;  %v2236_v48 = vmul.f32 %v2235_v3, %v4975_v57 }
 0x3b5   :  { %v2314_v55 = vmul.f32 %v2313_v52, %v5010_v19  ;;  %v5078_v45 = vmul.f32 0.70710677, %v5056_v32  ;;  %v2610_v58 = vsel %vm5071_vm7, %v4965_v43, %v2606_v35  ;;  %v2164_v31 = vsub.f32 1.0, %v2163_v18 }
 0x3b6   :  { %v2631_v63 = vmul.f32 %v2630_v2, %v4741_v16  ;;  %v2392_v36 = vmul.f32 3.8918573e-05, %v5060_v22  ;;  %v2187_v44 = vmul.f32 %v2186_v40, %v4869_v54  ;;  %v5086_v8 = vadd.f32 1.0, %v2200_v38 }
 0x3b7   :  { %v2274_v53 = vmul.f32 %v2273_v20, %v5018_v62  ;;  %v2419_v7 = vmul.f32 %v5078_v45, %v5078_v45  ;;  %v5091_v6 = vadd.f32 1.1283791, %v2149_v30  ;;  %v2352_v3 = vmul.f32 3.8918573e-05, %v5065_v33 }
 0x3b8   :  { %v2656_v37 = vmul.f32 %v2655_v0, %v2631_v63  ;;  %v5095_v43 = vadd.f32 %v2009_v25, %v4688_v5  ;;  %v2223_v16 = vmul.f32 %v2222_v34, %v4975_v57  ;;  %v2237_v35 = vadd.f32 0.112945676, %v2236_v48 }
 0x3b9   :  { %5748 = vst [vmem:[#allocation29_spill] sm:$0xff] %v5091_v6  ;;  %v2261_v52 = vmul.f32 2.1237322e-06, %v5018_v62  ;;  %v2315_v18 = vadd.f32 0.014752088, %v2314_v55  ;;  %v2615_v20 = vsel %vm5050_vm5, %v5002_v28, %v2610_v58  ;;  %v5103_v1 = vmin.f32 %v2419_v7, 16.0 }
 0x3ba   :  { %5749 = vst [vmem:[#allocation30_spill] sm:$0xff] %v5095_v43  ;;  %v2393_v30 = vadd.f32 0.001143296, %v2392_v36  ;;  %v2165_v40 = vmul.f32 %v5035_v26, %v2164_v31  ;;  %v2188_v38 = vadd.f32 0.18741608, %v2187_v44  ;;  %2975 = vrcp.f32 %v5086_v8 }
 0x3bb   :  { %v2275_v5 = vadd.f32 0.014752088, %v2274_v53  ;;  %vm2167_vm9 = vweird.f32 %v4988_v14  ;;  %v2353_v0 = vadd.f32 0.001143296, %v2352_v3  ;;  %v5109_v41 = vmul.f32 0.70710677, %v5095_v43 }
 0x3bc   :  { %v2858_v34 = vclamps-f32 %v2656_v37, 1.0  ;;  %v2224_v10 = vadd.f32 0.0036580483, %v2223_v16  ;;  %v2238_v28 = vmul.f32 %v2237_v35, %v4975_v57  ;;  %v2262_v48 = vadd.f32 0.00028619796, %v2261_v52 }
 0x3bd   :  { %v2316_v55 = vmul.f32 %v2315_v18, %v5010_v19  ;;  %v2616_v25 = vmul.f32 %v2615_v20, %v4957_v60  ;;  %v2394_v31 = vmul.f32 %v2393_v30, %v5060_v22  ;;  %v2432_v63 = vmul.f32 3.8918573e-05, %v5103_v1 }
 0x3be   :  { %v5118_v36 = vadd.f32 %v5035_v26, %v2165_v40  ;;  %vm2168_vm10 = vweird.f32 %v5035_v26  ;;  %v2189_v44 = vmul.f32 %v2188_v38, %v4869_v54  ;;  %v2276_v53 = vmul.f32 %v2275_v5, %v5018_v62 }
 0x3bf   :  { %v2354_v7 = vmul.f32 %v2353_v0, %v5065_v33  ;;  %v2433_v37 = vadd.f32 0.001143296, %v2432_v63  ;;  %v2459_v60 = vmul.f32 %v5109_v41, %v5109_v41  ;;  %v2713_v3 = vadd.f32 1.0, %v2858_v34  ;;  %vm5132_vm12 = vmor %vm2167_vm9, %vm2168_vm10 }
 0x3c0   :  { %5750 = vst [vmem:[#allocation31_spill] sm:$0xff] %v5118_v36  ;;  %v5126_v16 = vpop.eup %2975  ;;  %v2225_v35 = vmul.f32 %v2224_v10, %v4975_v57  ;;  %v2239_v52 = vadd.f32 0.4994258, %v2238_v28  ;;  %v2263_v18 = vmul.f32 %v2262_v48, %v5018_v62  ;;  %v2317_v20 = vadd.f32 0.112945676, %v2316_v55 }
 0x3c1   :  { %v5751_v54 = vmov 0  ;;  %v2301_v30 = vmul.f32 2.1237322e-06, %v5010_v19  ;;  %v2395_v40 = vadd.f32 0.014752088, %v2394_v31  ;;  %v2434_v38 = vmul.f32 %v2433_v37, %v5103_v1 }
 0x3c2   :  { %v5752_v54 = vsel %vm5132_vm12, 4294967295, %v5751_v54  ;;  %v2729_v5 = vmul.f32 %v2713_v3, %v2041_v9  ;;  %v5142_v34 = vadd.f32 1.1283791, %v2189_v44  ;;  %v2277_v28 = vadd.f32 0.112945676, %v2276_v53 }
 0x3c3   :  { %5753 = vst [vmem:[#allocation32_spill] sm:$0xff] %v5752_v54  ;;  %v2203_v48 = vmul.f32 %v5126_v16, %v5086_v8  ;;  %v2355_v55 = vadd.f32 0.014752088, %v2354_v7  ;;  %v5147_v63 = vmin.f32 %v2459_v60, 16.0  ;;  %v2857_v31 = vclamps-f32 %v2616_v25, 1.0 }
 0x3c4   :  { %5754 = vst [vmem:[#allocation33_spill] sm:$0xff] %v5142_v34  ;;  %2739 = vmatpush.msra.mxu3 %v2729_v5  ;;  %v2226_v37 = vadd.f32 0.05243302, %v2225_v35  ;;  %v2240_v9 = vmul.f32 %v2239_v52, %v4975_v57  ;;  %v2318_v3 = vmul.f32 %v2317_v20, %v5010_v19  ;;  %v2435_v58 = vadd.f32 0.014752088, %v2434_v38 }
 0x3c5   :  { %v2213_v44 = vand.u32 2147483648, %v5086_v8  ;;  %v2264_v0 = vadd.f32 0.0036580483, %v2263_v18  ;;  %v2302_v2 = vadd.f32 0.00028619796, %v2301_v30  ;;  %v2396_v53 = vmul.f32 %v2395_v40, %v5060_v22 }
 0x3c6   :  { %v2278_v10 = vmul.f32 %v2277_v28, %v5018_v62  ;;  %v2341_v7 = vmul.f32 2.1237322e-06, %v5065_v33  ;;  %v2381_v60 = vmul.f32 2.1237322e-06, %v5060_v22  ;;  %v2436_v25 = vmul.f32 %v2435_v58, %v5103_v1 }
 0x3c7   :  { %v2356_v35 = vmul.f32 %v2355_v55, %v5065_v33  ;;  %v2472_v52 = vmul.f32 3.8918573e-05, %v5147_v63  ;;  %v2712_v20 = vadd.f32 1.0, %v2857_v31  ;;  %v2856_v38 = vclamps-f32 %v4936_v47, 1.0 }
 0x3c8   :  { %v2204_v5 = vsub.f32 1.0, %v2203_v48  ;;  %v2227_v18 = vmul.f32 %v2226_v37, %v4975_v57  ;;  %v5161_v30 = vadd.f32 1.0, %v2240_v9  ;;  %v2319_v40 = vadd.f32 0.4994258, %v2318_v3 }
 0x3c9   :  { %v2265_v28 = vmul.f32 %v2264_v0, %v5018_v62  ;;  %v2397_v12 = vadd.f32 0.112945676, %v2396_v53  ;;  %v2473_v11 = vadd.f32 0.001143296, %v2472_v52  ;;  %v2728_v29 = vmul.f32 %v2712_v20, %v4921_v51  ;;  %v2012_v53 = vpop.f32.mrf.mxu2 }
 0x3ca   :  { %v2279_v58 = vadd.f32 0.4994258, %v2278_v10  ;;  %v2303_v55 = vmul.f32 %v2302_v2, %v5010_v19  ;;  %v2437_v23 = vadd.f32 0.112945676, %v2436_v25  ;;  %v2711_v46 = vadd.f32 1.0, %v2856_v38 }
 0x3cb   :  { %v2342_v31 = vadd.f32 0.00028619796, %v2341_v7  ;;  %v2357_v6 = vadd.f32 0.112945676, %v2356_v35  ;;  %v2382_v47 = vadd.f32 0.00028619796, %v2381_v60  ;;  %v2474_v48 = vmul.f32 %v2473_v11, %v5147_v63  ;;  %2740 = vmatpush.msra.mxu3 %v2728_v29 }
 0x3cc   :  { %v2205_v37 = vmul.f32 %v5126_v16, %v2204_v5  ;;  %v2228_v9 = vadd.f32 0.18741608, %v2227_v18  ;;  %2977 = vrcp.f32 %v5161_v30  ;;  %v2320_v0 = vmul.f32 %v2319_v40, %v5010_v19 }
 0x3cd   :  { %v2266_v3 = vadd.f32 0.05243302, %v2265_v28  ;;  %v2398_v51 = vmul.f32 %v2397_v12, %v5060_v22  ;;  %v2475_v10 = vadd.f32 0.014752088, %v2474_v48  ;;  %v2727_v2 = vmul.f32 %v2711_v46, %v4840_v61 }
 0x3ce   :  { %v2280_v7 = vmul.f32 %v2279_v58, %v5018_v62  ;;  %v2304_v60 = vadd.f32 0.0036580483, %v2303_v55  ;;  %v2438_v11 = vmul.f32 %v2437_v23, %v5103_v1  ;;  %v5175_v29 = vadd.f32 %v2012_v53, %v4715_v4 }
 0x3cf   :  { %vm2207_vm14 = vweird.f32 %v5086_v8  ;;  %v2343_v25 = vmul.f32 %v2342_v31, %v5065_v33  ;;  %v2358_v35 = vmul.f32 %v2357_v6, %v5065_v33  ;;  %v2383_v12 = vmul.f32 %v2382_v47, %v5060_v22  ;;  %2741 = vmatpush.msra.mxu3 %v2727_v2 }
 0x3d0   :  { %v2476_v52 = vmul.f32 %v2475_v10, %v5147_v63  ;;  %v5182_v61 = vor.u32 1.1754944e-38, %v2213_v44  ;;  %v5184_v46 = vadd.f32 1.0, %v2320_v0  ;;  %v2421_v23 = vmul.f32 2.1237322e-06, %v5103_v1 }
 0x3d1   :  { %v2461_v4 = vmul.f32 2.1237322e-06, %v5147_v63  ;;  %vm2208_vm0 = vweird.f32 %v5126_v16  ;;  %v2399_v20 = vadd.f32 0.4994258, %v2398_v51  ;;  %v5190_v5 = vmul.f32 0.70710677, %v5175_v29 }
 0x3d2   :  { %v2477_v38 = vadd.f32 0.112945676, %v2476_v52  ;;  %v5192_v6 = vpop.eup %2977  ;;  %v5195_v18 = vadd.f32 %v5126_v16, %v2205_v37  ;;  %v5197_v44 = vadd.f32 1.0, %v2280_v7  ;;  %v2305_v40 = vmul.f32 %v2304_v60, %v5010_v19  ;;  %vm5220_vm15 = vmor %vm2207_vm14, %vm2208_vm0 }
 0x3d3   :  { %v2439_v28 = vadd.f32 0.4994258, %v2438_v11  ;;  %v2229_v58 = vmul.f32 %v2228_v9, %v4975_v57  ;;  %v2344_v55 = vadd.f32 0.0036580483, %v2343_v25  ;;  %v2359_v31 = vadd.f32 0.4994258, %v2358_v35 }
 0x3d4   :  { %v2384_v47 = vadd.f32 0.0036580483, %v2383_v12  ;;  %v2267_v48 = vmul.f32 %v2266_v3, %v5018_v62  ;;  %v2462_v0 = vadd.f32 0.00028619796, %v2461_v4  ;;  %v2478_v51 = vmul.f32 %v2477_v38, %v5147_v63  ;;  %v5828_v35 = vld [vmem:[#allocation11_spill] sm:$0xff] }
 0x3d5   :  { %v2499_v10 = vmul.f32 %v5190_v5, %v5190_v5  ;;  %v2243_v37 = vmul.f32 %v5192_v6, %v5161_v30  ;;  %2979 = vrcp.f32 %v5184_v46  ;;  %v2400_v2 = vmul.f32 %v2399_v20, %v5060_v22 }
 0x3d6   :  { %v2422_v53 = vadd.f32 0.00028619796, %v2421_v23  ;;  %v2306_v57 = vadd.f32 0.05243302, %v2305_v40  ;;  %v2440_v9 = vmul.f32 %v2439_v28, %v5103_v1  ;;  %v2479_v7 = vadd.f32 0.4994258, %v2478_v51 }
 0x3d7   :  { %v5210_v60 = vmin.f32 %v2499_v10, 16.0  ;;  %2981 = vrcp.f32 %v5197_v44  ;;  %v2345_v3 = vmul.f32 %v2344_v55, %v5065_v33  ;;  %v2360_v11 = vmul.f32 %v2359_v31, %v5065_v33 }
 0x3d8   :  { %v2385_v25 = vmul.f32 %v2384_v47, %v5060_v22  ;;  %v2463_v12 = vmul.f32 %v2462_v0, %v5147_v63  ;;  %v2480_v52 = vmul.f32 %v2479_v7, %v5147_v63  ;;  %v2244_v38 = vsub.f32 1.0, %v2243_v37 }
 0x3d9   :  { %v2501_v23 = vmul.f32 2.1237322e-06, %v5210_v60  ;;  %v2512_v4 = vmul.f32 3.8918573e-05, %v5210_v60  ;;  %v5232_v40 = vadd.f32 1.0, %v2400_v2  ;;  %v2423_v28 = vmul.f32 %v2422_v53, %v5103_v1 }
 0x3da   :  { %v5235_v55 = vadd.f32 1.0, %v2440_v9  ;;  %v5237_v31 = vadd.f32 1.0, %v2480_v52  ;;  %v5241_v10 = vadd.f32 1.1283791, %v2229_v58  ;;  %v2268_v7 = vadd.f32 0.18741608, %v2267_v48 }
 0x3db   :  { %v2502_v47 = vadd.f32 0.00028619796, %v2501_v23  ;;  %v2513_v0 = vadd.f32 0.001143296, %v2512_v4  ;;  %v5239_v51 = vpop.eup %2979  ;;  %v2307_v59 = vmul.f32 %v2306_v57, %v5010_v19  ;;  %v2386_v27 = vadd.f32 0.05243302, %v2385_v25 }
 0x3dc   :  { %5757 = vst [vmem:[#allocation34_spill] sm:$0xff] %v5241_v10  ;;  %v2346_v20 = vadd.f32 0.05243302, %v2345_v3  ;;  %v5244_v37 = vadd.f32 1.0, %v2360_v11  ;;  %v2464_v2 = vadd.f32 0.0036580483, %v2463_v12  ;;  %2983 = vrcp.f32 %v5237_v31 }
 0x3dd   :  { %v5247_v53 = vpop.eup %2981  ;;  %2985 = vrcp.f32 %v5232_v40  ;;  %v2424_v9 = vadd.f32 0.0036580483, %v2423_v28  ;;  %v2503_v52 = vmul.f32 %v2502_v47, %v5210_v60  ;;  %v2514_v58 = vmul.f32 %v2513_v0, %v5210_v60 }
 0x3de   :  { %v2245_v48 = vmul.f32 %v5192_v6, %v2244_v38  ;;  %vm2247_vm1 = vweird.f32 %v5161_v30  ;;  %v2323_v57 = vmul.f32 %v5239_v51, %v5184_v46  ;;  %2987 = vrcp.f32 %v5235_v55 }
 0x3df   :  { %v2269_v3 = vmul.f32 %v2268_v7, %v5018_v62  ;;  %v2308_v11 = vadd.f32 0.18741608, %v2307_v59  ;;  %v2387_v25 = vmul.f32 %v2386_v27, %v5060_v22  ;;  %v2515_v12 = vadd.f32 0.014752088, %v2514_v58 }
 0x3e0   :  { %v2283_v4 = vmul.f32 %v5247_v53, %v5197_v44  ;;  %v2347_v38 = vmul.f32 %v2346_v20, %v5065_v33  ;;  %v2465_v28 = vmul.f32 %v2464_v2, %v5147_v63  ;;  %2989 = vrcp.f32 %v5244_v37 }
 0x3e1   :  { %v2425_v47 = vmul.f32 %v2424_v9, %v5103_v1  ;;  %v2504_v0 = vadd.f32 0.0036580483, %v2503_v52  ;;  %v2516_v62 = vmul.f32 %v2515_v12, %v5210_v60  ;;  %v5270_v27 = vadd.f32 %v5192_v6, %v2245_v48 }
 0x3e2   :  { %v5267_v59 = vpop.eup %2983  ;;  %vm2248_vm13 = vweird.f32 %v5192_v6  ;;  %v2324_v58 = vsub.f32 1.0, %v2323_v57  ;;  %v5276_v2 = vadd.f32 1.1283791, %v2269_v3  ;;  %v2309_v9 = vmul.f32 %v2308_v11, %v5010_v19 }
 0x3e3   :  { %v5274_v20 = vpop.eup %2985  ;;  %v2388_v52 = vadd.f32 0.18741608, %v2387_v25  ;;  %v2284_v39 = vsub.f32 1.0, %v2283_v4  ;;  %v2466_v13 = vadd.f32 0.05243302, %v2465_v28  ;;  %vm5285_vm2 = vmor %vm2247_vm1, %vm2248_vm13  ;;  %v2483_v23 = vmul.f32 %v5267_v59, %v5237_v31 }
 0x3e4   :  { %v5280_v12 = vpop.eup %2987  ;;  %v2517_v32 = vadd.f32 0.112945676, %v2516_v62  ;;  %v2348_v3 = vadd.f32 0.18741608, %v2347_v38  ;;  %v2426_v7 = vadd.f32 0.05243302, %v2425_v47  ;;  %v2505_v19 = vmul.f32 %v2504_v0, %v5210_v60 }
 0x3e5   :  { %v2325_v25 = vmul.f32 %v5239_v51, %v2324_v58  ;;  %v2403_v4 = vmul.f32 %v5274_v20, %v5232_v40  ;;  %v5302_v38 = vadd.f32 1.1283791, %v2309_v9  ;;  %v2333_v47 = vand.u32 2147483648, %v5184_v46 }
 0x3e6   :  { %v2518_v28 = vmul.f32 %v2517_v32, %v5210_v60  ;;  %v5300_v62 = vpop.eup %2989  ;;  %v2389_v0 = vmul.f32 %v2388_v52, %v5060_v22  ;;  %v2443_v48 = vmul.f32 %v5280_v12, %v5235_v55  ;;  %v2285_v11 = vmul.f32 %v5247_v53, %v2284_v39 }
 0x3e7   :  { %vm2328_vm3 = vweird.f32 %v5239_v51  ;;  %v2467_v58 = vmul.f32 %v2466_v13, %v5147_v63  ;;  %v2349_v32 = vmul.f32 %v2348_v3, %v5065_v33  ;;  %v2427_v42 = vmul.f32 %v2426_v7, %v5103_v1 }
 0x3e8   :  { %v2519_v34 = vadd.f32 0.4994258, %v2518_v28  ;;  %v2484_v9 = vsub.f32 1.0, %v2483_v23  ;;  %v2506_v36 = vadd.f32 0.05243302, %v2505_v19  ;;  %v5314_v26 = vadd.f32 %v5239_v51, %v2325_v25 }
 0x3e9   :  { %v2363_v22 = vmul.f32 %v5300_v62, %v5244_v37  ;;  %v2404_v52 = vsub.f32 1.0, %v2403_v4  ;;  %vm2327_vm4 = vweird.f32 %v5184_v46  ;;  %v2331_v13 = vand.u32 2147483647, %v5184_v46 }
 0x3ea   :  { %v2520_v39 = vmul.f32 %v2519_v34, %v5210_v60  ;;  %v2390_v28 = vadd.f32 1.1283791, %v2389_v0  ;;  %v2444_v54 = vsub.f32 1.0, %v2443_v48  ;;  %v5322_v33 = vadd.f32 %v5247_v53, %v2285_v11  ;;  %vm5330_vm5 = vmor %vm2327_vm4, %vm2328_vm3 }
 0x3eb   :  { %v5324_v23 = vor.u32 1.1754944e-38, %v2333_v47  ;;  %v2468_v7 = vadd.f32 0.18741608, %v2467_v58  ;;  %v5334_v34 = vadd.f32 1.1283791, %v2349_v32  ;;  %v2485_v46 = vmul.f32 %v5267_v59, %v2484_v9 }
 0x3ec   :  { %v5326_v3 = vadd.f32 1.0, %v2520_v39  ;;  %v2428_v25 = vadd.f32 0.18741608, %v2427_v42  ;;  %v2507_v48 = vmul.f32 %v2506_v36, %v5210_v60  ;;  %v2364_v4 = vsub.f32 1.0, %v2363_v22 }
 0x3ed   :  { %v2405_v47 = vmul.f32 %v5274_v20, %v2404_v52  ;;  %v2371_v0 = vand.u32 2147483647, %v5244_v37  ;;  %v2373_v58 = vand.u32 2147483648, %v5244_v37  ;;  %v5347_v42 = vmul.f32 %v2390_v28, %v5014_v24 }
 0x3ee   :  { %2991 = vrcp.f32 %v5326_v3  ;;  %v2445_v32 = vmul.f32 %v5280_v12, %v2444_v54  ;;  %vm2407_vm8 = vweird.f32 %v5232_v40  ;;  %vm2408_vm7 = vweird.f32 %v5274_v20 }
 0x3ef   :  { %v2411_v36 = vand.u32 2147483647, %v5232_v40  ;;  %v2469_v9 = vmul.f32 %v2468_v7, %v5147_v63  ;;  %vm2367_vm9 = vweird.f32 %v5244_v37  ;;  %v2429_v22 = vmul.f32 %v2428_v25, %v5103_v1  ;;  %vm5381_vm14 = vmor %vm2407_vm8, %vm2408_vm7 }
 0x3f0   :  { %v2486_v52 = vadd.f32 %v5267_v59, %v2485_v46  ;;  %vm2488_vm10 = vweird.f32 %v5267_v59  ;;  %v2508_v24 = vadd.f32 0.18741608, %v2507_v48  ;;  %v2365_v54 = vmul.f32 %v5300_v62, %v2364_v4 }
 0x3f1   :  { %v2406_v39 = vadd.f32 %v5274_v20, %v2405_v47  ;;  %v2451_v28 = vand.u32 2147483647, %v5235_v55  ;;  %v2493_v11 = vand.u32 2147483648, %v5237_v31  ;;  %v2446_v63 = vadd.f32 %v5280_v12, %v2445_v32 }
 0x3f2   :  { %vm2448_vm0 = vweird.f32 %v5280_v12  ;;  %vm2487_vm1 = vweird.f32 %v5237_v31  ;;  %v2491_v1 = vand.u32 2147483647, %v5237_v31  ;;  %vm2368_vm3 = vweird.f32 %v5300_v62 }
 0x3f3   :  { %v2413_v25 = vand.u32 2147483648, %v5232_v40  ;;  %v2453_v46 = vand.u32 2147483648, %v5235_v55  ;;  %v2470_v48 = vadd.f32 1.1283791, %v2469_v9  ;;  %vm5373_vm4 = vmor %vm2487_vm1, %vm2488_vm10  ;;  %vm2447_vm13 = vweird.f32 %v5235_v55 }
 0x3f4   :  { %v2992_v7 = vpop.eup %2991  ;;  %v2490_v47 = vsel %vm5373_vm4, %v5267_v59, %v2486_v52  ;;  %v2509_v32 = vmul.f32 %v2508_v24, %v5210_v60  ;;  %vm5391_vm10 = vcmp.eq.f32.partialorder %v2331_v13, 8.507059e+37  ;;  %v2366_v40 = vadd.f32 %v5300_v62, %v2365_v54  ;;  %vm5401_vm8 = vmor %vm2447_vm13, %vm2448_vm0 }
 0x3f5   :  { %v2523_v9 = vmul.f32 %v2992_v7, %v5326_v3  ;;  %v2410_v10 = vsel %vm5381_vm14, %v5274_v20, %v2406_v39  ;;  %v2430_v49 = vadd.f32 1.1283791, %v2429_v22  ;;  %v2494_v60 = vor.u32 1.1754944e-38, %v2493_v11  ;;  %vm5415_vm0 = vmor %vm2367_vm9, %vm2368_vm3 }
 0x3f6   :  { %v2450_v59 = vsel %vm5401_vm8, %v5280_v12, %v2446_v63  ;;  %vm2452_vm7 = vcmp.eq.f32.partialorder %v2451_v28, 8.507059e+37  ;;  %vm2492_vm1 = vcmp.eq.f32.partialorder %v2491_v1, 8.507059e+37  ;;  %v2454_v52 = vor.u32 1.1754944e-38, %v2453_v46  ;;  %v5804_v1 = vld [vmem:[#allocation16_spill] sm:$0xff] }
 0x3f7   :  { %v2524_v13 = vsub.f32 1.0, %v2523_v9  ;;  %v2471_v24 = vmul.f32 %v2470_v48, %v5109_v41  ;;  %v2495_v54 = vsel %vm2492_vm1, %v2494_v60, %v2490_v47  ;;  %v2533_v20 = vand.u32 2147483648, %v5326_v3 }
 0x3f8   :  { %v2510_v22 = vadd.f32 1.1283791, %v2509_v32  ;;  %vm2528_vm14 = vweird.f32 %v2992_v7  ;;  %v2531_v4 = vand.u32 2147483647, %v5326_v3  ;;  %vm2412_vm13 = vcmp.eq.f32.partialorder %v2411_v36, 8.507059e+37 }
 0x3f9   :  { %v2525_v39 = vmul.f32 %v2992_v7, %v2524_v13  ;;  %v2414_v11 = vor.u32 1.1754944e-38, %v2413_v25  ;;  %v2431_v41 = vmul.f32 %v2430_v49, %v5078_v45  ;;  %v2455_v28 = vsel %vm2452_vm7, %v2454_v52, %v2450_v59 }
 0x3fa   :  { %v5772_v63 = vand.u32 2147483647, %v5086_v8  ;;  %v2370_v46 = vsel %vm5415_vm0, %v5300_v62, %v2366_v40  ;;  %v2496_v37 = vmul.f32 %v2495_v54, %v2471_v24  ;;  %vm2527_vm9 = vweird.f32 %v5326_v3  ;;  %v5820_v40 = vld [vmem:[#allocation12_spill] sm:$0xff] }
 0x3fb   :  { %v2526_v48 = vadd.f32 %v2992_v7, %v2525_v39  ;;  %vm2372_vm3 = vcmp.eq.f32.partialorder %v2371_v0, 8.507059e+37  ;;  %v2374_v36 = vor.u32 1.1754944e-38, %v2373_v58  ;;  %v2415_v25 = vsel %vm2412_vm13, %v2414_v11, %v2410_v10  ;;  %vm2529_vm8 = vmor %vm2527_vm9, %vm2528_vm14  ;;  %v5798_v11 = vld [vmem:[#allocation30_spill] sm:$0xff] }
 0x3fc   :  { %vm5422_vm4 = vcmp.eq.f32.partialorder %v5772_v63, 8.507059e+37  ;;  %v2534_v49 = vor.u32 1.1754944e-38, %v2533_v20  ;;  %v5775_v45 = vand.u32 2147483647, %v4988_v14  ;;  %vm5778_vm1 = vweird.f32 %v5247_v53 }
 0x3fd   :  { %vm5779_vm0 = vweird.f32 %v5197_v44  ;;  %v2456_v3 = vmul.f32 %v2455_v28, %v2431_v41  ;;  %v2511_v10 = vmul.f32 %v2510_v22, %v5190_v5  ;;  %v2530_v0 = vsel %vm2529_vm8, %v2992_v7, %v2526_v48  ;;  %v5801_v48 = vld [vmem:[#allocation27_spill] sm:$0xff] }
 0x3fe   :  { %vm5433_vm7 = vcmp.eq.f32.partialorder %v5775_v45, 8.507059e+37  ;;  %vm5441_vm6 = vmor %vm5779_vm0, %vm5778_vm1  ;;  %vm2532_vm14 = vcmp.eq.f32.partialorder %v2531_v4, 8.507059e+37  ;;  %v2351_v31 = vmul.f32 %v5334_v34, %v5025_v21  ;;  %v2375_v47 = vsel %vm2372_vm3, %v2374_v36, %v2370_v46  ;;  %v5805_v36 = vld [vmem:[#allocation33_spill] sm:$0xff]  ;;  %v5806_v45 = vld [vmem:[#allocation28_spill] sm:$0xff] }
 0x3ff   :  { %v2290_v58 = vsel %vm5441_vm6, %v5247_v53, %v5322_v33  ;;  %v2535_v32 = vsel %vm2532_vm14, %v2534_v49, %v2530_v0  ;;  %v5782_v9 = vand.u32 2147483647, %v4811_v17  ;;  %v5785_v5 = vsel %vm5330_vm5, %v5239_v51, %v5314_v26 }
 0x400   :  { %v2335_v53 = vsel %vm5391_vm10, %v5324_v23, %v5785_v5  ;;  %v2416_v33 = vmul.f32 %v2415_v25, %v5347_v42  ;;  %v2536_v21 = vmul.f32 %v2535_v32, %v2511_v10  ;;  %v2854_v34 = vclamps-f32 %v2496_v37, 1.0  ;;  %v5810_v32 = vld [vmem:[#allocation21_spill] sm:$0xff]  ;;  %v5812_v5 = vld [vmem:[#allocation14_spill] sm:$0xff] }
 0x401   :  { %vm5454_vm13 = vcmp.eq.f32.partialorder %v5782_v9, 8.507059e+37  ;;  %v5786_v7 = vand.u32 2147483647, %v5161_v30  ;;  %v5787_v55 = vand.u32 2147483648, %v5161_v30  ;;  %v5788_v59 = vand.u32 2147483648, %v5197_v44 }
 0x402   :  { %v2311_v26 = vmul.f32 %v5302_v38, %v4978_v15  ;;  %v5789_v51 = vand.u32 2147483647, %v4766_v50  ;;  %v5792_v23 = vand.u32 2147483647, %v5197_v44  ;;  %v2376_v42 = vmul.f32 %v2375_v47, %v2351_v31  ;;  %v5809_v47 = vld [vmem:[#allocation5_spill] sm:$0xff] }
 0x403   :  { %vm2252_vm6 = vcmp.eq.f32.partialorder %v5786_v7, 8.507059e+37  ;;  %v2254_v60 = vor.u32 1.1754944e-38, %v5787_v55  ;;  %v2294_v19 = vor.u32 1.1754944e-38, %v5788_v59  ;;  %v2855_v13 = vclamps-f32 %v2536_v21, 1.0 }
 0x404   :  { %vm5477_vm5 = vcmp.eq.f32.partialorder %v5789_v51, 8.507059e+37  ;;  %vm2292_vm10 = vcmp.eq.f32.partialorder %v5792_v23, 8.507059e+37  ;;  %v2853_v52 = vclamps-f32 %v2456_v3, 1.0  ;;  %v5793_v30 = vsel %vm5285_vm2, %v5192_v6, %v5270_v27  ;;  %v5797_v27 = vld [vmem:[#allocation34_spill] sm:$0xff] }
 0x405   :  { %v2255_v24 = vsel %vm2252_vm6, %v2254_v60, %v5793_v30  ;;  %v2271_v15 = vmul.f32 %v5276_v2, %v4986_v56  ;;  %v2295_v38 = vsel %vm2292_vm10, %v2294_v19, %v2290_v58  ;;  %v2336_v54 = vmul.f32 %v2335_v53, %v2311_v26  ;;  %v5796_v56 = vld [vmem:[#allocation17_spill] sm:$0xff]  ;;  %v5817_v19 = vld [vmem:[#allocation8_spill] sm:$0xff]  ;;  %v5818_v26 = vld [vmem:[#allocation19_spill] sm:$0xff] }
 0x406   :  { %v2038_v20 = vmul.f32 0.5, %v5175_v29  ;;  %v2710_v22 = vadd.f32 1.0, %v2855_v13  ;;  %v2709_v39 = vadd.f32 1.0, %v2854_v34  ;;  %v2852_v44 = vclamps-f32 %v2416_v33, 1.0  ;;  %v5813_v53 = vld [vmem:[#allocation29_spill] sm:$0xff]  ;;  %v5822_v30 = vld [vmem:[#allocation26_spill] sm:$0xff] }
 0x407   :  { %v5794_v4 = vand.u32 2147483648, %v4988_v14  ;;  %v5795_v57 = vsel %vm5220_vm15, %v5126_v16, %v5195_v18  ;;  %v2231_v2 = vmul.f32 %v5797_v27, %v5796_v56  ;;  %v2037_v29 = vmul.f32 0.5, %v5798_v11  ;;  %v5802_v16 = vld [vmem:[#allocation31_spill] sm:$0xff]  ;;  %v5814_v34 = vld [vmem:[#allocation25_spill] sm:$0xff]  ;;  %v5826_v27 = vld [vmem:[#allocation24_spill] sm:$0xff] }
 0x408   :  { %v2215_v6 = vsel %vm5422_vm4, %v5182_v61, %v5795_v57  ;;  %v2296_v41 = vmul.f32 %v2295_v38, %v2271_v15  ;;  %v2726_v28 = vmul.f32 %v2710_v22, %v2038_v20  ;;  %v2708_v63 = vadd.f32 1.0, %v2853_v52  ;;  %v5823_v20 = vld [vmem:[#allocation7_spill] sm:$0xff]  ;;  %v5824_v22 = vld [vmem:[#allocation9_spill] sm:$0xff] }
 0x409   :  { %v2174_v12 = vor.u32 1.1754944e-38, %v5794_v4  ;;  %v2851_v46 = vclamps-f32 %v2376_v42, 1.0  ;;  %v5799_v14 = vand.u32 2147483648, %v4811_v17  ;;  %v5803_v18 = vsel %vm5132_vm12, %v5801_v48, %v5802_v16  ;;  %v5821_v42 = vld [vmem:[#allocation15_spill] sm:$0xff] }
 0x40a   :  { %v2191_v25 = vmul.f32 %v5805_v36, %v5804_v1  ;;  %v2256_v49 = vmul.f32 %v2255_v24, %v2231_v2  ;;  %v2036_v62 = vmul.f32 0.5, %v5806_v45  ;;  %2742 = vmatpush.msra.mxu3 %v2726_v28  ;;  %v2725_v3 = vmul.f32 %v2709_v39, %v2037_v29  ;;  %v5825_v4 = vld [vmem:[#allocation23_spill] sm:$0xff]  ;;  %v5827_v28 = vld [vmem:[#allocation22_spill] sm:$0xff]  ;;  %v5830_v45 = vld [vmem:[#allocation13_spill] sm:$0xff] }
 0x40b   :  { %v2134_v37 = vor.u32 1.1754944e-38, %v5799_v14  ;;  %v2175_v61 = vsel %vm5433_vm7, %v2174_v12, %v5803_v18  ;;  %v2707_v10 = vadd.f32 1.0, %v2852_v44  ;;  %v2850_v0 = vclamps-f32 %v2336_v54, 1.0  ;;  %v5829_v1 = vld [vmem:[#allocation18_spill] sm:$0xff] }
 0x40c   :  { %v5807_v17 = vand.u32 2147483648, %v4766_v50  ;;  %v5811_v9 = vsel %vm4940_vm11, %v5809_v47, %v5810_v32  ;;  %v2151_v33 = vmul.f32 %v5813_v53, %v5812_v5  ;;  %v2216_v21 = vmul.f32 %v2215_v6, %v2191_v25  ;;  %2743 = vmatpush.msra.mxu3 %v2725_v3  ;;  %v5815_v50 = vld [vmem:[#allocation20_spill] sm:$0xff]  ;;  %v2736_v32 = vpop.permute.xlu0 %2735 }
 0x40d   :  { %v2135_v8 = vsel %vm5454_vm13, %v2134_v37, %v5811_v9  ;;  %v2035_v7 = vmul.f32 0.5, %v5814_v34  ;;  %v2724_v55 = vmul.f32 %v2708_v63, %v2036_v62  ;;  %v2706_v60 = vadd.f32 1.0, %v2851_v46  ;;  %v2731_v47 = vld [vmem:[%s5560_s7] sm:$0xff]  ;;  %s3026_s7 = smov [#allocation2]  }
 0x40e   :  { %v2094_v58 = vor.u32 1.1754944e-38, %v5807_v17  ;;  %v2849_v59 = vclamps-f32 %v2296_v41, 1.0  ;;  %vm5816_vm12 = vnez %v5815_v50  ;;  %v2111_v13 = vmul.f32 %v5821_v42, %v5820_v40  ;;  %s2784_s11 = sshll.u32 %s3026_s7, 4  ;;  %s2785_s11 = int_to_ptr.vmem [resolvable:$true] %s2784_s11 }
 0x40f   :  { %v5819_v51 = vsel %vm5816_vm12, %v5817_v19, %v5818_v26  ;;  %v2176_v52 = vmul.f32 %v2175_v61, %v2151_v33  ;;  %v2034_v24 = vmul.f32 0.5, %v5822_v30  ;;  %2744 = vmatpush.msra.mxu3 %v2724_v55  ;;  %v2723_v15 = vmul.f32 %v2707_v10, %v2035_v7 }
 0x410   :  { %v2095_v23 = vsel %vm5477_vm5, %v2094_v58, %v5819_v51  ;;  %v2705_v38 = vadd.f32 1.0, %v2850_v0  ;;  %v2848_v54 = vclamps-f32 %v2256_v49, 1.0  ;;  %v2071_v39 = vmul.f32 %v5824_v22, %v5823_v20  ;;  %v5831_v0 = vld [vmem:[#allocation10_spill] sm:$0xff] }
 0x411   :  { %v2136_v44 = vmul.f32 %v2135_v8, %v2111_v13  ;;  %v2033_v12 = vmul.f32 0.5, %v5825_v4  ;;  %2745 = vmatpush.msra.mxu3 %v2723_v15  ;;  %v2722_v57 = vmul.f32 %v2706_v60, %v2034_v24  ;;  %v2704_v43 = vadd.f32 1.0, %v2849_v59 }
 0x412   :  { %v2847_v6 = vclamps-f32 %v2216_v21, 1.0  ;;  %v2096_v56 = vmul.f32 %v2095_v23, %v2071_v39  ;;  %v2032_v2 = vmul.f32 0.5, %v5826_v27  ;;  %v2703_v29 = vadd.f32 1.0, %v2848_v54 }
 0x413   :  { %2746 = vmatpush.msra.mxu3 %v2722_v57  ;;  %v2721_v11 = vmul.f32 %v2705_v38, %v2033_v12  ;;  %v2846_v41 = vclamps-f32 %v2176_v52, 1.0  ;;  %v2031_v63 = vmul.f32 0.5, %v5827_v28  ;;  %v2845_v37 = vclamps-f32 %v2136_v44, 1.0 }
 0x414   :  { %v2720_v46 = vmul.f32 %v2704_v43, %v2032_v2  ;;  %v2702_v14 = vadd.f32 1.0, %v2847_v6  ;;  %v2030_v48 = vmul.f32 0.5, %v5828_v35  ;;  %v2844_v61 = vclamps-f32 %v2096_v56, 1.0 }
 0x415   :  { %2747 = vmatpush.msra.mxu3 %v2721_v11  ;;  %v2719_v16 = vmul.f32 %v2703_v29, %v2031_v63  ;;  %v2701_v18 = vadd.f32 1.0, %v2846_v41  ;;  %v2029_v36 = vmul.f32 0.5, %v5829_v1  ;;  %v2700_v49 = vadd.f32 1.0, %v2845_v37 }
 0x416   :  { %v2718_v25 = vmul.f32 %v2702_v14, %v2030_v48  ;;  %v2028_v62 = vmul.f32 0.5, %v5830_v45  ;;  %v2699_v10 = vadd.f32 1.0, %v2844_v61  ;;  %v2027_v17 = vmul.f32 0.5, %v5831_v0 }
 0x417   :  { %2748 = vmatpush.msra.mxu3 %v2720_v46  ;;  %v2717_v3 = vmul.f32 %v2701_v18, %v2029_v36  ;;  %v2758_v55 = vlaneseq }
 0x418   :  { %v2716_v58 = vmul.f32 %v2700_v49, %v2028_v62  ;;  %v2715_v31 = vmul.f32 %v2699_v10, %v2027_v17 }
 0x419   :  { %2749 = vmatpush.msra.mxu3 %v2719_v16  ;;  %v2759_v50 = vshrl.u32 %v2758_v55, 7 }
 0x41b   :  { %2750 = vmatpush.msra.mxu3 %v2718_v25  ;;  %vm2760_vm15 = vcmp.lt.s32.totalorder %v2759_v50, 4 }
 0x41d   :  { %2751 = vmatpush.msra.mxu3 %v2717_v3 }
 0x41f   :  { %2752 = vmatpush.msra.mxu3 %v2716_v58 }
 0x421   :  { %2753 = vmatpush.msra.mxu3 %v2715_v31 }
 0x422   :  { %2754 = vmatmul.f32.vlgmr.msra.gmra.mxu3 %v2731_v47 }
 0x4a5   :  { %v2755_v9 = vpop.f32.mrf.mxu3 }
 0x4a6   :  { %v2756_v8 = vadd.f32 %v2755_v9, %v2736_v32 }
 0x4a8   :  { %v2763_v5 = vand.u32 2147483647, %v2756_v8  ;;  %v2762_v23 = vmax.f32 %v2756_v8, 0.0 }
 0x4aa   :  { %v2764_v53 = vsub.f32 0.0, %v2763_v5 }
 0x4ac   :  { %v2765_v33 = vmul.f32 1.442695, %v2764_v53 }
 0x4ae   :  { %2993 = vpow2.f32 %v2765_v33 }
 0x4b4   :  { %v2994_v21 = vpop.eup %2993 }
 0x4b5   :  { %v2767_v34 = vadd.f32 1.0, %v2994_v21  ;;  %v2770_v7 = vmul.f32 -0.5, %v2994_v21  ;;  %v2773_v59 = vand.u32 2147483647, %v2994_v21 }
 0x4b7   :  { %2995 = vlog2.f32 %v2767_v34  ;;  %v2771_v60 = vadd.f32 1.0, %v2770_v7  ;;  %vm2774_vm11 = vcmp.lt.f32.partialorder %v2773_v59, 0.0004427343 }
 0x4b8   :  { %2997 = vtanh.f32 %v2756_v8 }
 0x4b9   :  { %v2772_v51 = vmul.f32 %v2994_v21, %v2771_v60 }
 0x4bd   :  { %v2996_v19 = vpop.eup %2995 }
 0x4be   :  { %v2769_v26 = vmul.f32 0.6931472, %v2996_v19  ;;  %v2998_v13 = vpop.eup %2997 }
 0x4c0   :  { %v2775_v40 = vsel %vm2774_vm11, %v2772_v51, %v2769_v26 }
 0x4c1   :  { %v2776_v42 = vadd.f32 %v2775_v40, %v2762_v23 }
 0x4c3   :  { %v2777_v52 = vsel %vm2760_vm15, %v2998_v13, %v2776_v42 }
 0x4c4   :  { %2778 = vst [vmem:[#allocation2] sm:$0xff] %v2777_v52 }
 0x4c5   :  { %2789 = dma.vmem_to_hbm [thread:$0]  %s2785_s11, 128, %s2787_s14, [#allocation3]  }
 0x4c6   :  { %3023 = dma.done.wait [#allocation3], 128  }
 0x4c7   :  { %3024 = vsyncadd [#allocation3], 4294967168 }
 0x4c8   :  { %2794 = vsyncpa [#allocation3], 1 }

</bundles_post_ra>
